<compile_context>
chip_gen: v5e
topology: v5e:2x2
jax: 0.10.0
libtpu: 0.0.40
codegen_flags: <defaults>
</compile_context>

<pallas_src>
import functools

import jax
import jax.numpy as jnp
from jax.experimental import pallas as pl
from jax.experimental.pallas import tpu as pltpu


# ------------------------------ Pallas kernel ------------------------------- #

def _bottleneck_kernel(x_ref, w1_ref, w2_ref, w3_ref, sb_ref, out_ref, y1_ref,
                       *, TH, W, compute_dtype):
    """Fused Bottleneck forward for one (batch, row-tile) grid point.

    x_ref  : (1, (H+2)*W, Cin)  VMEM  pixel-major padded image (zero row top/bot)
    w1_ref : (Cin, Cw)          VMEM  1x1 conv
    w2_ref : (9, Cw, Cw)        VMEM  3x3 conv, one (Cw,Cw) matrix per tap
    w3_ref : (Cw, Cout)         VMEM  1x1 conv
    sb_ref : (6, Cmax)          VMEM  rows = s1,b1,s2,b2,s3,b3 (folded BN)
    out_ref: (1, TH*W, Cout)    VMEM  pixel-major output row tile
    y1_ref : (rows, Cw)         VMEM  scratch: conv1 output for TH+2 rows
    """
    Cin = x_ref.shape[2]
    Cw = w1_ref.shape[1]
    Cout = w3_ref.shape[1]
    THW = TH * W
    SLAB = (TH + 2) * W          # conv1 rows computed per step (halo + interior)
    BASE = 8                     # scratch row where the slab starts (aligned)
    cdt = compute_dtype

    i = pl.program_id(1)
    s0 = pl.multiple_of(i * THW, THW)   # slab start (padded-flat pixel index)

    s1, b1 = sb_ref[0:1, :Cw], sb_ref[1:2, :Cw]
    s2, b2 = sb_ref[2:3, :Cw], sb_ref[3:4, :Cw]
    s3, b3 = sb_ref[4:5, :Cout], sb_ref[5:6, :Cout]

    # --- stage 1: fused 1x1 conv + BN + ReLU over interior + halo rows ------
    x_slab = x_ref[0, pl.ds(s0, SLAB), :]                      # ((TH+2)*W, Cin)
    y1 = jnp.dot(x_slab.astype(cdt), w1_ref[...],
                 preferred_element_type=jnp.float32)
    y1 = jnp.maximum(y1 * s1 + b1, 0.0)
    y1_ref[pl.ds(BASE, SLAB), :] = y1.astype(y1_ref.dtype)

    # Out-of-image halo rows must be ZERO for conv2 (BN bias of a zero input
    # is not zero), so re-zero them only at the image boundary tiles.
    @pl.when(i == 0)
    def _():
        y1_ref[pl.ds(BASE, W), :] = jnp.zeros((W, Cw), y1_ref.dtype)

    @pl.when(i == pl.num_programs(1) - 1)
    def _():
        y1_ref[pl.ds(BASE + (TH + 1) * W, W), :] = (
            jnp.zeros((W, Cw), y1_ref.dtype))

    # --- stage 2: 3x3 conv as 9 shifted ref reads + 9 MXU dots --------------
    # Output pixel m = t*W + c needs scratch row m + kh*W + (kw-1); the column
    # wrap-around (c+kw-1 outside [0,W)) is killed with per-kw row masks.
    col = jax.lax.broadcasted_iota(jnp.int32, (THW, 1), 0) % W

    def tap_dot(kh, kw):
        tap = y1_ref[pl.ds(BASE + kh * W + kw - 1, THW), :]
        return jnp.dot(tap.astype(cdt), w2_ref[kh * 3 + kw],
                       preferred_element_type=jnp.float32)

    acc = None
    for kw in range(3):
        part = tap_dot(0, kw) + tap_dot(1, kw) + tap_dot(2, kw)
        if kw == 0:
            part = jnp.where(col > 0, part, 0.0)
        elif kw == 2:
            part = jnp.where(col < W - 1, part, 0.0)
        acc = part if acc is None else acc + part
    y2 = jnp.maximum(acc * s2 + b2, 0.0)

    # --- stage 3: 1x1 conv + BN + residual add + ReLU -----------------------
    y3 = jnp.dot(y2.astype(cdt), w3_ref[...],
                 preferred_element_type=jnp.float32) * s3 + b3
    identity = x_ref[0, pl.ds(s0 + W, THW), :].astype(jnp.float32)
    out_ref[0] = jnp.maximum(y3 + identity, 0.0).astype(out_ref.dtype)


# ------------------------------ host wrapper -------------------------------- #

def bottleneck_forward(x_nchw, params, *, row_tile=32,
                       compute_dtype=jnp.bfloat16, out_dtype=None):
    """Bottleneck forward. x_nchw: (N, Cin, H, W), Cin == planes*4.

    compute_dtype: dtype of the MXU operands (bf16 by default on all TPU
    generations; BN/ReLU/residual math stays f32).  out_dtype defaults to the
    input dtype; pass jnp.bfloat16 to halve the output HBM writeback.
    """
    N, Cin, H, W = x_nchw.shape
    w1, w2, w3 = params["w1"], params["w2"], params["w3"]
    Cw = w1.shape[1]
    Cout = w3.shape[1]
    assert Cin == Cout, "identity path requires inplanes == planes*expansion"
    if out_dtype is None:
        out_dtype = x_nchw.dtype

    # Largest row tile that divides H (<= row_tile).
    TH = min(row_tile, H)
    while H % TH:
        TH -= 1
    NH = H // TH

    # NCHW -> pixel-major (N, (H+2)*W, C), one zero pad row top & bottom.
    x_hwc = jnp.transpose(x_nchw, (0, 2, 3, 1))
    x_pad = jnp.pad(x_hwc, ((0, 0), (1, 1), (0, 0), (0, 0)))
    x_flat = x_pad.reshape(N, (H + 2) * W, Cin)

    # Weights cast ONCE to the MXU operand dtype; 3x3 conv as 9 (Cw,Cw) mats.
    w1c = w1.astype(compute_dtype)
    w2c = w2.reshape(9, Cw, Cw).astype(compute_dtype)       # (kh,kw,in,out)
    w3c = w3.astype(compute_dtype)

    # Folded BN scale/bias packed into a single array (one tiny DMA).
    Cmax = max(Cw, Cout)
    sb = jnp.zeros((6, Cmax), jnp.float32)
    sb = sb.at[0:2, :Cw].set(params["sb1"])
    sb = sb.at[2:4, :Cw].set(params["sb2"])
    sb = sb.at[4:6, :Cout].set(params["sb3"])

    kernel = functools.partial(_bottleneck_kernel, TH=TH, W=W,
                               compute_dtype=compute_dtype)
    rows_scr = (TH + 2) * W + 16        # BASE(=8) + slab + over-read slack

    out = pl.pallas_call(
        kernel,
        out_shape=jax.ShapeDtypeStruct((N, H * W, Cout), out_dtype),
        grid_spec=pltpu.PrefetchScalarGridSpec(
            num_scalar_prefetch=0,
            grid=(N, NH),
            in_specs=[
                # Full padded image per batch element; block index constant in
                # i so it is DMA'd only once per n.
                pl.BlockSpec((1, (H + 2) * W, Cin), lambda n, i: (n, 0, 0)),
                pl.BlockSpec((Cin, Cw), lambda n, i: (0, 0)),
                pl.BlockSpec((9, Cw, Cw), lambda n, i: (0, 0, 0)),
                pl.BlockSpec((Cw, Cout), lambda n, i: (0, 0)),
                pl.BlockSpec((6, Cmax), lambda n, i: (0, 0)),
            ],
            out_specs=pl.BlockSpec((1, TH * W, Cout), lambda n, i: (n, i, 0)),
            scratch_shapes=[pltpu.VMEM((rows_scr, Cw), compute_dtype)],
        ),
        compiler_params=pltpu.CompilerParams(
            # Batch axis is the (only) parallel axis -> v7x megacore splits on
            # n, so both TensorCores never pull the same full-image x block.
            dimension_semantics=("parallel", "arbitrary"),
            vmem_limit_bytes=64 * 1024 * 1024),
    )(x_flat, w1c, w2c, w3c, sb)

    return jnp.transpose(out.reshape(N, H, W, Cout), (0, 3, 1, 2))


# ------------------------ deterministic param setup ------------------------- #

def make_params(key, inplanes, planes, eps=1e-5):
    """Bottleneck params (groups=1, base_width=64 -> width == planes)."""
    width = planes
    cout = planes * 4            # expansion = 4
    assert inplanes == cout, "no-downsample Bottleneck needs inplanes==planes*4"
    ks = jax.random.split(key, 6)

    w1 = jax.random.normal(ks[0], (inplanes, width), jnp.float32) * 0.2
    w2 = jax.random.normal(ks[1], (3, 3, width, width), jnp.float32) * 0.2
    w3 = jax.random.normal(ks[2], (width, cout), jnp.float32) * 0.2

    def folded_bn(k, c):
        kg, kb, km, kv = jax.random.split(k, 4)
        g = 1.0 + 0.1 * jax.random.normal(kg, (c,), jnp.float32)
        b = 0.1 * jax.random.normal(kb, (c,), jnp.float32)
        m = 0.1 * jax.random.normal(km, (c,), jnp.float32)
        v = jnp.abs(jax.random.normal(kv, (c,), jnp.float32)) + 0.5
        s = g / jnp.sqrt(v + eps)
        return jnp.stack([s, b - m * s], axis=0)          # (2, c): scale, bias

    return {
        "w1": w1, "w2": w2, "w3": w3,
        "sb1": folded_bn(ks[3], width),
        "sb2": folded_bn(ks[4], width),
        "sb3": folded_bn(ks[5], cout),
    }


# --------------------------------- reference -------------------------------- #

def reference_forward(x_nchw, params):
    x = jnp.transpose(x_nchw, (0, 2, 3, 1))

    def conv(inp, w, pad):
        return jax.lax.conv_general_dilated(
            inp, w, window_strides=(1, 1), padding=((pad, pad), (pad, pad)),
            dimension_numbers=("NHWC", "HWIO", "NHWC"))

    s1, b1 = params["sb1"][0], params["sb1"][1]
    s2, b2 = params["sb2"][0], params["sb2"][1]
    s3, b3 = params["sb3"][0], params["sb3"][1]

    out = conv(x, params["w1"][None, None], 0) * s1 + b1
    out = jnp.maximum(out, 0.0)
    out = conv(out, params["w2"], 1) * s2 + b2
    out = jnp.maximum(out, 0.0)
    out = conv(out, params["w3"][None, None], 0) * s3 + b3
    out = jnp.maximum(out + x, 0.0)
    return jnp.transpose(out, (0, 3, 1, 2))


# ----------------------------------- main ------------------------------------ #

if __name__ == "__main__":
    # planes=4 -> width=4, out channels = planes*4 = 16 = inplanes (identity ok)
    N, planes, H, W = 2, 4, 16, 16
    Cin = planes * 4
    key = jax.random.PRNGKey(0)
    kx, kp = jax.random.split(key)
    x = jax.random.normal(kx, (N, Cin, H, W), jnp.float32)
    params = make_params(kp, inplanes=Cin, planes=planes)

    y_ref = jax.block_until_ready(reference_forward(x, params))

    # f32 MXU operands, single row tile (NH == 1): tight check of kernel logic.
    y_f32 = jax.block_until_ready(
        bottleneck_forward(x, params, compute_dtype=jnp.float32))
    assert y_f32.shape == (N, Cin, H, W)
    err_f32 = float(jnp.max(jnp.abs(y_f32 - y_ref)))
    assert err_f32 < 2e-3, f"f32 path mismatch vs XLA reference: {err_f32}"

    # Default path: bf16 MXU operands, 4 row tiles (exercises halo handling).
    y_bf16 = jax.block_until_ready(bottleneck_forward(x, params, row_tile=4))
    err_bf16 = float(jnp.max(jnp.abs(y_bf16 - y_ref)))
    assert err_bf16 < 0.15, f"bf16 path mismatch vs XLA reference: {err_bf16}"

    print("KERNEL_OK")
</pallas_src>

<mosaic_0001>
module attributes {stable_mosaic.version = 11 : i64} {
  func.func @_bottleneck_kernel(%arg0: i32, %arg1: i32, %arg2: memref<1x288x16xf32, #tpu.memory_space<vmem>>, %arg3: memref<16x4xf32, #tpu.memory_space<vmem>>, %arg4: memref<9x4x4xf32, #tpu.memory_space<vmem>>, %arg5: memref<4x16xf32, #tpu.memory_space<vmem>>, %arg6: memref<6x16xf32, #tpu.memory_space<vmem>>, %arg7: memref<1x256x16xf32, #tpu.memory_space<vmem>>, %arg8: memref<304x4xf32, #tpu.memory_space<vmem>>) attributes {dimension_semantics = [#tpu.dimension_semantics<parallel>, #tpu.dimension_semantics<arbitrary>], iteration_bounds = array<i64: 2, 1>, scalar_prefetch = 0 : i64, scratch_operands = 1 : i64, tpu.core_type = #tpu.core_type<tc>, window_params = [{transform_indices = @transform_0, window_bounds = array<i64: 1, 288, 16>}, {pipeline_mode = #tpu.pipeline_mode<synchronous>, transform_indices = @transform_1, window_bounds = array<i64: 16, 4>}, {pipeline_mode = #tpu.pipeline_mode<synchronous>, transform_indices = @transform_2, window_bounds = array<i64: 9, 4, 4>}, {pipeline_mode = #tpu.pipeline_mode<synchronous>, transform_indices = @transform_3, window_bounds = array<i64: 4, 16>}, {pipeline_mode = #tpu.pipeline_mode<synchronous>, transform_indices = @transform_4, window_bounds = array<i64: 6, 16>}, {transform_indices = @transform_5, window_bounds = array<i64: 1, 256, 16>}]} {
    %c256_i32 = arith.constant 256 : i32
    %0 = arith.muli %arg1, %c256_i32 : i32
    %1 = tpu.assume_multiple %0, 256 : i32
    %c0 = arith.constant 0 : index
    %c0_0 = arith.constant 0 : index
    %2 = vector.load %arg6[%c0, %c0_0] : memref<6x16xf32, #tpu.memory_space<vmem>>, vector<1x4xf32>
    %c1 = arith.constant 1 : index
    %c0_1 = arith.constant 0 : index
    %3 = vector.load %arg6[%c1, %c0_1] : memref<6x16xf32, #tpu.memory_space<vmem>>, vector<1x4xf32>
    %c2 = arith.constant 2 : index
    %c0_2 = arith.constant 0 : index
    %4 = vector.load %arg6[%c2, %c0_2] : memref<6x16xf32, #tpu.memory_space<vmem>>, vector<1x4xf32>
    %c3 = arith.constant 3 : index
    %c0_3 = arith.constant 0 : index
    %5 = vector.load %arg6[%c3, %c0_3] : memref<6x16xf32, #tpu.memory_space<vmem>>, vector<1x4xf32>
    %c4 = arith.constant 4 : index
    %c0_4 = arith.constant 0 : index
    %6 = vector.load %arg6[%c4, %c0_4] : memref<6x16xf32, #tpu.memory_space<vmem>>, vector<1x16xf32>
    %c5 = arith.constant 5 : index
    %c0_5 = arith.constant 0 : index
    %7 = vector.load %arg6[%c5, %c0_5] : memref<6x16xf32, #tpu.memory_space<vmem>>, vector<1x16xf32>
    %c0_6 = arith.constant 0 : index
    %8 = arith.index_cast %1 : i32 to index
    %c0_7 = arith.constant 0 : index
    %9 = vector.load %arg2[%c0_6, %8, %c0_7] : memref<1x288x16xf32, #tpu.memory_space<vmem>>, vector<1x288x16xf32>
    %10 = vector.shape_cast %9 : vector<1x288x16xf32> to vector<288x16xf32>
    %c0_8 = arith.constant 0 : index
    %c0_9 = arith.constant 0 : index
    %11 = vector.load %arg3[%c0_8, %c0_9] : memref<16x4xf32, #tpu.memory_space<vmem>>, vector<16x4xf32>
    %cst = arith.constant dense<0.000000e+00> : vector<288x4xf32>
    %12 = tpu.matmul %10, %11, %cst {dimension_numbers = #tpu.dot_dimension_numbers<[1], [0], [0], [1], [0, 0, 1, 1], [], []>} : vector<288x16xf32>, vector<16x4xf32>, vector<288x4xf32> -> vector<288x4xf32>
    %13 = vector.broadcast %2 : vector<1x4xf32> to vector<288x4xf32>
    %14 = arith.mulf %12, %13 : vector<288x4xf32>
    %15 = vector.broadcast %3 : vector<1x4xf32> to vector<288x4xf32>
    %16 = arith.addf %14, %15 : vector<288x4xf32>
    %cst_10 = arith.constant 0.000000e+00 : f32
    %17 = vector.broadcast %cst_10 : f32 to vector<288x4xf32>
    %18 = arith.maximumf %16, %17 : vector<288x4xf32>
    %c8 = arith.constant 8 : index
    %c0_11 = arith.constant 0 : index
    %19 = vector.load %arg8[%c8, %c0_11] : memref<304x4xf32, #tpu.memory_space<vmem>>, vector<288x4xf32>
    tpu.vector_store %arg8[%c8, %c0_11], %18 {strides = array<i32>} : memref<304x4xf32, #tpu.memory_space<vmem>>, vector<288x4xf32>,
    %c0_i32 = arith.constant 0 : i32
    %20 = arith.cmpi eq, %arg1, %c0_i32 : i32
    %21 = arith.extui %20 : i1 to i32
    %c0_i32_12 = arith.constant 0 : i32
    %22 = arith.cmpi ne, %21, %c0_i32_12 : i32
    scf.if %22 {
      %cst_78 = arith.constant 0.000000e+00 : f32
      %121 = vector.broadcast %cst_78 : f32 to vector<16x4xf32>
      %c8_79 = arith.constant 8 : index
      %c0_80 = arith.constant 0 : index
      %122 = vector.load %arg8[%c8_79, %c0_80] : memref<304x4xf32, #tpu.memory_space<vmem>>, vector<16x4xf32>
      tpu.vector_store %arg8[%c8_79, %c0_80], %121 {strides = array<i32>} : memref<304x4xf32, #tpu.memory_space<vmem>>, vector<16x4xf32>,
    } else {
    }
    %c0_i32_13 = arith.constant 0 : i32
    %23 = arith.cmpi eq, %arg1, %c0_i32_13 : i32
    %24 = arith.extui %23 : i1 to i32
    %c0_i32_14 = arith.constant 0 : i32
    %25 = arith.cmpi ne, %24, %c0_i32_14 : i32
    scf.if %25 {
      %cst_78 = arith.constant 0.000000e+00 : f32
      %121 = vector.broadcast %cst_78 : f32 to vector<16x4xf32>
      %c280 = arith.constant 280 : index
      %c0_79 = arith.constant 0 : index
      %122 = vector.load %arg8[%c280, %c0_79] : memref<304x4xf32, #tpu.memory_space<vmem>>, vector<16x4xf32>
      tpu.vector_store %arg8[%c280, %c0_79], %121 {strides = array<i32>} : memref<304x4xf32, #tpu.memory_space<vmem>>, vector<16x4xf32>,
    } else {
    }
    %26 = tpu.iota {dimensions = array<i32: 0>} : vector<256x1xi32>
    %c16_i32 = arith.constant 16 : i32
    %c0_i32_15 = arith.constant 0 : i32
    %27 = arith.cmpi eq, %c16_i32, %c0_i32_15 : i32
    %c1_i32 = arith.constant 1 : i32
    %28 = arith.select %27, %c1_i32, %c16_i32 : i32
    %29 = vector.broadcast %28 : i32 to vector<256x1xi32>
    %30 = arith.remsi %26, %29 : vector<256x1xi32>
    %c0_i32_16 = arith.constant 0 : i32
    %31 = vector.broadcast %c0_i32_16 : i32 to vector<256x1xi32>
    %32 = arith.cmpi ne, %30, %31 : vector<256x1xi32>
    %c0_i32_17 = arith.constant 0 : i32
    %33 = vector.broadcast %c0_i32_17 : i32 to vector<256x1xi32>
    %34 = arith.cmpi slt, %30, %33 : vector<256x1xi32>
    %c0_i32_18 = arith.constant 0 : i32
    %35 = arith.cmpi slt, %28, %c0_i32_18 : i32
    %36 = vector.broadcast %35 : i1 to vector<256x1xi1>
    %37 = vector.broadcast %36 : vector<256x1xi1> to vector<256x1xi1>
    %38 = arith.xori %34, %37 : vector<256x1xi1>
    %39 = arith.andi %38, %32 : vector<256x1xi1>
    %40 = vector.broadcast %28 : i32 to vector<256x1xi32>
    %41 = arith.addi %30, %40 : vector<256x1xi32>
    %42 = arith.select %39, %41, %30 : vector<256x1xi1>, vector<256x1xi32>
    %c7 = arith.constant 7 : index
    %c0_19 = arith.constant 0 : index
    %43 = vector.load %arg8[%c7, %c0_19] : memref<304x4xf32, #tpu.memory_space<vmem>>, vector<256x4xf32>
    %c0_20 = arith.constant 0 : index
    %c0_21 = arith.constant 0 : index
    %c0_22 = arith.constant 0 : index
    %44 = vector.load %arg4[%c0_20, %c0_21, %c0_22] : memref<9x4x4xf32, #tpu.memory_space<vmem>>, vector<1x4x4xf32>
    %45 = vector.shape_cast %44 : vector<1x4x4xf32> to vector<4x4xf32>
    %cst_23 = arith.constant dense<0.000000e+00> : vector<256x4xf32>
    %46 = tpu.matmul %43, %45, %cst_23 {dimension_numbers = #tpu.dot_dimension_numbers<[1], [0], [0], [1], [0, 0, 1, 1], [], []>} : vector<256x4xf32>, vector<4x4xf32>, vector<256x4xf32> -> vector<256x4xf32>
    %c23 = arith.constant 23 : index
    %c0_24 = arith.constant 0 : index
    %47 = vector.load %arg8[%c23, %c0_24] : memref<304x4xf32, #tpu.memory_space<vmem>>, vector<256x4xf32>
    %c3_25 = arith.constant 3 : index
    %c0_26 = arith.constant 0 : index
    %c0_27 = arith.constant 0 : index
    %48 = vector.load %arg4[%c3_25, %c0_26, %c0_27] : memref<9x4x4xf32, #tpu.memory_space<vmem>>, vector<1x4x4xf32>
    %49 = vector.shape_cast %48 : vector<1x4x4xf32> to vector<4x4xf32>
    %cst_28 = arith.constant dense<0.000000e+00> : vector<256x4xf32>
    %50 = tpu.matmul %47, %49, %cst_28 {dimension_numbers = #tpu.dot_dimension_numbers<[1], [0], [0], [1], [0, 0, 1, 1], [], []>} : vector<256x4xf32>, vector<4x4xf32>, vector<256x4xf32> -> vector<256x4xf32>
    %51 = arith.addf %46, %50 : vector<256x4xf32>
    %c39 = arith.constant 39 : index
    %c0_29 = arith.constant 0 : index
    %52 = vector.load %arg8[%c39, %c0_29] : memref<304x4xf32, #tpu.memory_space<vmem>>, vector<256x4xf32>
    %c6 = arith.constant 6 : index
    %c0_30 = arith.constant 0 : index
    %c0_31 = arith.constant 0 : index
    %53 = vector.load %arg4[%c6, %c0_30, %c0_31] : memref<9x4x4xf32, #tpu.memory_space<vmem>>, vector<1x4x4xf32>
    %54 = vector.shape_cast %53 : vector<1x4x4xf32> to vector<4x4xf32>
    %cst_32 = arith.constant dense<0.000000e+00> : vector<256x4xf32>
    %55 = tpu.matmul %52, %54, %cst_32 {dimension_numbers = #tpu.dot_dimension_numbers<[1], [0], [0], [1], [0, 0, 1, 1], [], []>} : vector<256x4xf32>, vector<4x4xf32>, vector<256x4xf32> -> vector<256x4xf32>
    %56 = arith.addf %51, %55 : vector<256x4xf32>
    %c0_i32_33 = arith.constant 0 : i32
    %57 = vector.broadcast %c0_i32_33 : i32 to vector<256x1xi32>
    %58 = arith.cmpi sgt, %42, %57 : vector<256x1xi32>
    %cst_34 = arith.constant 0.000000e+00 : f32
    %59 = vector.shape_cast %58 : vector<256x1xi1> to vector<256x1xi1>
    %60 = vector.broadcast %59 : vector<256x1xi1> to vector<256x4xi1>
    %61 = vector.broadcast %cst_34 : f32 to vector<256x4xf32>
    %62 = arith.select %60, %56, %61 : vector<256x4xi1>, vector<256x4xf32>
    %c8_35 = arith.constant 8 : index
    %c0_36 = arith.constant 0 : index
    %63 = vector.load %arg8[%c8_35, %c0_36] : memref<304x4xf32, #tpu.memory_space<vmem>>, vector<256x4xf32>
    %c1_37 = arith.constant 1 : index
    %c0_38 = arith.constant 0 : index
    %c0_39 = arith.constant 0 : index
    %64 = vector.load %arg4[%c1_37, %c0_38, %c0_39] : memref<9x4x4xf32, #tpu.memory_space<vmem>>, vector<1x4x4xf32>
    %65 = vector.shape_cast %64 : vector<1x4x4xf32> to vector<4x4xf32>
    %cst_40 = arith.constant dense<0.000000e+00> : vector<256x4xf32>
    %66 = tpu.matmul %63, %65, %cst_40 {dimension_numbers = #tpu.dot_dimension_numbers<[1], [0], [0], [1], [0, 0, 1, 1], [], []>} : vector<256x4xf32>, vector<4x4xf32>, vector<256x4xf32> -> vector<256x4xf32>
    %c24 = arith.constant 24 : index
    %c0_41 = arith.constant 0 : index
    %67 = vector.load %arg8[%c24, %c0_41] : memref<304x4xf32, #tpu.memory_space<vmem>>, vector<256x4xf32>
    %c4_42 = arith.constant 4 : index
    %c0_43 = arith.constant 0 : index
    %c0_44 = arith.constant 0 : index
    %68 = vector.load %arg4[%c4_42, %c0_43, %c0_44] : memref<9x4x4xf32, #tpu.memory_space<vmem>>, vector<1x4x4xf32>
    %69 = vector.shape_cast %68 : vector<1x4x4xf32> to vector<4x4xf32>
    %cst_45 = arith.constant dense<0.000000e+00> : vector<256x4xf32>
    %70 = tpu.matmul %67, %69, %cst_45 {dimension_numbers = #tpu.dot_dimension_numbers<[1], [0], [0], [1], [0, 0, 1, 1], [], []>} : vector<256x4xf32>, vector<4x4xf32>, vector<256x4xf32> -> vector<256x4xf32>
    %71 = arith.addf %66, %70 : vector<256x4xf32>
    %c40 = arith.constant 40 : index
    %c0_46 = arith.constant 0 : index
    %72 = vector.load %arg8[%c40, %c0_46] : memref<304x4xf32, #tpu.memory_space<vmem>>, vector<256x4xf32>
    %c7_47 = arith.constant 7 : index
    %c0_48 = arith.constant 0 : index
    %c0_49 = arith.constant 0 : index
    %73 = vector.load %arg4[%c7_47, %c0_48, %c0_49] : memref<9x4x4xf32, #tpu.memory_space<vmem>>, vector<1x4x4xf32>
    %74 = vector.shape_cast %73 : vector<1x4x4xf32> to vector<4x4xf32>
    %cst_50 = arith.constant dense<0.000000e+00> : vector<256x4xf32>
    %75 = tpu.matmul %72, %74, %cst_50 {dimension_numbers = #tpu.dot_dimension_numbers<[1], [0], [0], [1], [0, 0, 1, 1], [], []>} : vector<256x4xf32>, vector<4x4xf32>, vector<256x4xf32> -> vector<256x4xf32>
    %76 = arith.addf %71, %75 : vector<256x4xf32>
    %77 = arith.addf %62, %76 : vector<256x4xf32>
    %c9 = arith.constant 9 : index
    %c0_51 = arith.constant 0 : index
    %78 = vector.load %arg8[%c9, %c0_51] : memref<304x4xf32, #tpu.memory_space<vmem>>, vector<256x4xf32>
    %c2_52 = arith.constant 2 : index
    %c0_53 = arith.constant 0 : index
    %c0_54 = arith.constant 0 : index
    %79 = vector.load %arg4[%c2_52, %c0_53, %c0_54] : memref<9x4x4xf32, #tpu.memory_space<vmem>>, vector<1x4x4xf32>
    %80 = vector.shape_cast %79 : vector<1x4x4xf32> to vector<4x4xf32>
    %cst_55 = arith.constant dense<0.000000e+00> : vector<256x4xf32>
    %81 = tpu.matmul %78, %80, %cst_55 {dimension_numbers = #tpu.dot_dimension_numbers<[1], [0], [0], [1], [0, 0, 1, 1], [], []>} : vector<256x4xf32>, vector<4x4xf32>, vector<256x4xf32> -> vector<256x4xf32>
    %c25 = arith.constant 25 : index
    %c0_56 = arith.constant 0 : index
    %82 = vector.load %arg8[%c25, %c0_56] : memref<304x4xf32, #tpu.memory_space<vmem>>, vector<256x4xf32>
    %c5_57 = arith.constant 5 : index
    %c0_58 = arith.constant 0 : index
    %c0_59 = arith.constant 0 : index
    %83 = vector.load %arg4[%c5_57, %c0_58, %c0_59] : memref<9x4x4xf32, #tpu.memory_space<vmem>>, vector<1x4x4xf32>
    %84 = vector.shape_cast %83 : vector<1x4x4xf32> to vector<4x4xf32>
    %cst_60 = arith.constant dense<0.000000e+00> : vector<256x4xf32>
    %85 = tpu.matmul %82, %84, %cst_60 {dimension_numbers = #tpu.dot_dimension_numbers<[1], [0], [0], [1], [0, 0, 1, 1], [], []>} : vector<256x4xf32>, vector<4x4xf32>, vector<256x4xf32> -> vector<256x4xf32>
    %86 = arith.addf %81, %85 : vector<256x4xf32>
    %c41 = arith.constant 41 : index
    %c0_61 = arith.constant 0 : index
    %87 = vector.load %arg8[%c41, %c0_61] : memref<304x4xf32, #tpu.memory_space<vmem>>, vector<256x4xf32>
    %c8_62 = arith.constant 8 : index
    %c0_63 = arith.constant 0 : index
    %c0_64 = arith.constant 0 : index
    %88 = vector.load %arg4[%c8_62, %c0_63, %c0_64] : memref<9x4x4xf32, #tpu.memory_space<vmem>>, vector<1x4x4xf32>
    %89 = vector.shape_cast %88 : vector<1x4x4xf32> to vector<4x4xf32>
    %cst_65 = arith.constant dense<0.000000e+00> : vector<256x4xf32>
    %90 = tpu.matmul %87, %89, %cst_65 {dimension_numbers = #tpu.dot_dimension_numbers<[1], [0], [0], [1], [0, 0, 1, 1], [], []>} : vector<256x4xf32>, vector<4x4xf32>, vector<256x4xf32> -> vector<256x4xf32>
    %91 = arith.addf %86, %90 : vector<256x4xf32>
    %c15_i32 = arith.constant 15 : i32
    %92 = vector.broadcast %c15_i32 : i32 to vector<256x1xi32>
    %93 = arith.cmpi slt, %42, %92 : vector<256x1xi32>
    %cst_66 = arith.constant 0.000000e+00 : f32
    %94 = vector.shape_cast %93 : vector<256x1xi1> to vector<256x1xi1>
    %95 = vector.broadcast %94 : vector<256x1xi1> to vector<256x4xi1>
    %96 = vector.broadcast %cst_66 : f32 to vector<256x4xf32>
    %97 = arith.select %95, %91, %96 : vector<256x4xi1>, vector<256x4xf32>
    %98 = arith.addf %77, %97 : vector<256x4xf32>
    %99 = vector.broadcast %4 : vector<1x4xf32> to vector<256x4xf32>
    %100 = arith.mulf %98, %99 : vector<256x4xf32>
    %101 = vector.broadcast %5 : vector<1x4xf32> to vector<256x4xf32>
    %102 = arith.addf %100, %101 : vector<256x4xf32>
    %cst_67 = arith.constant 0.000000e+00 : f32
    %103 = vector.broadcast %cst_67 : f32 to vector<256x4xf32>
    %104 = arith.maximumf %102, %103 : vector<256x4xf32>
    %c0_68 = arith.constant 0 : index
    %c0_69 = arith.constant 0 : index
    %105 = vector.load %arg5[%c0_68, %c0_69] : memref<4x16xf32, #tpu.memory_space<vmem>>, vector<4x16xf32>
    %cst_70 = arith.constant dense<0.000000e+00> : vector<256x16xf32>
    %106 = tpu.matmul %104, %105, %cst_70 {dimension_numbers = #tpu.dot_dimension_numbers<[1], [0], [0], [1], [0, 0, 1, 1], [], []>} : vector<256x4xf32>, vector<4x16xf32>, vector<256x16xf32> -> vector<256x16xf32>
    %107 = vector.broadcast %6 : vector<1x16xf32> to vector<256x16xf32>
    %108 = arith.mulf %106, %107 : vector<256x16xf32>
    %109 = vector.broadcast %7 : vector<1x16xf32> to vector<256x16xf32>
    %110 = arith.addf %108, %109 : vector<256x16xf32>
    %c16_i32_71 = arith.constant 16 : i32
    %111 = arith.addi %1, %c16_i32_71 : i32
    %c0_72 = arith.constant 0 : index
    %112 = arith.index_cast %111 : i32 to index
    %c0_73 = arith.constant 0 : index
    %113 = vector.load %arg2[%c0_72, %112, %c0_73] : memref<1x288x16xf32, #tpu.memory_space<vmem>>, vector<1x256x16xf32>
    %114 = vector.shape_cast %113 : vector<1x256x16xf32> to vector<256x16xf32>
    %115 = arith.addf %110, %114 : vector<256x16xf32>
    %cst_74 = arith.constant 0.000000e+00 : f32
    %116 = vector.broadcast %cst_74 : f32 to vector<256x16xf32>
    %117 = arith.maximumf %115, %116 : vector<256x16xf32>
    %c0_75 = arith.constant 0 : index
    %c0_76 = arith.constant 0 : index
    %c0_77 = arith.constant 0 : index
    %118 = vector.load %arg7[%c0_75, %c0_76, %c0_77] : memref<1x256x16xf32, #tpu.memory_space<vmem>>, vector<1x256x16xf32>
    %119 = vector.shape_cast %118 : vector<1x256x16xf32> to vector<256x16xf32>
    %120 = vector.shape_cast %117 : vector<256x16xf32> to vector<1x256x16xf32>
    tpu.vector_store %arg7[%c0_75, %c0_76, %c0_77], %120 {strides = array<i32>} : memref<1x256x16xf32, #tpu.memory_space<vmem>>, vector<1x256x16xf32>,
    return
  }
  func.func @transform_0(%arg0: i32, %arg1: i32) -> (i32, i32, i32) {
    %c0_i32 = arith.constant 0 : i32
    %c0_i32_0 = arith.constant 0 : i32
    %c0_i32_1 = arith.constant 0 : i32
    return %arg0, %c0_i32, %c0_i32_0 : i32, i32, i32
  }
  func.func @transform_1(%arg0: i32, %arg1: i32) -> (i32, i32) {
    %c0_i32 = arith.constant 0 : i32
    %c0_i32_0 = arith.constant 0 : i32
    %c0_i32_1 = arith.constant 0 : i32
    return %c0_i32, %c0_i32_0 : i32, i32
  }
  func.func @transform_2(%arg0: i32, %arg1: i32) -> (i32, i32, i32) {
    %c0_i32 = arith.constant 0 : i32
    %c0_i32_0 = arith.constant 0 : i32
    %c0_i32_1 = arith.constant 0 : i32
    %c0_i32_2 = arith.constant 0 : i32
    return %c0_i32, %c0_i32_0, %c0_i32_1 : i32, i32, i32
  }
  func.func @transform_3(%arg0: i32, %arg1: i32) -> (i32, i32) {
    %c0_i32 = arith.constant 0 : i32
    %c0_i32_0 = arith.constant 0 : i32
    %c0_i32_1 = arith.constant 0 : i32
    return %c0_i32, %c0_i32_0 : i32, i32
  }
  func.func @transform_4(%arg0: i32, %arg1: i32) -> (i32, i32) {
    %c0_i32 = arith.constant 0 : i32
    %c0_i32_0 = arith.constant 0 : i32
    %c0_i32_1 = arith.constant 0 : i32
    return %c0_i32, %c0_i32_0 : i32, i32
  }
  func.func @transform_5(%arg0: i32, %arg1: i32) -> (i32, i32, i32) {
    %c0_i32 = arith.constant 0 : i32
    %c0_i32_0 = arith.constant 0 : i32
    return %arg0, %arg1, %c0_i32 : i32, i32, i32
  }
}

</mosaic_0001>

<bundles_post_ra>
// kernel: tpu_custom_call.1
= control target key start
LH: loop header
LB: loop body
LE: loop exit
PB: predicated region body
PF: predicated region fallthrough
CT: control target
= control target key end

     0   :  { %s4470_s18 = smov 0   ;;  %s4472_s19 = smov 0   ;;  %s5844_s0 = inlined_call_operand.vmem [shape: f32[2,288,16], index: 0, kind: input, shape index: {}]   ;;  %s5845_s1 = inlined_call_operand.vmem [shape: f32[16,4], index: 1, kind: input, shape index: {}]   ;;  %s5846_s2 = inlined_call_operand.vmem [shape: f32[9,4,4], index: 2, kind: input, shape index: {}]   ;;  %s5847_s3 = inlined_call_operand.vmem [shape: f32[4,16], index: 3, kind: input, shape index: {}]   ;;  %s5848_s4 = inlined_call_operand.vmem [shape: f32[6,16], index: 4, kind: input, shape index: {}]   ;;  %s5849_s5 = inlined_call_operand.vmem [shape: f32[2,256,16], index: 5, kind: output, shape index: {}]  }
   0x1   :  { %s4474_s20 = smov 0  }
   0x2 LB: > { %s27_s21 = sadd.s32 1, %s4433_s19  ;;  %p3967_p0 = scmp.ge.s32.totalorder %s4437_s20, 1  ;;  %s4437_s20 = sphi %s4474_s20, %s15_s20   ;;  %s4433_s19 = sphi %s4472_s19, %s5904_s19   ;;  %s4429_s18 = sphi %s4470_s18, %s5903_s18  }
   0x3   : > { %p29_p1 = scmp.ge.s32.totalorder %s27_s21, 2  ;;  %p201_p2 = scmp.lt.s32.totalorder %s4437_s20, 3 }
   0x5   : > { %s5906_s21 = smov (%p29_p1, %s27_s21), 0  ;;  %p202_p3 = pnand %p3967_p0, %p201_p2 }
   0x7   : > { %205 = sbr.rel (%p202_p3) target bundleno = 1215 (0x4bf), region = 40 }
   0xc   : > { %v293_v0 = vld [vmem:[%s5845_s1 + $0x8] sm:$0xff]  ;;  %v292_v1 = vld [vmem:[%s5845_s1] sm:$0xff]  ;;  %p233_p4 = scmp.lt.s32.totalorder %s4429_s18, 1  ;;  %vm294_vm0 = vcmask 130048   ;;  %vm638_vm1 = vcmask 31744   ;;  %v4439_v25 = vmov 0.0  }
   0xd   : > { %417 = vmatpush.msra.mxu0 %v293_v0  ;;  %v4537_v18 = vld [vmem:[%s5848_s4] ss:$0 sm:$0xff]  ;;  %v4542_v19 = vld [vmem:[%s5848_s4 + $0x1] ss:$0 sm:$0xff]  ;;  %vm1233_vm2 = vcmask 1043456  }
   0xe   : > { %s5908_s18 = smov (!%p233_p4, %s4429_s18), 1  ;;  %v1132_v46 = vld [vmem:[%s5846_s2] sm:$0xf]  ;;  %v4007_v57 = vld [vmem:[%s5846_s2 + $0xc] sm:$0xf] }
   0xf   : > { %418 = vmatpush.msra.mxu0 %v292_v1  ;;  %s4383_s26 = smul.u32 288, %s5908_s18  ;;  %4381 = vmatpush.msk.msra.mxu2 %vm1233_vm2, %v1132_v46  ;;  %v4108_v58 = vld [vmem:[%s5846_s2 + $0x4] sm:$0xf]  ;;  %v4109_v59 = vld [vmem:[%s5846_s2 + $0x10] sm:$0xf]  ;;  %s4379_s17 = sshll.u32 %s5908_s18, 8 }
  0x10   : > { %4380 = vmatpush.msk.msra.mxu1 %vm1233_vm2, %v4007_v57  ;;  %s5614_s24 = scalar_lea.vmem %s5849_s5, %s4379_s17 }
  0x11   : > { %s4500_s29 = scalar_lea.vmem %s5844_s0, %s4383_s26  ;;  %4008 = vmatpush.msk.msrb.mxu0 %vm1233_vm2, %v4007_v57  ;;  %4143 = vmatpush.msk.msrb.mxu2 %vm1233_vm2, %v4108_v58 }
  0x12   : > { %v256_v2 = vld [vmem:[%s4500_s29] sm:$0xff]  ;;  %v257_v3 = vld [vmem:[%s4500_s29 + $0x8] sm:$0xff]  ;;  %v258_v4 = vld [vmem:[%s4500_s29 + $0x10] sm:$0xff]  ;;  %4110 = vmatpush.msk.msrb.mxu1 %vm1233_vm2, %v4109_v59 }
  0x13   : > { %3971 = vmatmul.msk.f32.vlgmr.msra.gmra.mxu0 %vm294_vm0, %v256_v2  ;;  %v259_v5 = vld [vmem:[%s4500_s29 + $0x18] sm:$0xff]  ;;  %v260_v6 = vld [vmem:[%s4500_s29 + $0x20] sm:$0xff]  ;;  %v261_v7 = vld [vmem:[%s4500_s29 + $0x28] sm:$0xff] }
  0x14   : > { %v262_v8 = vld [vmem:[%s4500_s29 + $0x30] sm:$0xff]  ;;  %v263_v9 = vld [vmem:[%s4500_s29 + $0x38] sm:$0xff]  ;;  %v264_v10 = vld [vmem:[%s4500_s29 + $0x40] sm:$0xff]  ;;  %4041 = vmatpush.msk.msra.mxu0 %vm1233_vm2, %v1132_v46 }
  0x15   : > { %v265_v11 = vld [vmem:[%s4500_s29 + $0x48] sm:$0xff]  ;;  %v266_v12 = vld [vmem:[%s4500_s29 + $0x50] sm:$0xff]  ;;  %v267_v13 = vld [vmem:[%s4500_s29 + $0x58] sm:$0xff] }
  0x16   : > { %v268_v14 = vld [vmem:[%s4500_s29 + $0x60] sm:$0xff]  ;;  %v269_v15 = vld [vmem:[%s4500_s29 + $0x68] sm:$0xff]  ;;  %v270_v16 = vld [vmem:[%s4500_s29 + $0x70] sm:$0xff] }
  0x17   : > { %v271_v17 = vld [vmem:[%s4500_s29 + $0x78] sm:$0xff]  ;;  %v272_v21 = vld [vmem:[%s4500_s29 + $0x80] sm:$0xff]  ;;  %v273_v27 = vld [vmem:[%s4500_s29 + $0x88] sm:$0xff] }
  0x18   : > { %v274_v32 = vld [vmem:[%s4500_s29 + $0x90] sm:$0xff]  ;;  %v275_v37 = vld [vmem:[%s4500_s29 + $0x98] sm:$0xff]  ;;  %v276_v42 = vld [vmem:[%s4500_s29 + $0xa0] sm:$0xff] }
  0x19   : > { %v277_v48 = vld [vmem:[%s4500_s29 + $0xa8] sm:$0xff]  ;;  %v278_v53 = vld [vmem:[%s4500_s29 + $0xb0] sm:$0xff]  ;;  %v279_v61 = vld [vmem:[%s4500_s29 + $0xb8] sm:$0xff] }
  0x1a   : > { %v280_v2 = vld [vmem:[%s4500_s29 + $0xc0] sm:$0xff] }
  0x1b   : > { %3972 = vmatmul.msk.f32.gmra.mxu0 %vm294_vm0, %v257_v3 }
  0x23   : > { %3973 = vmatmul.msk.f32.gmra.mxu0 %vm294_vm0, %v258_v4 }
  0x2b   : > { %3974 = vmatmul.msk.f32.gmra.mxu0 %vm294_vm0, %v259_v5 }
  0x33   : > { %3975 = vmatmul.msk.f32.gmra.mxu0 %vm294_vm0, %v260_v6  ;;  %v4613_v6 = vld [vmem:[%s5846_s2 + $0x18] sm:$0xf] }
  0x34   : > { %4382 = vmatpush.msk.msra.mxu3 %vm1233_vm2, %v4613_v6 }
  0x3b   : > { %3976 = vmatmul.msk.f32.gmra.mxu0 %vm294_vm0, %v261_v7 }
  0x43   : > { %3977 = vmatmul.msk.f32.gmra.mxu0 %vm294_vm0, %v262_v8 }
  0x4b   : > { %3978 = vmatmul.msk.f32.gmra.mxu0 %vm294_vm0, %v263_v9  ;;  %v281_v9 = vld [vmem:[%s4500_s29 + $0xc8] sm:$0xff] }
  0x53   : > { %3979 = vmatmul.msk.f32.gmra.mxu0 %vm294_vm0, %v264_v10 }
  0x5b   : > { %3980 = vmatmul.msk.f32.gmra.mxu0 %vm294_vm0, %v265_v11 }
  0x63   : > { %3981 = vmatmul.msk.f32.gmra.mxu0 %vm294_vm0, %v266_v12 }
  0x6b   : > { %3982 = vmatmul.msk.f32.gmra.mxu0 %vm294_vm0, %v267_v13 }
  0x73   : > { %3983 = vmatmul.msk.f32.gmra.mxu0 %vm294_vm0, %v268_v14 }
  0x7b   : > { %3984 = vmatmul.msk.f32.gmra.mxu0 %vm294_vm0, %v269_v15  ;;  %v282_v15 = vld [vmem:[%s4500_s29 + $0xd0] sm:$0xff] }
  0x83   : > { %3985 = vmatmul.msk.f32.gmra.mxu0 %vm294_vm0, %v270_v16 }
  0x8b   : > { %3986 = vmatmul.msk.f32.gmra.mxu0 %vm294_vm0, %v271_v17 }
  0x90   : > { %v420_v20 = vpop.f32.mrf.mxu0 }
  0x91   : > { %v529_v22 = vmul.f32 %v4537_v18, %v420_v20 }
  0x93   : > { %v566_v23 = vadd.f32 %v4542_v19, %v529_v22  ;;  %3987 = vmatmul.msk.f32.gmra.mxu0 %vm294_vm0, %v272_v21 }
  0x95   : > { %v602_v24 = vmax.f32 %v566_v23, 0.0  ;;  %v283_v23 = vld [vmem:[%s4500_s29 + $0xd8] sm:$0xff] }
  0x97   : > { %639 = vst.msk [vmem:[#allocation2 + $0x8] sm:$0xff] %vm638_vm1, %v602_v24 }
  0x98   : > { %679 = vst.msk [vmem:[#allocation2 + $0x8] sm:$0xff] %vm638_vm1, %v4439_v25  ;;  %v423_v26 = vpop.f32.mrf.mxu0 }
  0x99   : > { %v530_v28 = vmul.f32 %v4537_v18, %v423_v26 }
  0x9b   : > { %v567_v29 = vadd.f32 %v4542_v19, %v530_v28  ;;  %3988 = vmatmul.msk.f32.gmra.mxu0 %vm294_vm0, %v273_v27 }
  0x9d   : > { %v603_v30 = vmax.f32 %v567_v29, 0.0 }
  0x9f   : > { %640 = vst.msk [vmem:[#allocation2 + $0x10] sm:$0xff] %vm638_vm1, %v603_v30  ;;  %v284_v30 = vld [vmem:[%s4500_s29 + $0xe0] sm:$0xff] }
  0xa0   : > { %680 = vst.msk [vmem:[#allocation2 + $0x10] sm:$0xff] %vm638_vm1, %v4439_v25  ;;  %v426_v31 = vpop.f32.mrf.mxu0 }
  0xa1   : > { %v531_v33 = vmul.f32 %v4537_v18, %v426_v31 }
  0xa3   : > { %v568_v34 = vadd.f32 %v4542_v19, %v531_v33  ;;  %3989 = vmatmul.msk.f32.gmra.mxu0 %vm294_vm0, %v274_v32 }
  0xa5   : > { %v604_v35 = vmax.f32 %v568_v34, 0.0 }
  0xa7   : > { %641 = vst.msk [vmem:[#allocation2 + $0x18] sm:$0xff] %vm638_vm1, %v604_v35 }
  0xa8   : > { %v429_v36 = vpop.f32.mrf.mxu0 }
  0xa9   : > { %v532_v38 = vmul.f32 %v4537_v18, %v429_v36  ;;  %v285_v36 = vld [vmem:[%s4500_s29 + $0xe8] sm:$0xff] }
  0xab   : > { %v569_v39 = vadd.f32 %v4542_v19, %v532_v38  ;;  %3990 = vmatmul.msk.f32.gmra.mxu0 %vm294_vm0, %v275_v37 }
  0xad   : > { %v605_v40 = vmax.f32 %v569_v39, 0.0 }
  0xaf   : > { %642 = vst.msk [vmem:[#allocation2 + $0x20] sm:$0xff] %vm638_vm1, %v605_v40 }
  0xb0   : > { %v432_v41 = vpop.f32.mrf.mxu0 }
  0xb1   : > { %v533_v43 = vmul.f32 %v4537_v18, %v432_v41 }
  0xb3   : > { %v570_v44 = vadd.f32 %v4542_v19, %v533_v43  ;;  %3991 = vmatmul.msk.f32.gmra.mxu0 %vm294_vm0, %v276_v42  ;;  %v286_v42 = vld [vmem:[%s4500_s29 + $0xf0] sm:$0xff] }
  0xb5   : > { %v606_v45 = vmax.f32 %v570_v44, 0.0 }
  0xb7   : > { %643 = vst.msk [vmem:[#allocation2 + $0x28] sm:$0xff] %vm638_vm1, %v606_v45 }
  0xb8   : > { %v435_v47 = vpop.f32.mrf.mxu0 }
  0xb9   : > { %v534_v49 = vmul.f32 %v4537_v18, %v435_v47 }
  0xbb   : > { %v571_v50 = vadd.f32 %v4542_v19, %v534_v49  ;;  %3992 = vmatmul.msk.f32.gmra.mxu0 %vm294_vm0, %v277_v48  ;;  %v287_v48 = vld [vmem:[%s4500_s29 + $0xf8] sm:$0xff] }
  0xbd   : > { %v607_v51 = vmax.f32 %v571_v50, 0.0 }
  0xbf   : > { %644 = vst.msk [vmem:[#allocation2 + $0x30] sm:$0xff] %vm638_vm1, %v607_v51 }
  0xc0   : > { %v438_v52 = vpop.f32.mrf.mxu0 }
  0xc1   : > { %v535_v54 = vmul.f32 %v4537_v18, %v438_v52 }
  0xc3   : > { %v572_v55 = vadd.f32 %v4542_v19, %v535_v54  ;;  %3993 = vmatmul.msk.f32.gmra.mxu0 %vm294_vm0, %v278_v53  ;;  %v288_v54 = vld [vmem:[%s4500_s29 + $0x100] sm:$0xff] }
  0xc5   : > { %v608_v56 = vmax.f32 %v572_v55, 0.0 }
  0xc7   : > { %645 = vst.msk [vmem:[#allocation2 + $0x38] sm:$0xff] %vm638_vm1, %v608_v56 }
  0xc8   : > { %v441_v60 = vpop.f32.mrf.mxu0 }
  0xc9   : > { %v536_v62 = vmul.f32 %v4537_v18, %v441_v60  ;;  %v289_v60 = vld [vmem:[%s4500_s29 + $0x108] sm:$0xff] }
  0xcb   : > { %v573_v63 = vadd.f32 %v4542_v19, %v536_v62  ;;  %3994 = vmatmul.msk.f32.gmra.mxu0 %vm294_vm0, %v279_v61 }
  0xcd   : > { %v609_v0 = vmax.f32 %v573_v63, 0.0 }
  0xcf   : > { %646 = vst.msk [vmem:[#allocation2 + $0x40] sm:$0xff] %vm638_vm1, %v609_v0 }
  0xd0   : > { %v444_v1 = vpop.f32.mrf.mxu0 }
  0xd1   : > { %v537_v3 = vmul.f32 %v4537_v18, %v444_v1 }
  0xd3   : > { %v574_v4 = vadd.f32 %v4542_v19, %v537_v3  ;;  %3995 = vmatmul.msk.f32.gmra.mxu0 %vm294_vm0, %v280_v2  ;;  %v290_v2 = vld [vmem:[%s4500_s29 + $0x110] sm:$0xff] }
  0xd5   : > { %v610_v5 = vmax.f32 %v574_v4, 0.0 }
  0xd6   : > { %v4615_v7 = vld [vmem:[#allocation2 + $0x3f] sm:$0xff] }
  0xd7   : > { %647 = vst.msk [vmem:[#allocation2 + $0x48] sm:$0xff] %vm638_vm1, %v610_v5  ;;  %4049 = vmatmul.msk.f32.vlgmr.msra.gmra.mxu2 %vm638_vm1, %v4615_v7 }
  0xd8   : > { %v447_v8 = vpop.f32.mrf.mxu0 }
  0xd9   : > { %v538_v10 = vmul.f32 %v4537_v18, %v447_v8 }
  0xdb   : > { %v575_v11 = vadd.f32 %v4542_v19, %v538_v10  ;;  %3996 = vmatmul.msk.f32.gmra.mxu0 %vm294_vm0, %v281_v9  ;;  %v291_v10 = vld [vmem:[%s4500_s29 + $0x118] sm:$0xff] }
  0xdd   : > { %v611_v12 = vmax.f32 %v575_v11, 0.0 }
  0xde   : > { %v4626_v13 = vld [vmem:[#allocation2 + $0x47] sm:$0xff] }
  0xdf   : > { %648 = vst.msk [vmem:[#allocation2 + $0x50] sm:$0xff] %vm638_vm1, %v611_v12  ;;  %4050 = vmatmul.msk.f32.gmra.mxu2 %vm638_vm1, %v4626_v13 }
  0xe0   : > { %v450_v14 = vpop.f32.mrf.mxu0 }
  0xe1   : > { %v539_v16 = vmul.f32 %v4537_v18, %v450_v14 }
  0xe3   : > { %v576_v17 = vadd.f32 %v4542_v19, %v539_v16  ;;  %3997 = vmatmul.msk.f32.gmra.mxu0 %vm294_vm0, %v282_v15 }
  0xe5   : > { %v612_v20 = vmax.f32 %v576_v17, 0.0 }
  0xe6   : > { %v4635_v21 = vld [vmem:[#allocation2 + $0x4f] sm:$0xff] }
  0xe7   : > { %649 = vst.msk [vmem:[#allocation2 + $0x58] sm:$0xff] %vm638_vm1, %v612_v20  ;;  %4016 = vmatmul.msk.f32.vlgmr.msra.gmra.mxu1 %vm638_vm1, %v4635_v21  ;;  %4051 = vmatmul.msk.f32.gmra.mxu2 %vm638_vm1, %v4635_v21  ;;  %v4718_v20 = vld [vmem:[#allocation2 + $0x17] sm:$0xff] }
  0xe8   : > { %v453_v22 = vpop.f32.mrf.mxu0 }
  0xe9   : > { %v540_v24 = vmul.f32 %v4537_v18, %v453_v22 }
  0xeb   : > { %v577_v26 = vadd.f32 %v4542_v19, %v540_v24  ;;  %3998 = vmatmul.msk.f32.gmra.mxu0 %vm294_vm0, %v283_v23 }
  0xed   : > { %v613_v27 = vmax.f32 %v577_v26, 0.0 }
  0xee   : > { %v4646_v28 = vld [vmem:[#allocation2 + $0x57] sm:$0xff] }
  0xef   : > { %650 = vst.msk [vmem:[#allocation2 + $0x60] sm:$0xff] %vm638_vm1, %v613_v27  ;;  %4017 = vmatmul.msk.f32.gmra.mxu1 %vm638_vm1, %v4646_v28  ;;  %4052 = vmatmul.msk.f32.gmra.mxu2 %vm638_vm1, %v4646_v28 }
  0xf0   : > { %v456_v29 = vpop.f32.mrf.mxu0 }
  0xf1   : > { %v541_v31 = vmul.f32 %v4537_v18, %v456_v29  ;;  %v4730_v29 = vld [vmem:[#allocation2 + $0x1f] sm:$0xff] }
  0xf3   : > { %v578_v32 = vadd.f32 %v4542_v19, %v541_v31  ;;  %3999 = vmatmul.msk.f32.gmra.mxu0 %vm294_vm0, %v284_v30 }
  0xf5   : > { %v614_v33 = vmax.f32 %v578_v32, 0.0 }
  0xf6   : > { %v1111_v34 = vld [vmem:[#allocation2 + $0x5f] sm:$0xff] }
  0xf7   : > { %651 = vst.msk [vmem:[#allocation2 + $0x68] sm:$0xff] %vm638_vm1, %v614_v33  ;;  %4018 = vmatmul.msk.f32.gmra.mxu1 %vm638_vm1, %v1111_v34  ;;  %4053 = vmatmul.msk.f32.gmra.mxu2 %vm638_vm1, %v1111_v34 }
  0xf8   : > { %4083 = vmatmul.msk.f32.vlgmr.msra.gmra.mxu3 %vm638_vm1, %v1111_v34  ;;  %v459_v35 = vpop.f32.mrf.mxu0  ;;  %v4740_v34 = vld [vmem:[#allocation2 + $0x27] sm:$0xff] }
  0xf9   : > { %v542_v37 = vmul.f32 %v4537_v18, %v459_v35 }
  0xfb   : > { %v579_v38 = vadd.f32 %v4542_v19, %v542_v37  ;;  %4000 = vmatmul.msk.f32.gmra.mxu0 %vm294_vm0, %v285_v36 }
  0xfd   : > { %v615_v39 = vmax.f32 %v579_v38, 0.0 }
  0xfe   : > { %v1112_v40 = vld [vmem:[#allocation2 + $0x67] sm:$0xff] }
  0xff   : > { %652 = vst.msk [vmem:[#allocation2 + $0x70] sm:$0xff] %vm638_vm1, %v615_v39  ;;  %4019 = vmatmul.msk.f32.gmra.mxu1 %vm638_vm1, %v1112_v40  ;;  %4054 = vmatmul.msk.f32.gmra.mxu2 %vm638_vm1, %v1112_v40 }
 0x100   : > { %4084 = vmatmul.msk.f32.gmra.mxu3 %vm638_vm1, %v1112_v40  ;;  %v462_v41 = vpop.f32.mrf.mxu0  ;;  %v4750_v40 = vld [vmem:[#allocation2 + $0x2f] sm:$0xff] }
 0x101   : > { %v543_v43 = vmul.f32 %v4537_v18, %v462_v41 }
 0x103   : > { %v580_v44 = vadd.f32 %v4542_v19, %v543_v43  ;;  %4001 = vmatmul.msk.f32.gmra.mxu0 %vm294_vm0, %v286_v42 }
 0x105   : > { %v616_v45 = vmax.f32 %v580_v44, 0.0 }
 0x106   : > { %v1113_v46 = vld [vmem:[#allocation2 + $0x6f] sm:$0xff] }
 0x107   : > { %653 = vst.msk [vmem:[#allocation2 + $0x78] sm:$0xff] %vm638_vm1, %v616_v45  ;;  %4020 = vmatmul.msk.f32.gmra.mxu1 %vm638_vm1, %v1113_v46  ;;  %4055 = vmatmul.msk.f32.gmra.mxu2 %vm638_vm1, %v1113_v46 }
 0x108   : > { %4085 = vmatmul.msk.f32.gmra.mxu3 %vm638_vm1, %v1113_v46  ;;  %v465_v47 = vpop.f32.mrf.mxu0  ;;  %v4760_v46 = vld [vmem:[#allocation2 + $0x37] sm:$0xff] }
 0x109   : > { %v544_v49 = vmul.f32 %v4537_v18, %v465_v47 }
 0x10b   : > { %v581_v50 = vadd.f32 %v4542_v19, %v544_v49  ;;  %4002 = vmatmul.msk.f32.gmra.mxu0 %vm294_vm0, %v287_v48 }
 0x10d   : > { %v617_v51 = vmax.f32 %v581_v50, 0.0  ;;  %v4176_v50 = vld [vmem:[%s5846_s2 + $0x1c] sm:$0xf] }
 0x10e   : > { %v1114_v52 = vld [vmem:[#allocation2 + $0x77] sm:$0xff]  ;;  %4177 = vmatpush.msk.msrb.mxu3 %vm1233_vm2, %v4176_v50 }
 0x10f   : > { %654 = vst.msk [vmem:[#allocation2 + $0x80] sm:$0xff] %vm638_vm1, %v617_v51  ;;  %4021 = vmatmul.msk.f32.gmra.mxu1 %vm638_vm1, %v1114_v52  ;;  %4056 = vmatmul.msk.f32.gmra.mxu2 %vm638_vm1, %v1114_v52 }
 0x110   : > { %4086 = vmatmul.msk.f32.gmra.mxu3 %vm638_vm1, %v1114_v52  ;;  %v468_v53 = vpop.f32.mrf.mxu0 }
 0x111   : > { %v545_v55 = vmul.f32 %v4537_v18, %v468_v53 }
 0x113   : > { %v582_v56 = vadd.f32 %v4542_v19, %v545_v55  ;;  %4003 = vmatmul.msk.f32.gmra.mxu0 %vm294_vm0, %v288_v54 }
 0x115   : > { %v618_v57 = vmax.f32 %v582_v56, 0.0 }
 0x116   : > { %v1115_v58 = vld [vmem:[#allocation2 + $0x7f] sm:$0xff] }
 0x117   : > { %655 = vst.msk [vmem:[#allocation2 + $0x88] sm:$0xff] %vm638_vm1, %v618_v57  ;;  %4022 = vmatmul.msk.f32.gmra.mxu1 %vm638_vm1, %v1115_v58  ;;  %4057 = vmatmul.msk.f32.gmra.mxu2 %vm638_vm1, %v1115_v58 }
 0x118   : > { %4087 = vmatmul.msk.f32.gmra.mxu3 %vm638_vm1, %v1115_v58  ;;  %v471_v59 = vpop.f32.mrf.mxu0 }
 0x119   : > { %v546_v61 = vmul.f32 %v4537_v18, %v471_v59 }
 0x11b   : > { %v583_v62 = vadd.f32 %v4542_v19, %v546_v61  ;;  %4004 = vmatmul.msk.f32.gmra.mxu0 %vm294_vm0, %v289_v60 }
 0x11d   : > { %v619_v63 = vmax.f32 %v583_v62, 0.0 }
 0x11e   : > { %v1116_v0 = vld [vmem:[#allocation2 + $0x87] sm:$0xff] }
 0x11f   : > { %656 = vst.msk [vmem:[#allocation2 + $0x90] sm:$0xff] %vm638_vm1, %v619_v63  ;;  %4023 = vmatmul.msk.f32.gmra.mxu1 %vm638_vm1, %v1116_v0  ;;  %4058 = vmatmul.msk.f32.gmra.mxu2 %vm638_vm1, %v1116_v0 }
 0x120   : > { %4088 = vmatmul.msk.f32.gmra.mxu3 %vm638_vm1, %v1116_v0  ;;  %v474_v1 = vpop.f32.mrf.mxu0 }
 0x121   : > { %v547_v3 = vmul.f32 %v4537_v18, %v474_v1  ;;  %v1100_v1 = vld [vmem:[#allocation2 + $0x7] sm:$0xff] }
 0x123   : > { %v584_v4 = vadd.f32 %v4542_v19, %v547_v3  ;;  %4005 = vmatmul.msk.f32.gmra.mxu0 %vm294_vm0, %v290_v2 }
 0x125   : > { %v620_v5 = vmax.f32 %v584_v4, 0.0 }
 0x126   : > { %v1117_v8 = vld [vmem:[#allocation2 + $0x8f] sm:$0xff] }
 0x127   : > { %657 = vst.msk [vmem:[#allocation2 + $0x98] sm:$0xff] %vm638_vm1, %v620_v5  ;;  %4024 = vmatmul.msk.f32.gmra.mxu1 %vm638_vm1, %v1117_v8  ;;  %4059 = vmatmul.msk.f32.gmra.mxu2 %vm638_vm1, %v1117_v8 }
 0x128   : > { %4089 = vmatmul.msk.f32.gmra.mxu3 %vm638_vm1, %v1117_v8  ;;  %v477_v9 = vpop.f32.mrf.mxu0 }
 0x129   : > { %v548_v11 = vmul.f32 %v4537_v18, %v477_v9 }
 0x12b   : > { %v585_v12 = vadd.f32 %v4542_v19, %v548_v11  ;;  %4006 = vmatmul.msk.f32.gmra.mxu0 %vm294_vm0, %v291_v10  ;;  %v1101_v11 = vld [vmem:[#allocation2 + $0xf] sm:$0xff] }
 0x12d   : > { %v621_v14 = vmax.f32 %v585_v12, 0.0 }
 0x12e   : > { %v1118_v15 = vld [vmem:[#allocation2 + $0x97] sm:$0xff] }
 0x12f   : > { %658 = vst.msk [vmem:[#allocation2 + $0xa0] sm:$0xff] %vm638_vm1, %v621_v14  ;;  %4025 = vmatmul.msk.f32.gmra.mxu1 %vm638_vm1, %v1118_v15  ;;  %4060 = vmatmul.msk.f32.gmra.mxu2 %vm638_vm1, %v1118_v15 }
 0x130   : > { %4090 = vmatmul.msk.f32.gmra.mxu3 %vm638_vm1, %v1118_v15  ;;  %v480_v16 = vpop.f32.mrf.mxu0 }
 0x131   : > { %v549_v17 = vmul.f32 %v4537_v18, %v480_v16 }
 0x133   : > { %v586_v22 = vadd.f32 %v4542_v19, %v549_v17  ;;  %4009 = vmatmul.msk.f32.vlgmr.msrb.gmra.mxu0 %vm638_vm1, %v4718_v20 }
 0x134   : > { %4075 = vmatpush.msk.msrb.mxu0 %vm1233_vm2, %v4613_v6 }
 0x135   : > { %v622_v23 = vmax.f32 %v586_v22, 0.0 }
 0x136   : > { %v1119_v24 = vld [vmem:[#allocation2 + $0x9f] sm:$0xff] }
 0x137   : > { %659 = vst.msk [vmem:[#allocation2 + $0xa8] sm:$0xff] %vm638_vm1, %v622_v23  ;;  %4026 = vmatmul.msk.f32.gmra.mxu1 %vm638_vm1, %v1119_v24  ;;  %4061 = vmatmul.msk.f32.gmra.mxu2 %vm638_vm1, %v1119_v24 }
 0x138   : > { %4091 = vmatmul.msk.f32.gmra.mxu3 %vm638_vm1, %v1119_v24  ;;  %v483_v26 = vpop.f32.mrf.mxu0 }
 0x139   : > { %v550_v27 = vmul.f32 %v4537_v18, %v483_v26 }
 0x13b   : > { %v587_v30 = vadd.f32 %v4542_v19, %v550_v27  ;;  %4010 = vmatmul.msk.f32.gmra.mxu0 %vm638_vm1, %v4730_v29 }
 0x13d   : > { %v623_v6 = vmax.f32 %v587_v30, 0.0 }
 0x13e   : > { %v1120_v31 = vld [vmem:[#allocation2 + $0xa7] sm:$0xff] }
 0x13f   : > { %660 = vst.msk [vmem:[#allocation2 + $0xb0] sm:$0xff] %vm638_vm1, %v623_v6  ;;  %4027 = vmatmul.msk.f32.gmra.mxu1 %vm638_vm1, %v1120_v31  ;;  %4062 = vmatmul.msk.f32.gmra.mxu2 %vm638_vm1, %v1120_v31 }
 0x140   : > { %4092 = vmatmul.msk.f32.gmra.mxu3 %vm638_vm1, %v1120_v31  ;;  %v486_v32 = vpop.f32.mrf.mxu0 }
 0x141   : > { %v551_v33 = vmul.f32 %v4537_v18, %v486_v32 }
 0x143   : > { %v588_v35 = vadd.f32 %v4542_v19, %v551_v33  ;;  %4011 = vmatmul.msk.f32.gmra.mxu0 %vm638_vm1, %v4740_v34 }
 0x145   : > { %v624_v36 = vmax.f32 %v588_v35, 0.0 }
 0x146   : > { %v1121_v37 = vld [vmem:[#allocation2 + $0xaf] sm:$0xff] }
 0x147   : > { %661 = vst.msk [vmem:[#allocation2 + $0xb8] sm:$0xff] %vm638_vm1, %v624_v36  ;;  %4028 = vmatmul.msk.f32.gmra.mxu1 %vm638_vm1, %v1121_v37  ;;  %4063 = vmatmul.msk.f32.gmra.mxu2 %vm638_vm1, %v1121_v37 }
 0x148   : > { %4093 = vmatmul.msk.f32.gmra.mxu3 %vm638_vm1, %v1121_v37  ;;  %v489_v38 = vpop.f32.mrf.mxu0 }
 0x149   : > { %v552_v39 = vmul.f32 %v4537_v18, %v489_v38 }
 0x14b   : > { %v589_v41 = vadd.f32 %v4542_v19, %v552_v39  ;;  %4012 = vmatmul.msk.f32.gmra.mxu0 %vm638_vm1, %v4750_v40 }
 0x14d   : > { %v625_v42 = vmax.f32 %v589_v41, 0.0 }
 0x14e   : > { %v1122_v43 = vld [vmem:[#allocation2 + $0xb7] sm:$0xff] }
 0x14f   : > { %662 = vst.msk [vmem:[#allocation2 + $0xc0] sm:$0xff] %vm638_vm1, %v625_v42  ;;  %4029 = vmatmul.msk.f32.gmra.mxu1 %vm638_vm1, %v1122_v43  ;;  %4064 = vmatmul.msk.f32.gmra.mxu2 %vm638_vm1, %v1122_v43 }
 0x150   : > { %4094 = vmatmul.msk.f32.gmra.mxu3 %vm638_vm1, %v1122_v43  ;;  %v492_v44 = vpop.f32.mrf.mxu0 }
 0x151   : > { %v553_v45 = vmul.f32 %v4537_v18, %v492_v44 }
 0x153   : > { %v590_v47 = vadd.f32 %v4542_v19, %v553_v45  ;;  %4013 = vmatmul.msk.f32.gmra.mxu0 %vm638_vm1, %v4760_v46 }
 0x155   : > { %v626_v48 = vmax.f32 %v590_v47, 0.0 }
 0x156   : > { %v1123_v49 = vld [vmem:[#allocation2 + $0xbf] sm:$0xff] }
 0x157   : > { %663 = vst.msk [vmem:[#allocation2 + $0xc8] sm:$0xff] %vm638_vm1, %v626_v48  ;;  %4030 = vmatmul.msk.f32.gmra.mxu1 %vm638_vm1, %v1123_v49  ;;  %4065 = vmatmul.msk.f32.gmra.mxu2 %vm638_vm1, %v1123_v49 }
 0x158   : > { %4095 = vmatmul.msk.f32.gmra.mxu3 %vm638_vm1, %v1123_v49  ;;  %v495_v51 = vpop.f32.mrf.mxu0 }
 0x159   : > { %v554_v52 = vmul.f32 %v4537_v18, %v495_v51 }
 0x15a   : > { %v1397_v53 = vpop.f32.mrf.mxu2 }
 0x15b   : > { %v591_v54 = vadd.f32 %v4542_v19, %v554_v52  ;;  %4014 = vmatmul.msk.f32.gmra.mxu0 %vm638_vm1, %v4615_v7 }
 0x15d   : > { %v627_v55 = vmax.f32 %v591_v54, 0.0 }
 0x15e   : > { %v1124_v56 = vld [vmem:[#allocation2 + $0xc7] sm:$0xff] }
 0x15f   : > { %664 = vst.msk [vmem:[#allocation2 + $0xd0] sm:$0xff] %vm638_vm1, %v627_v55  ;;  %4031 = vmatmul.msk.f32.gmra.mxu1 %vm638_vm1, %v1124_v56  ;;  %4066 = vmatmul.msk.f32.gmra.mxu2 %vm638_vm1, %v1124_v56 }
 0x160   : > { %4096 = vmatmul.msk.f32.gmra.mxu3 %vm638_vm1, %v1124_v56  ;;  %v498_v57 = vpop.f32.mrf.mxu0 }
 0x161   : > { %v555_v58 = vmul.f32 %v4537_v18, %v498_v57  ;;  %v4278_v57 = vld [vmem:[%s5846_s2 + $0x20] sm:$0xf] }
 0x162   : > { %v1400_v59 = vpop.f32.mrf.mxu2  ;;  %4279 = vmatpush.msk.msra.mxu2 %vm1233_vm2, %v4278_v57 }
 0x163   : > { %v592_v60 = vadd.f32 %v4542_v19, %v555_v58  ;;  %4015 = vmatmul.msk.f32.gmra.mxu0 %vm638_vm1, %v4626_v13  ;;  %v4210_v58 = vld [vmem:[%s5846_s2 + $0x8] sm:$0xf] }
 0x164   : > { %v1275_v61 = vpop.f32.mrf.mxu1  ;;  %4245 = vmatpush.msk.msra.mxu1 %vm1233_vm2, %v4210_v58 }
 0x165   : > { %v628_v62 = vmax.f32 %v592_v60, 0.0  ;;  %v1398_v26 = vadd.f32 %v1397_v53, %v1275_v61 }
 0x166   : > { %v1125_v63 = vld [vmem:[#allocation2 + $0xcf] sm:$0xff] }
 0x167   : > { %665 = vst.msk [vmem:[#allocation2 + $0xd8] sm:$0xff] %vm638_vm1, %v628_v62  ;;  %4032 = vmatmul.msk.f32.gmra.mxu1 %vm638_vm1, %v1125_v63  ;;  %4067 = vmatmul.msk.f32.gmra.mxu2 %vm638_vm1, %v1125_v63 }
 0x168   : > { %4097 = vmatmul.msk.f32.gmra.mxu3 %vm638_vm1, %v1125_v63  ;;  %v501_v0 = vpop.f32.mrf.mxu0 }
 0x169   : > { %v556_v2 = vmul.f32 %v4537_v18, %v501_v0 }
 0x16a   : > { %v1403_v3 = vpop.f32.mrf.mxu2 }
 0x16b   : > { %v593_v4 = vadd.f32 %v4542_v19, %v556_v2  ;;  %4042 = vmatmul.msk.f32.vlgmr.msra.gmra.mxu0 %vm638_vm1, %v1100_v1 }
 0x16c   : > { %v1278_v5 = vpop.f32.mrf.mxu1 }
 0x16d   : > { %v629_v8 = vmax.f32 %v593_v4, 0.0  ;;  %v1401_v38 = vadd.f32 %v1400_v59, %v1278_v5 }
 0x16e   : > { %v1126_v9 = vld [vmem:[#allocation2 + $0xd7] sm:$0xff] }
 0x16f   : > { %666 = vst.msk [vmem:[#allocation2 + $0xe0] sm:$0xff] %vm638_vm1, %v629_v8  ;;  %4033 = vmatmul.msk.f32.gmra.mxu1 %vm638_vm1, %v1126_v9  ;;  %4068 = vmatmul.msk.f32.gmra.mxu2 %vm638_vm1, %v1126_v9 }
 0x170   : > { %4098 = vmatmul.msk.f32.gmra.mxu3 %vm638_vm1, %v1126_v9  ;;  %v504_v10 = vpop.f32.mrf.mxu0 }
 0x171   : > { %v557_v12 = vmul.f32 %v4537_v18, %v504_v10 }
 0x172   : > { %v1406_v14 = vpop.f32.mrf.mxu2 }
 0x173   : > { %v594_v15 = vadd.f32 %v4542_v19, %v557_v12  ;;  %4043 = vmatmul.msk.f32.gmra.mxu0 %vm638_vm1, %v1101_v11 }
 0x174   : > { %v1281_v16 = vpop.f32.mrf.mxu1 }
 0x175   : > { %v630_v17 = vmax.f32 %v594_v15, 0.0  ;;  %v1404_v49 = vadd.f32 %v1403_v3, %v1281_v16  ;;  %v1878_v15 = vld [vmem:[#allocation2 + $0x8] sm:$0xff] }
 0x176   : > { %v1127_v22 = vld [vmem:[#allocation2 + $0xdf] sm:$0xff] }
 0x177   : > { %667 = vst.msk [vmem:[#allocation2 + $0xe8] sm:$0xff] %vm638_vm1, %v630_v17  ;;  %4034 = vmatmul.msk.f32.gmra.mxu1 %vm638_vm1, %v1127_v22  ;;  %4069 = vmatmul.msk.f32.gmra.mxu2 %vm638_vm1, %v1127_v22 }
 0x178   : > { %4099 = vmatmul.msk.f32.gmra.mxu3 %vm638_vm1, %v1127_v22  ;;  %v507_v23 = vpop.f32.mrf.mxu0 }
 0x179   : > { %v558_v24 = vmul.f32 %v4537_v18, %v507_v23 }
 0x17a   : > { %v4804_v27 = vpop.f32.mrf.mxu2 }
 0x17b   : > { %v595_v30 = vadd.f32 %v4542_v19, %v558_v24  ;;  %v1643_v6 = vpop.f32.mrf.mxu3  ;;  %4044 = vmatmul.msk.f32.gmra.mxu0 %vm638_vm1, %v4718_v20 }
 0x17c   : > { %v4809_v31 = vadd.f32 %v1643_v6, %v1398_v26  ;;  %v1284_v32 = vpop.f32.mrf.mxu1 }
 0x17d   : > { %v631_v33 = vmax.f32 %v595_v30, 0.0  ;;  %v1407_v60 = vadd.f32 %v1406_v14, %v1284_v32 }
 0x17e   : > { %v1128_v35 = vld [vmem:[#allocation2 + $0xe7] sm:$0xff] }
 0x17f   : > { %668 = vst.msk [vmem:[#allocation2 + $0xf0] sm:$0xff] %vm638_vm1, %v631_v33  ;;  %4035 = vmatmul.msk.f32.gmra.mxu1 %vm638_vm1, %v1128_v35  ;;  %4070 = vmatmul.msk.f32.gmra.mxu2 %vm638_vm1, %v1128_v35  ;;  %v1879_v33 = vld [vmem:[#allocation2 + $0x10] sm:$0xff] }
 0x180   : > { %4100 = vmatmul.msk.f32.gmra.mxu3 %vm638_vm1, %v1128_v35  ;;  %v510_v36 = vpop.f32.mrf.mxu0 }
 0x181   : > { %v559_v37 = vmul.f32 %v4537_v18, %v510_v36 }
 0x182   : > { %v4816_v39 = vpop.f32.mrf.mxu2 }
 0x183   : > { %v596_v20 = vadd.f32 %v4542_v19, %v559_v37  ;;  %v1646_v41 = vpop.f32.mrf.mxu3  ;;  %4045 = vmatmul.msk.f32.gmra.mxu0 %vm638_vm1, %v4730_v29 }
 0x184   : > { %v4821_v42 = vadd.f32 %v1646_v41, %v1401_v38  ;;  %v1287_v43 = vpop.f32.mrf.mxu1 }
 0x185   : > { %v632_v44 = vmax.f32 %v596_v20, 0.0  ;;  %v1410_v8 = vadd.f32 %v4804_v27, %v1287_v43 }
 0x186   : > { %v1129_v45 = vld [vmem:[#allocation2 + $0xef] sm:$0xff] }
 0x187   : > { %669 = vst.msk [vmem:[#allocation2 + $0xf8] sm:$0xff] %vm638_vm1, %v632_v44  ;;  %4036 = vmatmul.msk.f32.gmra.mxu1 %vm638_vm1, %v1129_v45  ;;  %4071 = vmatmul.msk.f32.gmra.mxu2 %vm638_vm1, %v1129_v45 }
 0x188   : > { %4101 = vmatmul.msk.f32.gmra.mxu3 %vm638_vm1, %v1129_v45  ;;  %v513_v47 = vpop.f32.mrf.mxu0 }
 0x189   : > { %v560_v48 = vmul.f32 %v4537_v18, %v513_v47  ;;  %v1880_v47 = vld [vmem:[#allocation2 + $0x18] sm:$0xff] }
 0x18a   : > { %v4828_v50 = vpop.f32.mrf.mxu2 }
 0x18b   : > { %v597_v29 = vadd.f32 %v4542_v19, %v560_v48  ;;  %v1649_v51 = vpop.f32.mrf.mxu3  ;;  %4046 = vmatmul.msk.f32.gmra.mxu0 %vm638_vm1, %v4740_v34 }
 0x18c   : > { %v4833_v52 = vadd.f32 %v1649_v51, %v1404_v49  ;;  %v1290_v53 = vpop.f32.mrf.mxu1  ;;  %v1881_v51 = vld [vmem:[#allocation2 + $0x20] sm:$0xff] }
 0x18d   : > { %v633_v54 = vmax.f32 %v597_v29, 0.0  ;;  %v1413_v24 = vadd.f32 %v4816_v39, %v1290_v53 }
 0x18e   : > { %v1130_v55 = vld [vmem:[#allocation2 + $0xf7] sm:$0xff] }
 0x18f   : > { %670 = vst.msk [vmem:[#allocation2 + $0x100] sm:$0xff] %vm638_vm1, %v633_v54  ;;  %4037 = vmatmul.msk.f32.gmra.mxu1 %vm638_vm1, %v1130_v55  ;;  %4072 = vmatmul.msk.f32.gmra.mxu2 %vm638_vm1, %v1130_v55 }
 0x190   : > { %4102 = vmatmul.msk.f32.gmra.mxu3 %vm638_vm1, %v1130_v55  ;;  %v516_v56 = vpop.f32.mrf.mxu0 }
 0x191   : > { %v561_v59 = vmul.f32 %v4537_v18, %v516_v56  ;;  %v4211_v56 = vld [vmem:[%s5846_s2 + $0x14] sm:$0xf] }
 0x192   : > { %v4848_v61 = vpop.f32.mrf.mxu2  ;;  %4212 = vmatpush.msk.msra.mxu0 %vm1233_vm2, %v4211_v56 }
 0x193   : > { %v598_v62 = vadd.f32 %v4542_v19, %v561_v59  ;;  %v1652_v63 = vpop.f32.mrf.mxu3  ;;  %4047 = vmatmul.msk.f32.gmra.mxu0 %vm638_vm1, %v4750_v40  ;;  %v1882_v59 = vld [vmem:[#allocation2 + $0x28] sm:$0xff] }
 0x194   : > { %v4853_v0 = vadd.f32 %v1652_v63, %v1407_v60  ;;  %v1293_v1 = vpop.f32.mrf.mxu1 }
 0x195   : > { %v634_v2 = vmax.f32 %v598_v62, 0.0  ;;  %v1416_v38 = vadd.f32 %v4828_v50, %v1293_v1 }
 0x196   : > { %v1131_v3 = vld [vmem:[#allocation2 + $0xff] sm:$0xff] }
 0x197   : > { %671 = vst.msk [vmem:[#allocation2 + $0x108] sm:$0xff] %vm638_vm1, %v634_v2  ;;  %4038 = vmatmul.msk.f32.gmra.mxu1 %vm638_vm1, %v1131_v3  ;;  %4073 = vmatmul.msk.f32.gmra.mxu2 %vm638_vm1, %v1131_v3  ;;  %v1883_v2 = vld [vmem:[#allocation2 + $0x30] sm:$0xff] }
 0x198   : > { %4103 = vmatmul.msk.f32.gmra.mxu3 %vm638_vm1, %v1131_v3  ;;  %v519_v4 = vpop.f32.mrf.mxu0 }
 0x199   : > { %v562_v5 = vmul.f32 %v4537_v18, %v519_v4 }
 0x19a   : > { %v1421_v9 = vpop.f32.mrf.mxu2 }
 0x19b   : > { %v599_v10 = vadd.f32 %v4542_v19, %v562_v5  ;;  %v1655_v11 = vpop.f32.mrf.mxu3  ;;  %4048 = vmatmul.msk.f32.gmra.mxu0 %vm638_vm1, %v4760_v46 }
 0x19c   : > { %v4864_v12 = vadd.f32 %v1655_v11, %v1410_v8  ;;  %v1296_v14 = vpop.f32.mrf.mxu1 }
 0x19d   : > { %v635_v16 = vmax.f32 %v599_v10, 0.0  ;;  %v1884_v10 = vld [vmem:[#allocation2 + $0x38] sm:$0xff] }
 0x19e   : > { %v1133_v17 = vld [vmem:[#allocation2 + $0x107] sm:$0xff] }
 0x19f   : > { %672 = vst.msk [vmem:[#allocation2 + $0x110] sm:$0xff] %vm638_vm1, %v635_v16  ;;  %4039 = vmatmul.msk.f32.gmra.mxu1 %vm638_vm1, %v1133_v17  ;;  %4144 = vmatmul.msk.f32.vlgmr.msrb.gmra.mxu2 %vm638_vm1, %v1878_v15 }
 0x1a0   : > { %4104 = vmatmul.msk.f32.gmra.mxu3 %vm638_vm1, %v1133_v17  ;;  %v522_v22 = vpop.f32.mrf.mxu0 }
 0x1a1   : > { %v563_v23 = vmul.f32 %v4537_v18, %v522_v22  ;;  %v1885_v22 = vld [vmem:[#allocation2 + $0x40] sm:$0xff] }
 0x1a2   : > { %v1424_v26 = vpop.f32.mrf.mxu2 }
 0x1a3   : > { %v600_v27 = vadd.f32 %v4542_v19, %v563_v23  ;;  %v1658_v30 = vpop.f32.mrf.mxu3  ;;  %4076 = vmatmul.msk.f32.vlgmr.msrb.gmra.mxu0 %vm638_vm1, %v4740_v34 }
 0x1a4   : > { %v4875_v6 = vadd.f32 %v1658_v30, %v1413_v24  ;;  %v1299_v32 = vpop.f32.mrf.mxu1 }
 0x1a5   : > { %v636_v35 = vmax.f32 %v600_v27, 0.0  ;;  %v1422_v54 = vadd.f32 %v1421_v9, %v1299_v32  ;;  %v4948_v27 = vld [vmem:[#allocation2 + $0x19] sm:$0xff] }
 0x1a6   : > { %v1134_v36 = vld [vmem:[#allocation2 + $0x10f] sm:$0xff] }
 0x1a7   : > { %673 = vst.msk [vmem:[#allocation2 + $0x118] sm:$0xff] %vm638_vm1, %v636_v35  ;;  %4040 = vmatmul.msk.f32.gmra.mxu1 %vm638_vm1, %v1134_v36  ;;  %4145 = vmatmul.msk.f32.gmra.mxu2 %vm638_vm1, %v1879_v33  ;;  %v1886_v33 = vld [vmem:[#allocation2 + $0x48] sm:$0xff] }
 0x1a8   : > { %681 = vst.msk [vmem:[#allocation2 + $0x118] sm:$0xff] %vm638_vm1, %v4439_v25  ;;  %4105 = vmatmul.msk.f32.gmra.mxu3 %vm638_vm1, %v1134_v36  ;;  %v525_v37 = vpop.f32.mrf.mxu0 }
 0x1a9   : > { %v564_v34 = vmul.f32 %v4537_v18, %v525_v37 }
 0x1aa   : > { %v1427_v39 = vpop.f32.mrf.mxu2 }
 0x1ab   : > { %v601_v20 = vadd.f32 %v4542_v19, %v564_v34  ;;  %v1661_v41 = vpop.f32.mrf.mxu3  ;;  %4077 = vmatmul.msk.f32.gmra.mxu0 %vm638_vm1, %v4750_v40  ;;  %v1419_v40 = vadd.f32 %v4848_v61, %v1296_v14  ;;  %v4959_v34 = vld [vmem:[#allocation2 + $0x21] sm:$0xff] }
 0x1ac   : > { %v4888_v43 = vadd.f32 %v1661_v41, %v1416_v38  ;;  %v1302_v44 = vpop.f32.mrf.mxu1  ;;  %v1887_v41 = vld [vmem:[#allocation2 + $0x50] sm:$0xff] }
 0x1ad   : > { %v637_v45 = vmax.f32 %v601_v20, 0.0  ;;  %v1425_v61 = vadd.f32 %v1424_v26, %v1302_v44 }
 0x1af   : > { %674 = vst.msk [vmem:[#allocation2 + $0x120] sm:$0xff] %vm638_vm1, %v637_v45  ;;  %4111 = vmatmul.msk.f32.vlgmr.msrb.gmra.mxu1 %vm638_vm1, %v1880_v47  ;;  %4146 = vmatmul.msk.f32.gmra.mxu2 %vm638_vm1, %v1880_v47  ;;  %v1502_v18 = vld [vmem:[#allocation2 + $0x117] sm:$0xff]  ;;  %v4968_v47 = vld [vmem:[#allocation2 + $0x29] sm:$0xff] }
 0x1b0   : > { %682 = vst.msk [vmem:[#allocation2 + $0x120] sm:$0xff] %vm638_vm1, %v4439_v25  ;;  %v4895_v19 = vpop.f32.mrf.mxu0  ;;  %4106 = vmatmul.msk.f32.gmra.mxu3 %vm638_vm1, %v1502_v18 }
 0x1b2   : > { %v1430_v48 = vpop.f32.mrf.mxu2 }
 0x1b3   : > { %v1664_v49 = vpop.f32.mrf.mxu3  ;;  %4078 = vmatmul.msk.f32.gmra.mxu0 %vm638_vm1, %v4760_v46 }
 0x1b4   : > { %v4901_v50 = vadd.f32 %v1664_v49, %v1419_v40  ;;  %v1305_v29 = vpop.f32.mrf.mxu1 }
 0x1b5   : > { %v1428_v4 = vadd.f32 %v1427_v39, %v1305_v29  ;;  %v1888_v29 = vld [vmem:[#allocation2 + $0x58] sm:$0xff] }
 0x1b7   : > { %4112 = vmatmul.msk.f32.gmra.mxu1 %vm638_vm1, %v1881_v51  ;;  %4147 = vmatmul.msk.f32.gmra.mxu2 %vm638_vm1, %v1881_v51  ;;  %v1503_v25 = vld [vmem:[#allocation2 + $0x11f] sm:$0xff] }
 0x1b8   : > { %v4905_v53 = vpop.f32.mrf.mxu0  ;;  %4107 = vmatmul.msk.f32.gmra.mxu3 %vm638_vm1, %v1503_v25 }
 0x1ba   : > { %v1433_v55 = vpop.f32.mrf.mxu2 }
 0x1bb   : > { %v1667_v46 = vpop.f32.mrf.mxu3  ;;  %4079 = vmatmul.msk.f32.gmra.mxu0 %vm638_vm1, %v4615_v7 }
 0x1bc   : > { %v4913_v57 = vadd.f32 %v1667_v46, %v1422_v54  ;;  %v1308_v58 = vpop.f32.mrf.mxu1  ;;  %v4979_v54 = vld [vmem:[#allocation2 + $0x31] sm:$0xff] }
 0x1bd   : > { %v1431_v14 = vadd.f32 %v1430_v48, %v1308_v58 }
 0x1bf   : > { %4113 = vmatmul.msk.f32.gmra.mxu1 %vm638_vm1, %v1882_v59  ;;  %4148 = vmatmul.msk.f32.gmra.mxu2 %vm638_vm1, %v1882_v59 }
 0x1c0   : > { %v4918_v60 = vpop.f32.mrf.mxu0  ;;  %4178 = vmatmul.msk.f32.vlgmr.msrb.gmra.mxu3 %vm638_vm1, %v1882_v59  ;;  %v1889_v59 = vld [vmem:[#allocation2 + $0x60] sm:$0xff] }
 0x1c2   : > { %v1436_v62 = vpop.f32.mrf.mxu2 }
 0x1c3   : > { %v1670_v63 = vpop.f32.mrf.mxu3  ;;  %4080 = vmatmul.msk.f32.gmra.mxu0 %vm638_vm1, %v4626_v13 }
 0x1c4   : > { %v4923_v7 = vadd.f32 %v1670_v63, %v1425_v61  ;;  %v1311_v1 = vpop.f32.mrf.mxu1  ;;  %v4990_v63 = vld [vmem:[#allocation2 + $0x39] sm:$0xff] }
 0x1c5   : > { %v1434_v24 = vadd.f32 %v1433_v55, %v1311_v1 }
 0x1c7   : > { %4114 = vmatmul.msk.f32.gmra.mxu1 %vm638_vm1, %v1883_v2  ;;  %4149 = vmatmul.msk.f32.gmra.mxu2 %vm638_vm1, %v1883_v2 }
 0x1c8   : > { %v4927_v3 = vpop.f32.mrf.mxu0  ;;  %4179 = vmatmul.msk.f32.gmra.mxu3 %vm638_vm1, %v1883_v2 }
 0x1ca   : > { %v1439_v5 = vpop.f32.mrf.mxu2 }
 0x1cb   : > { %v1673_v8 = vpop.f32.mrf.mxu3  ;;  %4081 = vmatmul.msk.f32.gmra.mxu0 %vm638_vm1, %v4635_v21 }
 0x1cc   : > { %v4932_v9 = vadd.f32 %v1673_v8, %v1428_v4  ;;  %v1314_v13 = vpop.f32.mrf.mxu1 }
 0x1cd   : > { %v1437_v35 = vadd.f32 %v1436_v62, %v1314_v13 }
 0x1cf   : > { %4115 = vmatmul.msk.f32.gmra.mxu1 %vm638_vm1, %v1884_v10  ;;  %4150 = vmatmul.msk.f32.gmra.mxu2 %vm638_vm1, %v1884_v10 }
 0x1d0   : > { %v4936_v11 = vpop.f32.mrf.mxu0  ;;  %4180 = vmatmul.msk.f32.gmra.mxu3 %vm638_vm1, %v1884_v10 }
 0x1d2   : > { %v1442_v15 = vpop.f32.mrf.mxu2 }
 0x1d3   : > { %v1676_v16 = vpop.f32.mrf.mxu3  ;;  %4082 = vmatmul.msk.f32.gmra.mxu0 %vm638_vm1, %v4646_v28 }
 0x1d4   : > { %v4941_v17 = vadd.f32 %v1676_v16, %v1431_v14  ;;  %v1317_v21 = vpop.f32.mrf.mxu1  ;;  %v5001_v14 = vld [vmem:[#allocation2 + $0x41] sm:$0xff] }
 0x1d5   : > { %v1440_v44 = vadd.f32 %v1439_v5, %v1317_v21  ;;  %v1890_v5 = vld [vmem:[#allocation2 + $0x68] sm:$0xff] }
 0x1d7   : > { %4116 = vmatmul.msk.f32.gmra.mxu1 %vm638_vm1, %v1885_v22  ;;  %4151 = vmatmul.msk.f32.gmra.mxu2 %vm638_vm1, %v1885_v22 }
 0x1d8   : > { %v4945_v23 = vpop.f32.mrf.mxu0  ;;  %4181 = vmatmul.msk.f32.gmra.mxu3 %vm638_vm1, %v1885_v22  ;;  %v1891_v22 = vld [vmem:[#allocation2 + $0x70] sm:$0xff] }
 0x1da   : > { %v1445_v26 = vpop.f32.mrf.mxu2 }
 0x1db   : > { %v1679_v30 = vpop.f32.mrf.mxu3  ;;  %4213 = vmatmul.msk.f32.vlgmr.msra.gmra.mxu0 %vm638_vm1, %v4948_v27 }
 0x1dc   : > { %v4952_v28 = vadd.f32 %v1679_v30, %v1434_v24  ;;  %v1320_v32 = vpop.f32.mrf.mxu1 }
 0x1dd   : > { %v1443_v51 = vadd.f32 %v1442_v15, %v1320_v32  ;;  %v5012_v32 = vld [vmem:[#allocation2 + $0x49] sm:$0xff] }
 0x1df   : > { %4117 = vmatmul.msk.f32.gmra.mxu1 %vm638_vm1, %v1886_v33  ;;  %4152 = vmatmul.msk.f32.gmra.mxu2 %vm638_vm1, %v1886_v33 }
 0x1e0   : > { %4182 = vmatmul.msk.f32.gmra.mxu3 %vm638_vm1, %v1886_v33  ;;  %v4957_v36 = vpop.f32.mrf.mxu0 }
 0x1e2   : > { %v1448_v37 = vpop.f32.mrf.mxu2 }
 0x1e3   : > { %v1682_v38 = vpop.f32.mrf.mxu3  ;;  %4214 = vmatmul.msk.f32.gmra.mxu0 %vm638_vm1, %v4959_v34 }
 0x1e4   : > { %v4963_v39 = vadd.f32 %v1682_v38, %v1437_v35  ;;  %v1323_v20 = vpop.f32.mrf.mxu1  ;;  %v1892_v38 = vld [vmem:[#allocation2 + $0x78] sm:$0xff] }
 0x1e5   : > { %v1446_v61 = vadd.f32 %v1445_v26, %v1323_v20 }
 0x1e7   : > { %4118 = vmatmul.msk.f32.gmra.mxu1 %vm638_vm1, %v1887_v41  ;;  %4153 = vmatmul.msk.f32.gmra.mxu2 %vm638_vm1, %v1887_v41 }
 0x1e8   : > { %4183 = vmatmul.msk.f32.gmra.mxu3 %vm638_vm1, %v1887_v41  ;;  %v4972_v40 = vpop.f32.mrf.mxu0 }
 0x1ea   : > { %v1451_v45 = vpop.f32.mrf.mxu2 }
 0x1eb   : > { %v1685_v18 = vpop.f32.mrf.mxu3  ;;  %4215 = vmatmul.msk.f32.gmra.mxu0 %vm638_vm1, %v4968_v47 }
 0x1ec   : > { %v4974_v48 = vadd.f32 %v1685_v18, %v1440_v44  ;;  %v1326_v49 = vpop.f32.mrf.mxu1  ;;  %v5021_v44 = vld [vmem:[#allocation2 + $0x51] sm:$0xff] }
 0x1ed   : > { %v1449_v13 = vadd.f32 %v1448_v37, %v1326_v49 }
 0x1ef   : > { %4119 = vmatmul.msk.f32.gmra.mxu1 %vm638_vm1, %v1888_v29  ;;  %4154 = vmatmul.msk.f32.gmra.mxu2 %vm638_vm1, %v1888_v29 }
 0x1f0   : > { %4184 = vmatmul.msk.f32.gmra.mxu3 %vm638_vm1, %v1888_v29  ;;  %v4985_v58 = vpop.f32.mrf.mxu0 }
 0x1f2   : > { %v1454_v25 = vpop.f32.mrf.mxu2 }
 0x1f3   : > { %v1688_v55 = vpop.f32.mrf.mxu3  ;;  %4216 = vmatmul.msk.f32.gmra.mxu0 %vm638_vm1, %v4979_v54 }
 0x1f4   : > { %v4983_v56 = vadd.f32 %v1688_v55, %v1443_v51  ;;  %v1329_v46 = vpop.f32.mrf.mxu1  ;;  %v1893_v51 = vld [vmem:[#allocation2 + $0x80] sm:$0xff] }
 0x1f5   : > { %v1452_v24 = vadd.f32 %v1451_v45, %v1329_v46  ;;  %v5032_v46 = vld [vmem:[#allocation2 + $0x59] sm:$0xff] }
 0x1f6   : > { %5853 = vst [vmem:[#allocation3_spill] sm:$0xff] %v4983_v56  ;;  %v1899_v56 = vld [vmem:[#allocation2 + $0xb0] sm:$0xff] }
 0x1f7   : > { %4120 = vmatmul.msk.f32.gmra.mxu1 %vm638_vm1, %v1889_v59  ;;  %4155 = vmatmul.msk.f32.gmra.mxu2 %vm638_vm1, %v1889_v59 }
 0x1f8   : > { %4185 = vmatmul.msk.f32.gmra.mxu3 %vm638_vm1, %v1889_v59  ;;  %v4998_v8 = vpop.f32.mrf.mxu0  ;;  %v3468_v59 = vld [vmem:[%s5847_s3] sm:$0xf] }
 0x1f9   : > { %4312 = vmatpush.msk.msra.mxu3 %vm1233_vm2, %v3468_v59 }
 0x1fa   : > { %v1457_v62 = vpop.f32.mrf.mxu2 }
 0x1fb   : > { %v1691_v1 = vpop.f32.mrf.mxu3  ;;  %4217 = vmatmul.msk.f32.gmra.mxu0 %vm638_vm1, %v4990_v63 }
 0x1fc   : > { %v4994_v2 = vadd.f32 %v1691_v1, %v1446_v61  ;;  %v1332_v4 = vpop.f32.mrf.mxu1 }
 0x1fd   : > { %v1455_v20 = vadd.f32 %v1454_v25, %v1332_v4 }
 0x1fe   : > { %5854 = vst [vmem:[#allocation4_spill] sm:$0xff] %v4994_v2 }
 0x1ff   : > { %4121 = vmatmul.msk.f32.gmra.mxu1 %vm638_vm1, %v1890_v5  ;;  %4156 = vmatmul.msk.f32.gmra.mxu2 %vm638_vm1, %v1890_v5 }
 0x200   : > { %4186 = vmatmul.msk.f32.gmra.mxu3 %vm638_vm1, %v1890_v5  ;;  %v5010_v26 = vpop.f32.mrf.mxu0 }
 0x202   : > { %v1460_v10 = vpop.f32.mrf.mxu2 }
 0x203   : > { %v1694_v15 = vpop.f32.mrf.mxu3  ;;  %4218 = vmatmul.msk.f32.gmra.mxu0 %vm638_vm1, %v5001_v14 }
 0x204   : > { %v5005_v16 = vadd.f32 %v1694_v15, %v1449_v13  ;;  %v1335_v21 = vpop.f32.mrf.mxu1  ;;  %v1894_v13 = vld [vmem:[#allocation2 + $0x88] sm:$0xff] }
 0x205   : > { %v1458_v25 = vadd.f32 %v1457_v62, %v1335_v21  ;;  %v5047_v21 = vld [vmem:[#allocation2 + $0x61] sm:$0xff] }
 0x206   : > { %5855 = vst [vmem:[#allocation5_spill] sm:$0xff] %v5005_v16 }
 0x207   : > { %4122 = vmatmul.msk.f32.gmra.mxu1 %vm638_vm1, %v1891_v22  ;;  %4157 = vmatmul.msk.f32.gmra.mxu2 %vm638_vm1, %v1891_v22 }
 0x208   : > { %4187 = vmatmul.msk.f32.gmra.mxu3 %vm638_vm1, %v1891_v22  ;;  %v5025_v18 = vpop.f32.mrf.mxu0 }
 0x20a   : > { %v1463_v30 = vpop.f32.mrf.mxu2 }
 0x20b   : > { %v1697_v33 = vpop.f32.mrf.mxu3  ;;  %4219 = vmatmul.msk.f32.gmra.mxu0 %vm638_vm1, %v5012_v32 }
 0x20c   : > { %v5016_v35 = vadd.f32 %v1697_v33, %v1452_v24  ;;  %v1338_v37 = vpop.f32.mrf.mxu1 }
 0x20d   : > { %v1461_v62 = vadd.f32 %v1460_v10, %v1338_v37 }
 0x20e   : > { %5856 = vst [vmem:[#allocation6_spill] sm:$0xff] %v5016_v35  ;;  %v1898_v35 = vld [vmem:[#allocation2 + $0xa8] sm:$0xff] }
 0x20f   : > { %4123 = vmatmul.msk.f32.gmra.mxu1 %vm638_vm1, %v1892_v38  ;;  %4158 = vmatmul.msk.f32.gmra.mxu2 %vm638_vm1, %v1892_v38 }
 0x210   : > { %4188 = vmatmul.msk.f32.gmra.mxu3 %vm638_vm1, %v1892_v38  ;;  %v5042_v5 = vpop.f32.mrf.mxu0  ;;  %v1895_v38 = vld [vmem:[#allocation2 + $0x90] sm:$0xff] }
 0x212   : > { %v1466_v41 = vpop.f32.mrf.mxu2 }
 0x213   : > { %v1700_v45 = vpop.f32.mrf.mxu3  ;;  %4220 = vmatmul.msk.f32.gmra.mxu0 %vm638_vm1, %v5021_v44 }
 0x214   : > { %v5027_v49 = vadd.f32 %v1700_v45, %v1455_v20  ;;  %v1341_v29 = vpop.f32.mrf.mxu1  ;;  %v5058_v45 = vld [vmem:[#allocation2 + $0x69] sm:$0xff] }
 0x215   : > { %v1464_v10 = vadd.f32 %v1463_v30, %v1341_v29  ;;  %v5067_v29 = vld [vmem:[#allocation2 + $0x71] sm:$0xff] }
 0x216   : > { %5857 = vst [vmem:[#allocation7_spill] sm:$0xff] %v5027_v49 }
 0x217   : > { %4124 = vmatmul.msk.f32.gmra.mxu1 %vm638_vm1, %v1893_v51  ;;  %4159 = vmatmul.msk.f32.gmra.mxu2 %vm638_vm1, %v1893_v51 }
 0x218   : > { %4189 = vmatmul.msk.f32.gmra.mxu3 %vm638_vm1, %v1893_v51  ;;  %v5055_v20 = vpop.f32.mrf.mxu0 }
 0x21a   : > { %v1469_v55 = vpop.f32.mrf.mxu2 }
 0x21b   : > { %v1703_v61 = vpop.f32.mrf.mxu3  ;;  %4221 = vmatmul.msk.f32.gmra.mxu0 %vm638_vm1, %v5032_v46 }
 0x21c   : > { %v5040_v1 = vadd.f32 %v1703_v61, %v1458_v25  ;;  %v1344_v4 = vpop.f32.mrf.mxu1  ;;  %v1896_v61 = vld [vmem:[#allocation2 + $0x98] sm:$0xff] }
 0x21e   : > { %5858 = vst [vmem:[#allocation8_spill] sm:$0xff] %v5040_v1 }
 0x21f   : > { %4125 = vmatmul.msk.f32.gmra.mxu1 %vm638_vm1, %v1894_v13  ;;  %4160 = vmatmul.msk.f32.gmra.mxu2 %vm638_vm1, %v1894_v13 }
 0x220   : > { %4190 = vmatmul.msk.f32.gmra.mxu3 %vm638_vm1, %v1894_v13  ;;  %v1467_v13 = vadd.f32 %v1466_v41, %v1344_v4 }
 0x222   : > { %v2154_v15 = vpop.f32.mrf.mxu2 }
 0x223   : > { %v1706_v22 = vpop.f32.mrf.mxu3  ;;  %4222 = vmatmul.msk.f32.gmra.mxu0 %vm638_vm1, %v5047_v21 }
 0x224   : > { %v5051_v24 = vadd.f32 %v1706_v22, %v1461_v62  ;;  %v1347_v33 = vpop.f32.mrf.mxu1  ;;  %v1622_v62 = vpop.f32.mrf.mxu0 }
 0x225   : > { %v1470_v41 = vadd.f32 %v1469_v55, %v1347_v33  ;;  %v1377_v55 = vadd.f32 %v4972_v40, %v4895_v19 }
 0x226   : > { %5859 = vst [vmem:[#allocation9_spill] sm:$0xff] %v5051_v24 }
 0x227   : > { %4126 = vmatmul.msk.f32.gmra.mxu1 %vm638_vm1, %v1895_v38  ;;  %4161 = vmatmul.msk.f32.gmra.mxu2 %vm638_vm1, %v1895_v38  ;;  %v1718_v33 = vadd.f32 %v1622_v62, %v1377_v55  ;;  %v5108_v62 = vld [vmem:[#allocation2 + $0x89] sm:$0xff] }
 0x228   : > { %4191 = vmatmul.msk.f32.gmra.mxu3 %vm638_vm1, %v1895_v38 }
 0x22a   : > { %v2157_v37 = vpop.f32.mrf.mxu2 }
 0x22b   : > { %v1709_v51 = vpop.f32.mrf.mxu3  ;;  %4223 = vmatmul.msk.f32.gmra.mxu0 %vm638_vm1, %v5058_v45 }
 0x22c   : > { %v5062_v25 = vadd.f32 %v1709_v51, %v1464_v10  ;;  %v2032_v59 = vpop.f32.mrf.mxu1  ;;  %v1897_v51 = vld [vmem:[#allocation2 + $0xa0] sm:$0xff] }
 0x22e   : > { %5860 = vst [vmem:[#allocation10_spill] sm:$0xff] %v5062_v25  ;;  %v683_v25 = vlaneseq }
 0x22f   : > { %4127 = vmatmul.msk.f32.gmra.mxu1 %vm638_vm1, %v1896_v61  ;;  %4162 = vmatmul.msk.f32.gmra.mxu2 %vm638_vm1, %v1896_v61 }
 0x230   : > { %4192 = vmatmul.msk.f32.gmra.mxu3 %vm638_vm1, %v1896_v61  ;;  %v5078_v61 = vld [vmem:[#allocation2 + $0x79] sm:$0xff] }
 0x232   : > { %v2160_v30 = vpop.f32.mrf.mxu2 }
 0x233   : > { %v1712_v22 = vpop.f32.mrf.mxu3  ;;  %4224 = vmatmul.msk.f32.gmra.mxu0 %vm638_vm1, %v5067_v29 }
 0x234   : > { %v5071_v38 = vadd.f32 %v1712_v22, %v1467_v13  ;;  %v2035_v10 = vpop.f32.mrf.mxu1  ;;  %v5082_v13 = vshrl.u32 %v683_v25, 7  ;;  %v1625_v22 = vpop.f32.mrf.mxu0  ;;  %v2155_v25 = vadd.f32 %v2154_v15, %v2032_v59 }
 0x235   : > { %v2158_v15 = vadd.f32 %v2157_v37, %v2035_v10 }
 0x236   : > { %5861 = vst [vmem:[#allocation11_spill] sm:$0xff] %v5071_v38  ;;  %v720_v49 = vand.u32 15, %v5082_v13 }
 0x237   : > { %4128 = vmatmul.msk.f32.gmra.mxu1 %vm638_vm1, %v1897_v51  ;;  %4163 = vmatmul.msk.f32.gmra.mxu2 %vm638_vm1, %v1897_v51 }
 0x238   : > { %4193 = vmatmul.msk.f32.gmra.mxu3 %vm638_vm1, %v1897_v51  ;;  %vm1750_vm3 = vcmp.gt.s32.totalorder %v720_v49, 0  ;;  %v686_v49 = vadd.s32 16, %v5082_v13 }
 0x239   : > { %v1846_v19 = vsel %vm1750_vm3, %v1718_v33, 0.0 }
 0x23a   : > { %v5076_v4 = vpop.f32.mrf.mxu2 }
 0x23b   : > { %v1715_v24 = vpop.f32.mrf.mxu3  ;;  %4225 = vmatmul.msk.f32.gmra.mxu0 %vm638_vm1, %v5078_v61 }
 0x23c   : > { %v5084_v38 = vadd.f32 %v1715_v24, %v1470_v41  ;;  %v2038_v1 = vpop.f32.mrf.mxu1  ;;  %v5094_v24 = vld [vmem:[#allocation2 + $0x81] sm:$0xff]  ;;  %v1628_v40 = vpop.f32.mrf.mxu0 }
 0x23d   : > { %v2161_v10 = vadd.f32 %v2160_v30, %v2038_v1  ;;  %v1386_v1 = vadd.f32 %v5010_v26, %v4927_v3  ;;  %v688_v30 = vadd.s32 32, %v5082_v13  ;;  %v1902_v3 = vld [vmem:[#allocation2 + $0xc8] sm:$0xff]  ;;  %v1389_v26 = vadd.f32 %v5025_v18, %v4936_v11 }
 0x23e   : > { %5862 = vst [vmem:[#allocation12_spill] sm:$0xff] %v5084_v38 }
 0x23f   : > { %4129 = vmatmul.msk.f32.gmra.mxu1 %vm638_vm1, %v1898_v35  ;;  %4164 = vmatmul.msk.f32.gmra.mxu2 %vm638_vm1, %v1898_v35 }
 0x240   : > { %4194 = vmatmul.msk.f32.gmra.mxu3 %vm638_vm1, %v1898_v35  ;;  %v1380_v35 = vadd.f32 %v4985_v58, %v4905_v53  ;;  %v1383_v53 = vadd.f32 %v4998_v8, %v4918_v60 }
 0x242   : > { %v5092_v51 = vpop.f32.mrf.mxu2  ;;  %v1720_v37 = vadd.f32 %v1628_v40, %v1383_v53 }
 0x243   : > { %v2400_v41 = vpop.f32.mrf.mxu3  ;;  %4226 = vmatmul.msk.f32.gmra.mxu0 %vm638_vm1, %v5094_v24 }
 0x244   : > { %v2496_v38 = vadd.f32 %v2400_v41, %v2155_v25  ;;  %v2041_v16 = vpop.f32.mrf.mxu1  ;;  %v734_v41 = vand.u32 15, %v686_v49  ;;  %v1631_v58 = vpop.f32.mrf.mxu0 }
 0x246   : > { %v5098_v2 = vadd.f32 %v2496_v38, %v1846_v19  ;;  %v1719_v38 = vadd.f32 %v1625_v22, %v1380_v35  ;;  %vm1752_vm4 = vcmp.gt.s32.totalorder %v734_v41, 0  ;;  %v5121_v35 = vld [vmem:[#allocation2 + $0x91] sm:$0xff] }
 0x247   : > { %4130 = vmatmul.msk.f32.gmra.mxu1 %vm638_vm1, %v1899_v56  ;;  %4165 = vmatmul.msk.f32.gmra.mxu2 %vm638_vm1, %v1899_v56  ;;  %v1848_v8 = vsel %vm1752_vm4, %v1720_v37, 0.0  ;;  %v1721_v37 = vadd.f32 %v1631_v58, %v1386_v1 }
 0x248   : > { %4195 = vmatmul.msk.f32.gmra.mxu3 %vm638_vm1, %v1899_v56  ;;  %v1900_v56 = vld [vmem:[#allocation2 + $0xb8] sm:$0xff] }
 0x24a   : > { %v5106_v59 = vpop.f32.mrf.mxu2 }
 0x24b   : > { %v2403_v55 = vpop.f32.mrf.mxu3  ;;  %4227 = vmatmul.msk.f32.gmra.mxu0 %vm638_vm1, %v5108_v62 }
 0x24c   : > { %v2497_v33 = vadd.f32 %v2403_v55, %v2158_v15  ;;  %v2044_v25 = vpop.f32.mrf.mxu1  ;;  %v1634_v40 = vpop.f32.mrf.mxu0 }
 0x24e   : > { %v5112_v19 = vadd.f32 %v2497_v33, %v1719_v38  ;;  %v1901_v38 = vld [vmem:[#allocation2 + $0xc0] sm:$0xff]  ;;  %v2164_v33 = vadd.f32 %v5076_v4, %v2041_v16  ;;  %v1722_v16 = vadd.f32 %v1634_v40, %v1389_v26  ;;  %v2167_v4 = vadd.f32 %v5092_v51, %v2044_v25 }
 0x24f   : > { %4131 = vmatmul.msk.f32.gmra.mxu1 %vm638_vm1, %v1900_v56  ;;  %4166 = vmatmul.msk.f32.gmra.mxu2 %vm638_vm1, %v1900_v56  ;;  %v1392_v51 = vadd.f32 %v5042_v5, %v4945_v23  ;;  %v690_v25 = vadd.s32 48, %v5082_v13  ;;  %v1395_v23 = vadd.f32 %v5055_v20, %v4957_v36 }
 0x250   : > { %4196 = vmatmul.msk.f32.gmra.mxu3 %vm638_vm1, %v1900_v56  ;;  %v5136_v56 = vld [vmem:[#allocation2 + $0x99] sm:$0xff] }
 0x252   : > { %v5119_v22 = vpop.f32.mrf.mxu2 }
 0x253   : > { %v2406_v49 = vpop.f32.mrf.mxu3  ;;  %4228 = vmatmul.msk.f32.gmra.mxu0 %vm638_vm1, %v5121_v35 }
 0x254   : > { %v2498_v15 = vadd.f32 %v2406_v49, %v2161_v10  ;;  %v2047_v60 = vpop.f32.mrf.mxu1 }
 0x255   : > { %v2170_v40 = vadd.f32 %v5106_v59, %v2047_v60 }
 0x256   : > { %v5125_v55 = vadd.f32 %v2498_v15, %v1848_v8  ;;  %v748_v15 = vand.u32 15, %v688_v30  ;;  %v1637_v30 = vpop.f32.mrf.mxu0 }
 0x257   : > { %4132 = vmatmul.msk.f32.gmra.mxu1 %vm638_vm1, %v1901_v38  ;;  %4167 = vmatmul.msk.f32.gmra.mxu2 %vm638_vm1, %v1901_v38  ;;  %v1723_v26 = vadd.f32 %v1637_v30, %v1392_v51  ;;  %v5173_v30 = vld [vmem:[#allocation2 + $0xb1] sm:$0xff] }
 0x258   : > { %4197 = vmatmul.msk.f32.gmra.mxu3 %vm638_vm1, %v1901_v38  ;;  %vm1754_vm5 = vcmp.gt.s32.totalorder %v748_v15, 0  ;;  %v5148_v38 = vld [vmem:[#allocation2 + $0xa1] sm:$0xff]  ;;  %v5161_v15 = vld [vmem:[#allocation2 + $0xa9] sm:$0xff] }
 0x259   : > { %v1850_v18 = vsel %vm1754_vm5, %v1722_v16, 0.0 }
 0x25a   : > { %v5134_v41 = vpop.f32.mrf.mxu2 }
 0x25b   : > { %v2409_v53 = vpop.f32.mrf.mxu3  ;;  %4229 = vmatmul.msk.f32.gmra.mxu0 %vm638_vm1, %v5136_v56 }
 0x25c   : > { %v2499_v10 = vadd.f32 %v2409_v53, %v2164_v33  ;;  %v2050_v49 = vpop.f32.mrf.mxu1 }
 0x25d   : > { %v2173_v59 = vadd.f32 %v5119_v22, %v2050_v49  ;;  %v692_v22 = vadd.s32 64, %v5082_v13 }
 0x25e   : > { %v5140_v8 = vadd.f32 %v2499_v10, %v1721_v37  ;;  %v1903_v37 = vld [vmem:[#allocation2 + $0xd0] sm:$0xff] }
 0x25f   : > { %4133 = vmatmul.msk.f32.gmra.mxu1 %vm638_vm1, %v1902_v3  ;;  %4168 = vmatmul.msk.f32.gmra.mxu2 %vm638_vm1, %v1902_v3 }
 0x260   : > { %4198 = vmatmul.msk.f32.gmra.mxu3 %vm638_vm1, %v1902_v3 }
 0x262   : > { %v2178_v58 = vpop.f32.mrf.mxu2 }
 0x263   : > { %v2412_v1 = vpop.f32.mrf.mxu3  ;;  %4230 = vmatmul.msk.f32.gmra.mxu0 %vm638_vm1, %v5148_v38 }
 0x264   : > { %v2500_v33 = vadd.f32 %v2412_v1, %v2167_v4  ;;  %v2053_v11 = vpop.f32.mrf.mxu1  ;;  %v762_v1 = vand.u32 15, %v690_v25 }
 0x265   : > { %v2176_v49 = vadd.f32 %v5134_v41, %v2053_v11 }
 0x266   : > { %v5152_v53 = vadd.f32 %v2500_v33, %v1850_v18  ;;  %v1640_v33 = vpop.f32.mrf.mxu0  ;;  %vm1756_vm6 = vcmp.gt.s32.totalorder %v762_v1, 0 }
 0x267   : > { %4134 = vmatmul.msk.f32.gmra.mxu1 %vm638_vm1, %v1903_v37  ;;  %4169 = vmatmul.msk.f32.gmra.mxu2 %vm638_vm1, %v1903_v37  ;;  %v1724_v5 = vadd.f32 %v1640_v33, %v1395_v23  ;;  %v776_v23 = vand.u32 15, %v692_v22 }
 0x268   : > { %4199 = vmatmul.msk.f32.gmra.mxu3 %vm638_vm1, %v1903_v37  ;;  %v1904_v37 = vld [vmem:[#allocation2 + $0xd8] sm:$0xff] }
 0x269   : > { %v1852_v36 = vsel %vm1756_vm6, %v1724_v5, 0.0  ;;  %vm1758_vm7 = vcmp.gt.s32.totalorder %v776_v23, 0 }
 0x26a   : > { %v2181_v10 = vpop.f32.mrf.mxu2 }
 0x26b   : > { %v2415_v3 = vpop.f32.mrf.mxu3  ;;  %4231 = vmatmul.msk.f32.gmra.mxu0 %vm638_vm1, %v5161_v15 }
 0x26c   : > { %v2501_v16 = vadd.f32 %v2415_v3, %v2170_v40  ;;  %v2056_v4 = vpop.f32.mrf.mxu1  ;;  %v1905_v3 = vld [vmem:[#allocation2 + $0xe0] sm:$0xff] }
 0x26d   : > { %v2179_v41 = vadd.f32 %v2178_v58, %v2056_v4  ;;  %v694_v58 = vadd.s32 80, %v5082_v13 }
 0x26e   : > { %v5165_v18 = vadd.f32 %v2501_v16, %v1723_v26  ;;  %v5184_v16 = vld [vmem:[#allocation2 + $0xb9] sm:$0xff] }
 0x26f   : > { %4135 = vmatmul.msk.f32.gmra.mxu1 %vm638_vm1, %v1904_v37  ;;  %4170 = vmatmul.msk.f32.gmra.mxu2 %vm638_vm1, %v1904_v37 }
 0x270   : > { %5863 = vst [vmem:[#allocation13_spill] sm:$0xff] %v5165_v18  ;;  %4200 = vmatmul.msk.f32.gmra.mxu3 %vm638_vm1, %v1904_v37 }
 0x272   : > { %v2184_v60 = vpop.f32.mrf.mxu2 }
 0x273   : > { %v2418_v51 = vpop.f32.mrf.mxu3  ;;  %4232 = vmatmul.msk.f32.gmra.mxu0 %vm638_vm1, %v5173_v30 }
 0x274   : > { %v2502_v25 = vadd.f32 %v2418_v51, %v2173_v59  ;;  %v2059_v40 = vpop.f32.mrf.mxu1  ;;  %v1906_v59 = vld [vmem:[#allocation2 + $0xe8] sm:$0xff] }
 0x275   : > { %v5194_v51 = vld [vmem:[#allocation2 + $0xc1] sm:$0xff]  ;;  %v2182_v4 = vadd.f32 %v2181_v10, %v2059_v40 }
 0x276   : > { %v5177_v20 = vadd.f32 %v2502_v25, %v1852_v36 }
 0x277   : > { %4136 = vmatmul.msk.f32.gmra.mxu1 %vm638_vm1, %v1905_v3  ;;  %4171 = vmatmul.msk.f32.gmra.mxu2 %vm638_vm1, %v1905_v3 }
 0x278   : > { %5864 = vst [vmem:[#allocation14_spill] sm:$0xff] %v5177_v20  ;;  %4201 = vmatmul.msk.f32.gmra.mxu3 %vm638_vm1, %v1905_v3 }
 0x27a   : > { %v2187_v26 = vpop.f32.mrf.mxu2 }
 0x27b   : > { %v2421_v1 = vpop.f32.mrf.mxu3  ;;  %4233 = vmatmul.msk.f32.gmra.mxu0 %vm638_vm1, %v5184_v16 }
 0x27c   : > { %v2503_v33 = vadd.f32 %v2421_v1, %v2176_v49  ;;  %v2062_v37 = vpop.f32.mrf.mxu1  ;;  %v1907_v49 = vld [vmem:[#allocation2 + $0xf0] sm:$0xff] }
 0x27d   : > { %v2185_v10 = vadd.f32 %v2184_v60, %v2062_v37  ;;  %v696_v60 = vadd.s32 96, %v5082_v13 }
 0x27e   : > { %v5189_v5 = vadd.f32 %v2503_v33, %v4809_v31  ;;  %v1854_v31 = vsel %vm1758_vm7, %v4821_v42, 0.0  ;;  %v5205_v33 = vld [vmem:[#allocation2 + $0xc9] sm:$0xff] }
 0x27f   : > { %4137 = vmatmul.msk.f32.gmra.mxu1 %vm638_vm1, %v1906_v59  ;;  %4172 = vmatmul.msk.f32.gmra.mxu2 %vm638_vm1, %v1906_v59 }
 0x280   : > { %5865 = vst [vmem:[#allocation15_spill] sm:$0xff] %v5189_v5  ;;  %4202 = vmatmul.msk.f32.gmra.mxu3 %vm638_vm1, %v1906_v59  ;;  %v5243_v5 = vld [vmem:[#allocation2 + $0xe1] sm:$0xff] }
 0x282   : > { %v2190_v11 = vpop.f32.mrf.mxu2 }
 0x283   : > { %v2424_v25 = vpop.f32.mrf.mxu3  ;;  %4234 = vmatmul.msk.f32.gmra.mxu0 %vm638_vm1, %v5194_v51 }
 0x284   : > { %v2504_v36 = vadd.f32 %v2424_v25, %v2179_v41  ;;  %v2065_v3 = vpop.f32.mrf.mxu1  ;;  %v5209_v41 = vpop.f32.mrf.mxu0  ;;  %v790_v25 = vand.u32 15, %v694_v58 }
 0x285   : > { %v2188_v37 = vadd.f32 %v2187_v26, %v2065_v3 }
 0x286   : > { %v5199_v22 = vadd.f32 %v2504_v36, %v1854_v31  ;;  %v1908_v31 = vld [vmem:[#allocation2 + $0xf8] sm:$0xff]  ;;  %vm1760_vm8 = vcmp.gt.s32.totalorder %v790_v25, 0 }
 0x287   : > { %4138 = vmatmul.msk.f32.gmra.mxu1 %vm638_vm1, %v1907_v49  ;;  %4173 = vmatmul.msk.f32.gmra.mxu2 %vm638_vm1, %v1907_v49 }
 0x288   : > { %5866 = vst [vmem:[#allocation16_spill] sm:$0xff] %v5199_v22  ;;  %4203 = vmatmul.msk.f32.gmra.mxu3 %vm638_vm1, %v1907_v49  ;;  %v5217_v49 = vld [vmem:[#allocation2 + $0xd1] sm:$0xff] }
 0x28a   : > { %v2193_v1 = vpop.f32.mrf.mxu2 }
 0x28b   : > { %v2427_v23 = vpop.f32.mrf.mxu3  ;;  %4235 = vmatmul.msk.f32.gmra.mxu0 %vm638_vm1, %v5205_v33 }
 0x28c   : > { %v2505_v42 = vadd.f32 %v2427_v23, %v2182_v4  ;;  %v2068_v59 = vpop.f32.mrf.mxu1  ;;  %v5224_v22 = vpop.f32.mrf.mxu0 }
 0x28d   : > { %v2191_v3 = vadd.f32 %v2190_v11, %v2068_v59  ;;  %v698_v11 = vadd.s32 112, %v5082_v13 }
 0x28e   : > { %v5212_v36 = vadd.f32 %v2505_v42, %v4833_v52  ;;  %v1856_v52 = vsel %vm1760_vm8, %v4853_v0, 0.0 }
 0x28f   : > { %4139 = vmatmul.msk.f32.gmra.mxu1 %vm638_vm1, %v1908_v31  ;;  %4174 = vmatmul.msk.f32.gmra.mxu2 %vm638_vm1, %v1908_v31  ;;  %v818_v20 = vand.u32 15, %v698_v11 }
 0x290   : > { %5867 = vst [vmem:[#allocation17_spill] sm:$0xff] %v5212_v36  ;;  %4204 = vmatmul.msk.f32.gmra.mxu3 %vm638_vm1, %v1908_v31  ;;  %v1909_v36 = vld [vmem:[#allocation2 + $0x100] sm:$0xff] }
 0x291   : > { %v5230_v31 = vld [vmem:[#allocation2 + $0xd9] sm:$0xff]  ;;  %vm1764_vm10 = vcmp.gt.s32.totalorder %v818_v20, 0  ;;  %v700_v20 = vadd.s32 128, %v5082_v13 }
 0x292   : > { %v2196_v40 = vpop.f32.mrf.mxu2 }
 0x293   : > { %v2430_v4 = vpop.f32.mrf.mxu3  ;;  %4236 = vmatmul.msk.f32.gmra.mxu0 %vm638_vm1, %v5217_v49 }
 0x294   : > { %v2506_v58 = vadd.f32 %v2430_v4, %v2185_v10  ;;  %v2071_v23 = vpop.f32.mrf.mxu1  ;;  %v5241_v26 = vpop.f32.mrf.mxu0 }
 0x295   : > { %v2194_v59 = vadd.f32 %v2193_v1, %v2071_v23 }
 0x296   : > { %v5222_v42 = vadd.f32 %v2506_v58, %v1856_v52  ;;  %v804_v58 = vand.u32 15, %v696_v60 }
 0x297   : > { %4140 = vmatmul.msk.f32.gmra.mxu1 %vm638_vm1, %v1909_v36  ;;  %4175 = vmatmul.msk.f32.gmra.mxu2 %vm638_vm1, %v1909_v36 }
 0x298   : > { %5868 = vst [vmem:[#allocation18_spill] sm:$0xff] %v5222_v42  ;;  %4205 = vmatmul.msk.f32.gmra.mxu3 %vm638_vm1, %v1909_v36  ;;  %v1912_v42 = vld [vmem:[#allocation2 + $0x108] sm:$0xff]  ;;  %vm1762_vm9 = vcmp.gt.s32.totalorder %v804_v58, 0 }
 0x299   : > { %v5255_v58 = vld [vmem:[#allocation2 + $0xe9] sm:$0xff] }
 0x29a   : > { %v2199_v25 = vpop.f32.mrf.mxu2  ;;  %5871 = vst [vmem:[#allocation21_spill] sm:$0xff] %v5255_v58 }
 0x29b   : > { %v2433_v10 = vpop.f32.mrf.mxu3  ;;  %4237 = vmatmul.msk.f32.gmra.mxu0 %vm638_vm1, %v5230_v31 }
 0x29c   : > { %v2507_v0 = vadd.f32 %v2433_v10, %v2188_v37  ;;  %v2074_v4 = vpop.f32.mrf.mxu1  ;;  %v1858_v10 = vsel %vm1762_vm9, %v4875_v6, 0.0 }
 0x29d   : > { %v2197_v1 = vadd.f32 %v2196_v40, %v2074_v4 }
 0x29e   : > { %v5235_v52 = vadd.f32 %v2507_v0, %v4864_v12 }
 0x29f   : > { %4141 = vmatmul.msk.f32.gmra.mxu1 %vm638_vm1, %v1912_v42  ;;  %4280 = vmatmul.msk.f32.vlgmr.msra.gmra.mxu2 %vm638_vm1, %v4968_v47 }
 0x2a0   : > { %5869 = vst [vmem:[#allocation19_spill] sm:$0xff] %v5235_v52  ;;  %4206 = vmatmul.msk.f32.gmra.mxu3 %vm638_vm1, %v1912_v42  ;;  %v1913_v52 = vld [vmem:[#allocation2 + $0x110] sm:$0xff] }
 0x2a2   : > { %v2202_v36 = vpop.f32.mrf.mxu2 }
 0x2a3   : > { %v2436_v37 = vpop.f32.mrf.mxu3  ;;  %4238 = vmatmul.msk.f32.gmra.mxu0 %vm638_vm1, %v5243_v5 }
 0x2a4   : > { %v2508_v12 = vadd.f32 %v2436_v37, %v2191_v3  ;;  %v2077_v60 = vpop.f32.mrf.mxu1  ;;  %v5257_v3 = vpop.f32.mrf.mxu0 }
 0x2a5   : > { %v2200_v40 = vadd.f32 %v2199_v25, %v2077_v60 }
 0x2a6   : > { %v5248_v0 = vadd.f32 %v2508_v12, %v1858_v10  ;;  %v2560_v10 = vld [vmem:[#allocation2 + $0x9] sm:$0xff] }
 0x2a7   : > { %4142 = vmatmul.msk.f32.gmra.mxu1 %vm638_vm1, %v1913_v52  ;;  %4281 = vmatmul.msk.f32.gmra.mxu2 %vm638_vm1, %v4979_v54 }
 0x2a8   : > { %5870 = vst [vmem:[#allocation20_spill] sm:$0xff] %v5248_v0  ;;  %4207 = vmatmul.msk.f32.gmra.mxu3 %vm638_vm1, %v1913_v52  ;;  %v2280_v0 = vld [vmem:[#allocation2 + $0x118] sm:$0xff] }
 0x2a9   : > { %v5268_v52 = vld [vmem:[#allocation2 + $0xf1] sm:$0xff] }
 0x2aa   : > { %v2205_v42 = vpop.f32.mrf.mxu2 }
 0x2ab   : > { %v2439_v37 = vpop.f32.mrf.mxu3  ;;  %4239 = vmatmul.msk.f32.gmra.mxu0 %vm638_vm1, %v5255_v58  ;;  %v2561_v58 = vld [vmem:[#allocation2 + $0x11] sm:$0xff] }
 0x2ac   : > { %v2509_v6 = vadd.f32 %v2439_v37, %v2194_v59  ;;  %v2080_v12 = vpop.f32.mrf.mxu1 }
 0x2ad   : > { %v2203_v25 = vadd.f32 %v2202_v36, %v2080_v12  ;;  %v702_v36 = vadd.s32 144, %v5082_v13 }
 0x2ae   : > { %v5262_v18 = vadd.f32 %v2509_v6, %v4888_v43  ;;  %v1860_v43 = vsel %vm1764_vm10, %v4901_v50, 0.0  ;;  %v5273_v6 = vpop.f32.mrf.mxu0 }
 0x2af   : > { %4246 = vmatmul.msk.f32.vlgmr.msra.gmra.mxu1 %vm638_vm1, %v2560_v10  ;;  %4282 = vmatmul.msk.f32.gmra.mxu2 %vm638_vm1, %v4990_v63  ;;  %v2281_v10 = vld [vmem:[#allocation2 + $0x120] sm:$0xff] }
 0x2b0   : > { %5872 = vst [vmem:[#allocation22_spill] sm:$0xff] %v5262_v18  ;;  %4208 = vmatmul.msk.f32.gmra.mxu3 %vm638_vm1, %v2280_v0  ;;  %v5282_v0 = vld [vmem:[#allocation2 + $0xf9] sm:$0xff] }
 0x2b2   : > { %v2208_v23 = vpop.f32.mrf.mxu2 }
 0x2b3   : > { %v2442_v59 = vpop.f32.mrf.mxu3  ;;  %4240 = vmatmul.msk.f32.gmra.mxu0 %vm638_vm1, %v5268_v52 }
 0x2b4   : > { %v2510_v11 = vadd.f32 %v2442_v59, %v2197_v1  ;;  %v2083_v37 = vpop.f32.mrf.mxu1 }
 0x2b5   : > { %v2206_v12 = vadd.f32 %v2205_v42, %v2083_v37 }
 0x2b6   : > { %v5275_v18 = vadd.f32 %v2510_v11, %v1860_v43  ;;  %v832_v11 = vand.u32 15, %v700_v20  ;;  %v5289_v43 = vpop.f32.mrf.mxu0 }
 0x2b7   : > { %4247 = vmatmul.msk.f32.gmra.mxu1 %vm638_vm1, %v2561_v58  ;;  %4283 = vmatmul.msk.f32.gmra.mxu2 %vm638_vm1, %v5001_v14 }
 0x2b8   : > { %5873 = vst [vmem:[#allocation23_spill] sm:$0xff] %v5275_v18  ;;  %4209 = vmatmul.msk.f32.gmra.mxu3 %vm638_vm1, %v2281_v10  ;;  %vm1766_vm11 = vcmp.gt.s32.totalorder %v832_v11, 0  ;;  %v5295_v10 = vld [vmem:[#allocation2 + $0x101] sm:$0xff]  ;;  %v5309_v11 = vld [vmem:[#allocation2 + $0x109] sm:$0xff] }
 0x2ba   : > { %v2211_v4 = vpop.f32.mrf.mxu2 }
 0x2bb   : > { %v2445_v50 = vpop.f32.mrf.mxu3  ;;  %4241 = vmatmul.msk.f32.gmra.mxu0 %vm638_vm1, %v5282_v0 }
 0x2bc   : > { %v2511_v1 = vadd.f32 %v2445_v50, %v2200_v40  ;;  %v2086_v59 = vpop.f32.mrf.mxu1  ;;  %v1862_v40 = vsel %vm1766_vm11, %v4923_v7, 0.0 }
 0x2bd   : > { %v2209_v42 = vadd.f32 %v2208_v23, %v2086_v59 }
 0x2be   : > { %v5287_v58 = vadd.f32 %v2511_v1, %v4913_v57 }
 0x2bf   : > { %4248 = vmatmul.msk.f32.gmra.mxu1 %vm638_vm1, %v4948_v27  ;;  %4284 = vmatmul.msk.f32.gmra.mxu2 %vm638_vm1, %v5012_v32  ;;  %v5306_v27 = vpop.f32.mrf.mxu0 }
 0x2c0   : > { %5874 = vst [vmem:[#allocation24_spill] sm:$0xff] %v5287_v58 }
 0x2c2   : > { %v2214_v60 = vpop.f32.mrf.mxu2 }
 0x2c3   : > { %v2448_v18 = vpop.f32.mrf.mxu3  ;;  %4242 = vmatmul.msk.f32.gmra.mxu0 %vm638_vm1, %v5295_v10 }
 0x2c4   : > { %v2512_v20 = vadd.f32 %v2448_v18, %v2203_v25  ;;  %v2089_v57 = vpop.f32.mrf.mxu1 }
 0x2c5   : > { %v2212_v23 = vadd.f32 %v2211_v4, %v2089_v57 }
 0x2c6   : > { %v5300_v50 = vadd.f32 %v2512_v20, %v1862_v40  ;;  %v846_v20 = vand.u32 15, %v702_v36  ;;  %v5320_v40 = vld [vmem:[#allocation2 + $0x111] sm:$0xff] }
 0x2c7   : > { %4249 = vmatmul.msk.f32.gmra.mxu1 %vm638_vm1, %v4959_v34  ;;  %4285 = vmatmul.msk.f32.gmra.mxu2 %vm638_vm1, %v5021_v44  ;;  %5877 = vst [vmem:[#allocation27_spill] sm:$0xff] %v5320_v40 }
 0x2c8   : > { %5875 = vst [vmem:[#allocation25_spill] sm:$0xff] %v5300_v50  ;;  %vm1768_vm12 = vcmp.gt.s32.totalorder %v846_v20, 0  ;;  %v5322_v50 = vpop.f32.mrf.mxu0 }
 0x2ca   : > { %v2217_v1 = vpop.f32.mrf.mxu2 }
 0x2cb   : > { %v2451_v18 = vpop.f32.mrf.mxu3  ;;  %4243 = vmatmul.msk.f32.gmra.mxu0 %vm638_vm1, %v5309_v11 }
 0x2cc   : > { %v2513_v7 = vadd.f32 %v2451_v18, %v2206_v12  ;;  %v2092_v25 = vpop.f32.mrf.mxu1  ;;  %v1864_v12 = vsel %vm1768_vm12, %v4941_v17, 0.0 }
 0x2cd   : > { %v2215_v17 = vadd.f32 %v2214_v60, %v2092_v25 }
 0x2ce   : > { %v5314_v34 = vadd.f32 %v2513_v7, %v4932_v9 }
 0x2cf   : > { %4250 = vmatmul.msk.f32.gmra.mxu1 %vm638_vm1, %v4968_v47  ;;  %4286 = vmatmul.msk.f32.gmra.mxu2 %vm638_vm1, %v5032_v46  ;;  %v704_v47 = vadd.s32 160, %v5082_v13 }
 0x2d0   : > { %5876 = vst [vmem:[#allocation26_spill] sm:$0xff] %v5314_v34 }
 0x2d2   : > { %v2220_v37 = vpop.f32.mrf.mxu2 }
 0x2d3   : > { %v2454_v58 = vpop.f32.mrf.mxu3  ;;  %4244 = vmatmul.msk.f32.gmra.mxu0 %vm638_vm1, %v5320_v40  ;;  %v860_v40 = vand.u32 15, %v704_v47 }
 0x2d4   : > { %v2514_v36 = vadd.f32 %v2454_v58, %v2209_v42  ;;  %v2095_v9 = vpop.f32.mrf.mxu1 }
 0x2d5   : > { %vm1770_vm13 = vcmp.gt.s32.totalorder %v860_v40, 0 }
 0x2d6   : > { %v5327_v18 = vadd.f32 %v2514_v36, %v1864_v12  ;;  %v1866_v57 = vsel %vm1770_vm13, %v4963_v39, 0.0 }
 0x2d7   : > { %4251 = vmatmul.msk.f32.gmra.mxu1 %vm638_vm1, %v4979_v54  ;;  %4287 = vmatmul.msk.f32.gmra.mxu2 %vm638_vm1, %v5047_v21 }
 0x2da   : > { %v2223_v59 = vpop.f32.mrf.mxu2 }
 0x2db   : > { %v2457_v7 = vpop.f32.mrf.mxu3 }
 0x2dc   : > { %v2515_v20 = vadd.f32 %v2457_v7, %v2212_v23  ;;  %v2098_v34 = vpop.f32.mrf.mxu1 }
 0x2dd   : > { %v2221_v39 = vadd.f32 %v2220_v37, %v2098_v34 }
 0x2de   : > { %v5335_v58 = vadd.f32 %v2515_v20, %v4952_v28  ;;  %v706_v28 = vadd.s32 176, %v5082_v13 }
 0x2df   : > { %4252 = vmatmul.msk.f32.gmra.mxu1 %vm638_vm1, %v4990_v63  ;;  %4288 = vmatmul.msk.f32.gmra.mxu2 %vm638_vm1, %v5058_v45  ;;  %v2218_v63 = vadd.f32 %v2217_v1, %v2095_v9  ;;  %v5878_v9 = vld [vmem:[#allocation3_spill] sm:$0xff] }
 0x2e0   : > { %v874_v23 = vand.u32 15, %v706_v28 }
 0x2e2   : > { %v2226_v54 = vpop.f32.mrf.mxu2  ;;  %vm1772_vm14 = vcmp.gt.s32.totalorder %v874_v23, 0 }
 0x2e3   : > { %v2460_v42 = vpop.f32.mrf.mxu3 }
 0x2e4   : > { %v2516_v36 = vadd.f32 %v2460_v42, %v2215_v17  ;;  %v2101_v4 = vpop.f32.mrf.mxu1  ;;  %v1868_v42 = vsel %vm1772_vm14, %v5878_v9, 0.0 }
 0x2e6   : > { %v5342_v12 = vadd.f32 %v2516_v36, %v1866_v57 }
 0x2e7   : > { %4253 = vmatmul.msk.f32.gmra.mxu1 %vm638_vm1, %v5001_v14  ;;  %4289 = vmatmul.msk.f32.gmra.mxu2 %vm638_vm1, %v5067_v29 }
 0x2ea   : > { %v2229_v47 = vpop.f32.mrf.mxu2 }
 0x2eb   : > { %v2463_v40 = vpop.f32.mrf.mxu3 }
 0x2ec   : > { %v2517_v60 = vadd.f32 %v2463_v40, %v2218_v63  ;;  %v2104_v25 = vpop.f32.mrf.mxu1  ;;  %v5879_v40 = vld [vmem:[#allocation4_spill] sm:$0xff] }
 0x2ee   : > { %v5350_v7 = vadd.f32 %v2517_v60, %v4974_v48  ;;  %v708_v48 = vadd.s32 192, %v5082_v13 }
 0x2ef   : > { %4254 = vmatmul.msk.f32.gmra.mxu1 %vm638_vm1, %v5012_v32  ;;  %4290 = vmatmul.msk.f32.gmra.mxu2 %vm638_vm1, %v5078_v61  ;;  %v2224_v32 = vadd.f32 %v2223_v59, %v2101_v4  ;;  %v5880_v4 = vld [vmem:[#allocation5_spill] sm:$0xff] }
 0x2f0   : > { %v888_v63 = vand.u32 15, %v708_v48 }
 0x2f2   : > { %v2232_v14 = vpop.f32.mrf.mxu2  ;;  %vm1774_vm15 = vcmp.gt.s32.totalorder %v888_v63, 0 }
 0x2f3   : > { %v2466_v20 = vpop.f32.mrf.mxu3 }
 0x2f4   : > { %v2518_v17 = vadd.f32 %v2466_v20, %v2221_v39  ;;  %v2107_v1 = vpop.f32.mrf.mxu1 }
 0x2f6   : > { %v5357_v36 = vadd.f32 %v2518_v17, %v1868_v42  ;;  %v1870_v17 = vsel %vm1774_vm15, %v5880_v4, 0.0  ;;  %v2230_v42 = vadd.f32 %v2229_v47, %v2107_v1  ;;  %v5882_v1 = vld [vmem:[#allocation7_spill] sm:$0xff] }
 0x2f7   : > { %4255 = vmatmul.msk.f32.gmra.mxu1 %vm638_vm1, %v5021_v44  ;;  %4291 = vmatmul.msk.f32.gmra.mxu2 %vm638_vm1, %v5094_v24  ;;  %v2227_v44 = vadd.f32 %v2226_v54, %v2104_v25 }
 0x2fa   : > { %v2235_v57 = vpop.f32.mrf.mxu2 }
 0x2fb   : > { %v2469_v28 = vpop.f32.mrf.mxu3 }
 0x2fc   : > { %v2519_v34 = vadd.f32 %v2469_v28, %v2224_v32  ;;  %v2110_v37 = vpop.f32.mrf.mxu1 }
 0x2fe   : > { %v5365_v60 = vadd.f32 %v2519_v34, %v5879_v40  ;;  %v5881_v34 = vld [vmem:[#allocation6_spill] sm:$0xff] }
 0x2ff   : > { %4256 = vmatmul.msk.f32.gmra.mxu1 %vm638_vm1, %v5032_v46  ;;  %4292 = vmatmul.msk.f32.gmra.mxu2 %vm638_vm1, %v5108_v62  ;;  %v710_v46 = vadd.s32 208, %v5082_v13 }
 0x301   : > { %v902_v28 = vand.u32 15, %v710_v46 }
 0x302   : > { %v2238_v23 = vpop.f32.mrf.mxu2 }
 0x303   : > { %v2472_v39 = vpop.f32.mrf.mxu3  ;;  %vm1776_vm2 = vcmp.gt.s32.totalorder %v902_v28, 0 }
 0x304   : > { %v2520_v20 = vadd.f32 %v2472_v39, %v2227_v44  ;;  %v2113_v59 = vpop.f32.mrf.mxu1 }
 0x306   : > { %v5372_v9 = vadd.f32 %v2520_v20, %v1870_v17  ;;  %v1872_v20 = vsel %vm1776_vm2, %v5882_v1, 0.0  ;;  %v2236_v17 = vadd.f32 %v2235_v57, %v2113_v59  ;;  %v5884_v59 = vld [vmem:[#allocation9_spill] sm:$0xff] }
 0x307   : > { %4257 = vmatmul.msk.f32.gmra.mxu1 %vm638_vm1, %v5047_v21  ;;  %4293 = vmatmul.msk.f32.gmra.mxu2 %vm638_vm1, %v5121_v35  ;;  %v2233_v21 = vadd.f32 %v2232_v14, %v2110_v37 }
 0x30a   : > { %v2241_v48 = vpop.f32.mrf.mxu2 }
 0x30b   : > { %v2475_v32 = vpop.f32.mrf.mxu3 }
 0x30c   : > { %v2521_v54 = vadd.f32 %v2475_v32, %v2230_v42  ;;  %v2116_v25 = vpop.f32.mrf.mxu1 }
 0x30e   : > { %v5380_v63 = vadd.f32 %v2521_v54, %v5881_v34  ;;  %v5883_v54 = vld [vmem:[#allocation8_spill] sm:$0xff] }
 0x30f   : > { %4258 = vmatmul.msk.f32.gmra.mxu1 %vm638_vm1, %v5058_v45  ;;  %4294 = vmatmul.msk.f32.gmra.mxu2 %vm638_vm1, %v5136_v56  ;;  %v712_v45 = vadd.s32 224, %v5082_v13 }
 0x311   : > { %v916_v32 = vand.u32 15, %v712_v45 }
 0x312   : > { %v2244_v40 = vpop.f32.mrf.mxu2 }
 0x313   : > { %v2478_v44 = vpop.f32.mrf.mxu3  ;;  %vm1778_vm3 = vcmp.gt.s32.totalorder %v916_v32, 0  ;;  %v5885_v32 = vld [vmem:[#allocation10_spill] sm:$0xff] }
 0x314   : > { %v2522_v39 = vadd.f32 %v2478_v44, %v2233_v21  ;;  %v2119_v47 = vpop.f32.mrf.mxu1 }
 0x316   : > { %v5387_v4 = vadd.f32 %v2522_v39, %v1872_v20  ;;  %v1874_v39 = vsel %vm1778_vm3, %v5884_v59, 0.0  ;;  %v2242_v20 = vadd.f32 %v2241_v48, %v2119_v47  ;;  %v5427_v48 = vld [vmem:[%s5848_s4 + $0x3] ss:$0 sm:$0xff] }
 0x317   : > { %4259 = vmatmul.msk.f32.gmra.mxu1 %vm638_vm1, %v5067_v29  ;;  %4295 = vmatmul.msk.f32.gmra.mxu2 %vm638_vm1, %v5148_v38  ;;  %v2239_v29 = vadd.f32 %v2238_v23, %v2116_v25 }
 0x31a   : > { %v2247_v46 = vpop.f32.mrf.mxu2 }
 0x31b   : > { %v2481_v42 = vpop.f32.mrf.mxu3 }
 0x31c   : > { %v2523_v14 = vadd.f32 %v2481_v42, %v2236_v17  ;;  %v2122_v37 = vpop.f32.mrf.mxu1 }
 0x31d   : > { %v2245_v47 = vadd.f32 %v2244_v40, %v2122_v37 }
 0x31e   : > { %v5395_v28 = vadd.f32 %v2523_v14, %v5883_v54 }
 0x31f   : > { %4260 = vmatmul.msk.f32.gmra.mxu1 %vm638_vm1, %v5078_v61  ;;  %4296 = vmatmul.msk.f32.gmra.mxu2 %vm638_vm1, %v5161_v15  ;;  %v714_v61 = vadd.s32 240, %v5082_v13 }
 0x321   : > { %v930_v14 = vand.u32 15, %v714_v61 }
 0x322   : > { %v3082_v34 = vpop.f32.mrf.mxu2 }
 0x323   : > { %v2484_v21 = vpop.f32.mrf.mxu3  ;;  %vm1780_vm4 = vcmp.gt.s32.totalorder %v930_v14, 0 }
 0x324   : > { %v2524_v44 = vadd.f32 %v2484_v21, %v2239_v29  ;;  %v2125_v57 = vpop.f32.mrf.mxu1  ;;  %v685_v29 = vadd.s32 8, %v5082_v13 }
 0x325   : > { %v2248_v37 = vadd.f32 %v2247_v46, %v2125_v57 }
 0x326   : > { %v5402_v1 = vadd.f32 %v2524_v44, %v1874_v39  ;;  %v727_v44 = vand.u32 15, %v685_v29 }
 0x327   : > { %4261 = vmatmul.msk.f32.gmra.mxu1 %vm638_vm1, %v5094_v24  ;;  %4297 = vmatmul.msk.f32.gmra.mxu2 %vm638_vm1, %v5173_v30  ;;  %v5417_v24 = vld [vmem:[%s5848_s4 + $0x2] ss:$0 sm:$0xff] }
 0x328   : > { %vm3211_vm5 = vcmp.lt.s32.totalorder %v727_v44, 15  ;;  %v5442_v44 = vpop.f32.mrf.mxu0 }
 0x32a   : > { %v3085_v45 = vpop.f32.mrf.mxu2 }
 0x32b   : > { %v2487_v17 = vpop.f32.mrf.mxu3 }
 0x32c   : > { %v2525_v23 = vadd.f32 %v2487_v17, %v2242_v20  ;;  %v2836_v25 = vpop.f32.mrf.mxu1 }
 0x32d   : > { %v2837_v42 = vadd.f32 %v2836_v25, %v5209_v41 }
 0x32e   : > { %v5411_v54 = vadd.f32 %v2525_v23, %v5885_v32 }
 0x32f   : > { %v3178_v21 = vadd.f32 %v3082_v34, %v2837_v42  ;;  %4262 = vmatmul.msk.f32.gmra.mxu1 %vm638_vm1, %v5108_v62  ;;  %4298 = vmatmul.msk.f32.gmra.mxu2 %vm638_vm1, %v5184_v16  ;;  %v5886_v62 = vld [vmem:[#allocation11_spill] sm:$0xff] }
 0x330   : > { %v1876_v17 = vsel %vm1780_vm4, %v5886_v62, 0.0 }
 0x331   : > { %v3338_v41 = vadd.f32 %v3178_v21, %v5098_v2 }
 0x332   : > { %v3088_v34 = vpop.f32.mrf.mxu2 }
 0x333   : > { %v3371_v59 = vmul.f32 %v5417_v24, %v3338_v41  ;;  %v2490_v39 = vpop.f32.mrf.mxu3 }
 0x334   : > { %v2526_v61 = vadd.f32 %v2490_v39, %v2245_v47  ;;  %v2839_v20 = vpop.f32.mrf.mxu1 }
 0x335   : > { %v3404_v23 = vadd.f32 %v5427_v48, %v3371_v59  ;;  %v2840_v2 = vadd.f32 %v2839_v20, %v5224_v22 }
 0x336   : > { %v5433_v25 = vadd.f32 %v2526_v61, %v1876_v17  ;;  %v687_v61 = vadd.s32 24, %v5082_v13 }
 0x337   : > { %v3436_v42 = vmax.f32 %v3404_v23, 0.0  ;;  %v3179_v32 = vadd.f32 %v3085_v45, %v2840_v2  ;;  %4263 = vmatmul.msk.f32.gmra.mxu1 %vm638_vm1, %v5121_v35  ;;  %4299 = vmatmul.msk.f32.gmra.mxu2 %vm638_vm1, %v5194_v51  ;;  %v5887_v35 = vld [vmem:[#allocation12_spill] sm:$0xff]  ;;  %v5459_v2 = vpop.f32.mrf.mxu0 }
 0x339   : > { %v3307_v40 = vsel %vm3211_vm5, %v3179_v32, 0.0  ;;  %4313 = vmatmul.msk.f32.vlgmr.msra.gmra.mxu3 %vm638_vm1, %v3436_v42 }
 0x33a   : > { %v3339_v14 = vadd.f32 %v3307_v40, %v5112_v19  ;;  %v3091_v29 = vpop.f32.mrf.mxu2 }
 0x33b   : > { %v2493_v21 = vpop.f32.mrf.mxu3 }
 0x33c   : > { %v3372_v22 = vmul.f32 %v5417_v24, %v3339_v14  ;;  %v2527_v41 = vadd.f32 %v2493_v21, %v2248_v37  ;;  %v2842_v47 = vpop.f32.mrf.mxu1  ;;  %v689_v21 = vadd.s32 40, %v5082_v13 }
 0x33d   : > { %v2843_v45 = vadd.f32 %v2842_v47, %v5241_v26  ;;  %v741_v26 = vand.u32 15, %v687_v61 }
 0x33e   : > { %v5446_v59 = vadd.f32 %v2527_v41, %v5887_v35  ;;  %v3405_v39 = vadd.f32 %v5427_v48, %v3372_v22 }
 0x33f   : > { %v3180_v46 = vadd.f32 %v3088_v34, %v2843_v45  ;;  %4264 = vmatmul.msk.f32.gmra.mxu1 %vm638_vm1, %v5136_v56  ;;  %4300 = vmatmul.msk.f32.gmra.mxu2 %vm638_vm1, %v5205_v33  ;;  %vm3213_vm6 = vcmp.lt.s32.totalorder %v741_v26, 15  ;;  %v5475_v22 = vpop.f32.mrf.mxu0 }
 0x340   : > { %v3437_v19 = vmax.f32 %v3405_v39, 0.0 }
 0x341   : > { %v3340_v57 = vadd.f32 %v3180_v46, %v5125_v55 }
 0x342   : > { %v3094_v20 = vpop.f32.mrf.mxu2  ;;  %4314 = vmatmul.msk.f32.gmra.mxu3 %vm638_vm1, %v3437_v19  ;;  %v5888_v19 = vld [vmem:[#allocation13_spill] sm:$0xff] }
 0x343   : > { %v3373_v62 = vmul.f32 %v5417_v24, %v3340_v57 }
 0x344   : > { %v2845_v17 = vpop.f32.mrf.mxu1 }
 0x345   : > { %v2846_v23 = vadd.f32 %v2845_v17, %v5257_v3  ;;  %v3406_v34 = vadd.f32 %v5427_v48, %v3373_v62 }
 0x347   : > { %v3181_v56 = vadd.f32 %v3091_v29, %v2846_v23  ;;  %4265 = vmatmul.msk.f32.gmra.mxu1 %vm638_vm1, %v5148_v38  ;;  %4301 = vmatmul.msk.f32.gmra.mxu2 %vm638_vm1, %v5217_v49  ;;  %v3438_v55 = vmax.f32 %v3406_v34, 0.0  ;;  %v5488_v26 = vpop.f32.mrf.mxu0 }
 0x349   : > { %v3309_v42 = vsel %vm3213_vm6, %v3181_v56, 0.0  ;;  %v5889_v56 = vld [vmem:[#allocation21_spill] sm:$0xff] }
 0x34a   : > { %v3341_v32 = vadd.f32 %v3309_v42, %v5140_v8  ;;  %v3097_v40 = vpop.f32.mrf.mxu2  ;;  %4315 = vmatmul.msk.f32.gmra.mxu3 %vm638_vm1, %v3438_v55  ;;  %v5890_v42 = vld [vmem:[#allocation14_spill] sm:$0xff] }
 0x34c   : > { %v3374_v3 = vmul.f32 %v5417_v24, %v3341_v32  ;;  %v2848_v37 = vpop.f32.mrf.mxu1 }
 0x34d   : > { %v2849_v14 = vadd.f32 %v2848_v37, %v5273_v6  ;;  %v755_v6 = vand.u32 15, %v689_v21 }
 0x34e   : > { %v3407_v29 = vadd.f32 %v5427_v48, %v3374_v3 }
 0x34f   : > { %v3182_v38 = vadd.f32 %v3094_v20, %v2849_v14  ;;  %4266 = vmatmul.msk.f32.gmra.mxu1 %vm638_vm1, %v5161_v15  ;;  %4302 = vmatmul.msk.f32.gmra.mxu2 %vm638_vm1, %v5230_v31  ;;  %vm3215_vm7 = vcmp.lt.s32.totalorder %v755_v6, 15  ;;  %v5501_v14 = vpop.f32.mrf.mxu0 }
 0x350   : > { %v3439_v8 = vmax.f32 %v3407_v29, 0.0 }
 0x351   : > { %v3342_v41 = vadd.f32 %v3182_v38, %v5152_v53 }
 0x352   : > { %v3100_v47 = vpop.f32.mrf.mxu2  ;;  %4316 = vmatmul.msk.f32.gmra.mxu3 %vm638_vm1, %v3439_v8 }
 0x353   : > { %v3375_v45 = vmul.f32 %v5417_v24, %v3342_v41  ;;  %v5891_v41 = vld [vmem:[#allocation15_spill] sm:$0xff] }
 0x354   : > { %v2851_v35 = vpop.f32.mrf.mxu1 }
 0x355   : > { %v2852_v39 = vadd.f32 %v2851_v35, %v5289_v43  ;;  %v3408_v61 = vadd.f32 %v5427_v48, %v3375_v45 }
 0x357   : > { %v3183_v15 = vadd.f32 %v3097_v40, %v2852_v39  ;;  %4267 = vmatmul.msk.f32.gmra.mxu1 %vm638_vm1, %v5173_v30  ;;  %4303 = vmatmul.msk.f32.gmra.mxu2 %vm638_vm1, %v5243_v5  ;;  %v3440_v53 = vmax.f32 %v3408_v61, 0.0  ;;  %v691_v30 = vadd.s32 56, %v5082_v13  ;;  %v693_v61 = vadd.s32 72, %v5082_v13 }
 0x359   : > { %v3311_v46 = vsel %vm3215_vm7, %v3183_v15, 0.0  ;;  %v769_v3 = vand.u32 15, %v691_v30 }
 0x35a   : > { %v3343_v57 = vadd.f32 %v3311_v46, %v5888_v19  ;;  %v3103_v20 = vpop.f32.mrf.mxu2  ;;  %4317 = vmatmul.msk.f32.gmra.mxu3 %vm638_vm1, %v3440_v53  ;;  %v5892_v46 = vld [vmem:[#allocation16_spill] sm:$0xff] }
 0x35b   : > { %vm3217_vm8 = vcmp.lt.s32.totalorder %v769_v3, 15 }
 0x35c   : > { %v3376_v43 = vmul.f32 %v5417_v24, %v3343_v57  ;;  %v2854_v62 = vpop.f32.mrf.mxu1 }
 0x35d   : > { %v2855_v17 = vadd.f32 %v2854_v62, %v5306_v27 }
 0x35e   : > { %v3409_v23 = vadd.f32 %v5427_v48, %v3376_v43 }
 0x35f   : > { %v3184_v34 = vadd.f32 %v3100_v47, %v2855_v17  ;;  %4268 = vmatmul.msk.f32.gmra.mxu1 %vm638_vm1, %v5184_v16  ;;  %4304 = vmatmul.msk.f32.gmra.mxu2 %vm638_vm1, %v5889_v56 }
 0x360   : > { %v3441_v55 = vmax.f32 %v3409_v23, 0.0 }
 0x361   : > { %v3344_v32 = vadd.f32 %v3184_v34, %v5890_v42 }
 0x362   : > { %v3106_v40 = vpop.f32.mrf.mxu2  ;;  %4318 = vmatmul.msk.f32.gmra.mxu3 %vm638_vm1, %v3441_v55  ;;  %v5893_v55 = vld [vmem:[#allocation17_spill] sm:$0xff] }
 0x363   : > { %v3377_v27 = vmul.f32 %v5417_v24, %v3344_v32 }
 0x364   : > { %v2857_v37 = vpop.f32.mrf.mxu1 }
 0x365   : > { %v2858_v29 = vadd.f32 %v2857_v37, %v5322_v50  ;;  %v3410_v21 = vadd.f32 %v5427_v48, %v3377_v27 }
 0x367   : > { %v3185_v16 = vadd.f32 %v3103_v20, %v2858_v29  ;;  %4269 = vmatmul.msk.f32.gmra.mxu1 %vm638_vm1, %v5194_v51  ;;  %4305 = vmatmul.msk.f32.gmra.mxu2 %vm638_vm1, %v5268_v52  ;;  %v3442_v38 = vmax.f32 %v3410_v21, 0.0  ;;  %v5515_v51 = vpop.f32.mrf.mxu0  ;;  %v5894_v21 = vld [vmem:[#allocation18_spill] sm:$0xff] }
 0x369   : > { %v3313_v8 = vsel %vm3217_vm8, %v3185_v16, 0.0 }
 0x36a   : > { %v3345_v47 = vadd.f32 %v3313_v8, %v5891_v41  ;;  %v3109_v6 = vpop.f32.mrf.mxu2  ;;  %4319 = vmatmul.msk.f32.gmra.mxu3 %vm638_vm1, %v3442_v38 }
 0x36c   : > { %v3378_v45 = vmul.f32 %v5417_v24, %v3345_v47  ;;  %v2860_v50 = vpop.f32.mrf.mxu1 }
 0x36d   : > { %v2861_v35 = vadd.f32 %v2860_v50, %v5442_v44  ;;  %v783_v44 = vand.u32 15, %v693_v61 }
 0x36e   : > { %v3411_v39 = vadd.f32 %v5427_v48, %v3378_v45 }
 0x36f   : > { %v3186_v15 = vadd.f32 %v3106_v40, %v2861_v35  ;;  %4270 = vmatmul.msk.f32.gmra.mxu1 %vm638_vm1, %v5205_v33  ;;  %4306 = vmatmul.msk.f32.gmra.mxu2 %vm638_vm1, %v5282_v0  ;;  %vm3219_vm9 = vcmp.lt.s32.totalorder %v783_v44, 15  ;;  %v5530_v30 = vpop.f32.mrf.mxu0 }
 0x370   : > { %v3443_v53 = vmax.f32 %v3411_v39, 0.0  ;;  %v5896_v39 = vld [vmem:[#allocation19_spill] sm:$0xff] }
 0x371   : > { %v3346_v19 = vadd.f32 %v3186_v15, %v5892_v46  ;;  %v2962_v46 = vld [vmem:[#allocation2 + $0x119] sm:$0xff] }
 0x372   : > { %v3112_v57 = vpop.f32.mrf.mxu2  ;;  %4320 = vmatmul.msk.f32.gmra.mxu3 %vm638_vm1, %v3443_v53 }
 0x373   : > { %v3379_v20 = vmul.f32 %v5417_v24, %v3346_v19 }
 0x374   : > { %v2863_v43 = vpop.f32.mrf.mxu1 }
 0x375   : > { %v2864_v62 = vadd.f32 %v2863_v43, %v5459_v2  ;;  %v3412_v17 = vadd.f32 %v5427_v48, %v3379_v20 }
 0x377   : > { %v3187_v23 = vadd.f32 %v3109_v6, %v2864_v62  ;;  %4271 = vmatmul.msk.f32.gmra.mxu1 %vm638_vm1, %v5217_v49  ;;  %4307 = vmatmul.msk.f32.gmra.mxu2 %vm638_vm1, %v5295_v10  ;;  %v3444_v33 = vmax.f32 %v3412_v17, 0.0  ;;  %v695_v49 = vadd.s32 88, %v5082_v13  ;;  %v2759_v41 = vpop.f32.mrf.mxu0  ;;  %v5897_v62 = vld [vmem:[#allocation20_spill] sm:$0xff] }
 0x379   : > { %v3315_v34 = vsel %vm3219_vm9, %v3187_v23, 0.0  ;;  %v797_v8 = vand.u32 15, %v695_v49 }
 0x37a   : > { %v3347_v42 = vadd.f32 %v3315_v34, %v5893_v55  ;;  %v3115_v32 = vpop.f32.mrf.mxu2  ;;  %4321 = vmatmul.msk.f32.gmra.mxu3 %vm638_vm1, %v3444_v33  ;;  %v2963_v55 = vld [vmem:[#allocation2 + $0x121] sm:$0xff] }
 0x37b   : > { %vm3221_vm10 = vcmp.lt.s32.totalorder %v797_v8, 15 }
 0x37c   : > { %v3380_v2 = vmul.f32 %v5417_v24, %v3347_v42  ;;  %v2866_v40 = vpop.f32.mrf.mxu1 }
 0x37d   : > { %v2867_v3 = vadd.f32 %v2866_v40, %v5475_v22 }
 0x37e   : > { %v3413_v27 = vadd.f32 %v5427_v48, %v3380_v2 }
 0x37f   : > { %v3188_v37 = vadd.f32 %v3112_v57, %v2867_v3  ;;  %4272 = vmatmul.msk.f32.gmra.mxu1 %vm638_vm1, %v5230_v31  ;;  %4308 = vmatmul.msk.f32.gmra.mxu2 %vm638_vm1, %v5309_v11  ;;  %v5895_v11 = vld [vmem:[#allocation27_spill] sm:$0xff]  ;;  %v2762_v19 = vpop.f32.mrf.mxu0 }
 0x380   : > { %v3445_v29 = vmax.f32 %v3413_v27, 0.0  ;;  %v5898_v27 = vld [vmem:[#allocation22_spill] sm:$0xff] }
 0x381   : > { %v3348_v16 = vadd.f32 %v3188_v37, %v5894_v21 }
 0x382   : > { %v3118_v38 = vpop.f32.mrf.mxu2  ;;  %4322 = vmatmul.msk.f32.gmra.mxu3 %vm638_vm1, %v3445_v29 }
 0x383   : > { %v3381_v22 = vmul.f32 %v5417_v24, %v3348_v16 }
 0x384   : > { %v2869_v47 = vpop.f32.mrf.mxu1 }
 0x385   : > { %v2870_v6 = vadd.f32 %v2869_v47, %v5488_v26  ;;  %v3414_v45 = vadd.f32 %v5427_v48, %v3381_v22  ;;  %v5899_v47 = vld [vmem:[#allocation23_spill] sm:$0xff] }
 0x387   : > { %v3189_v31 = vadd.f32 %v3115_v32, %v2870_v6  ;;  %4273 = vmatmul.msk.f32.gmra.mxu1 %vm638_vm1, %v5243_v5  ;;  %4309 = vmatmul.msk.f32.gmra.mxu2 %vm638_vm1, %v5895_v11  ;;  %v3446_v50 = vmax.f32 %v3414_v45, 0.0  ;;  %v697_v5 = vadd.s32 104, %v5082_v13  ;;  %v2765_v2 = vpop.f32.mrf.mxu0 }
 0x389   : > { %v3317_v35 = vsel %vm3221_vm10, %v3189_v31, 0.0  ;;  %v811_v33 = vand.u32 15, %v697_v5 }
 0x38a   : > { %v3349_v61 = vadd.f32 %v3317_v35, %v5896_v39  ;;  %v3121_v15 = vpop.f32.mrf.mxu2  ;;  %4323 = vmatmul.msk.f32.gmra.mxu3 %vm638_vm1, %v3446_v50 }
 0x38b   : > { %vm3223_vm11 = vcmp.lt.s32.totalorder %v811_v33, 15 }
 0x38c   : > { %v3382_v53 = vmul.f32 %v5417_v24, %v3349_v61  ;;  %v2872_v26 = vpop.f32.mrf.mxu1 }
 0x38d   : > { %v2873_v57 = vadd.f32 %v2872_v26, %v5501_v14 }
 0x38e   : > { %v3415_v44 = vadd.f32 %v5427_v48, %v3382_v53 }
 0x38f   : > { %v3190_v20 = vadd.f32 %v3118_v38, %v2873_v57  ;;  %4274 = vmatmul.msk.f32.gmra.mxu1 %vm638_vm1, %v5889_v56  ;;  %4310 = vmatmul.msk.f32.gmra.mxu2 %vm638_vm1, %v2962_v46  ;;  %v699_v38 = vadd.s32 120, %v5082_v13  ;;  %v2768_v22 = vpop.f32.mrf.mxu0 }
 0x390   : > { %v3447_v43 = vmax.f32 %v3415_v44, 0.0 }
 0x391   : > { %v3350_v17 = vadd.f32 %v3190_v20, %v5897_v62  ;;  %v825_v31 = vand.u32 15, %v699_v38  ;;  %v701_v20 = vadd.s32 136, %v5082_v13 }
 0x392   : > { %v3124_v23 = vpop.f32.mrf.mxu2  ;;  %4324 = vmatmul.msk.f32.gmra.mxu3 %vm638_vm1, %v3447_v43 }
 0x393   : > { %v3383_v34 = vmul.f32 %v5417_v24, %v3350_v17  ;;  %vm3225_vm12 = vcmp.lt.s32.totalorder %v825_v31, 15  ;;  %v5901_v17 = vld [vmem:[#allocation25_spill] sm:$0xff]  ;;  %v839_v33 = vand.u32 15, %v701_v20 }
 0x394   : > { %v2875_v14 = vpop.f32.mrf.mxu1 }
 0x395   : > { %v2876_v42 = vadd.f32 %v2875_v14, %v5515_v51  ;;  %v3416_v32 = vadd.f32 %v5427_v48, %v3383_v34  ;;  %vm3227_vm13 = vcmp.lt.s32.totalorder %v839_v33, 15 }
 0x397   : > { %v3191_v56 = vadd.f32 %v3121_v15, %v2876_v42  ;;  %4275 = vmatmul.msk.f32.gmra.mxu1 %vm638_vm1, %v5268_v52  ;;  %v3448_v40 = vmax.f32 %v3416_v32, 0.0  ;;  %4311 = vmatmul.msk.f32.gmra.mxu2 %vm638_vm1, %v2963_v55  ;;  %v5900_v15 = vld [vmem:[#allocation24_spill] sm:$0xff]  ;;  %v2771_v46 = vpop.f32.mrf.mxu0 }
 0x399   : > { %v3319_v3 = vsel %vm3223_vm11, %v3191_v56, 0.0 }
 0x39a   : > { %v3351_v49 = vadd.f32 %v3319_v3, %v5898_v27  ;;  %v3127_v37 = vpop.f32.mrf.mxu2  ;;  %4325 = vmatmul.msk.f32.gmra.mxu3 %vm638_vm1, %v3448_v40  ;;  %v5594_v3 = vld [vmem:[%s5848_s4 + $0x4] ss:$0 sm:$0xff]  ;;  %v5902_v27 = vld [vmem:[#allocation26_spill] sm:$0xff] }
 0x39c   : > { %v3384_v29 = vmul.f32 %v5417_v24, %v3351_v49  ;;  %v2878_v51 = vpop.f32.mrf.mxu1 }
 0x39d   : > { %v2879_v21 = vadd.f32 %v2878_v51, %v5530_v30 }
 0x39e   : > { %v3417_v16 = vadd.f32 %v5427_v48, %v3384_v29 }
 0x39f   : > { %v3192_v8 = vadd.f32 %v3124_v23, %v2879_v21  ;;  %4276 = vmatmul.msk.f32.gmra.mxu1 %vm638_vm1, %v5282_v0  ;;  %v2774_v55 = vpop.f32.mrf.mxu0 }
 0x3a0   : > { %v3449_v52 = vmax.f32 %v3417_v16, 0.0 }
 0x3a1   : > { %v3352_v6 = vadd.f32 %v3192_v8, %v5899_v47  ;;  %v4345_v8 = vld [vmem:[%s4500_s29 + $0x10] sm:$0xff]  ;;  %v703_v47 = vadd.s32 152, %v5082_v13 }
 0x3a2   : > { %v3130_v45 = vpop.f32.mrf.mxu2  ;;  %4326 = vmatmul.msk.f32.gmra.mxu3 %vm638_vm1, %v3449_v52 }
 0x3a3   : > { %v3385_v11 = vmul.f32 %v5417_v24, %v3352_v6 }
 0x3a4   : > { %v2881_v50 = vpop.f32.mrf.mxu1 }
 0x3a5   : > { %v2882_v30 = vadd.f32 %v2881_v50, %v2759_v41  ;;  %v3418_v35 = vadd.f32 %v5427_v48, %v3385_v11 }
 0x3a7   : > { %v3193_v39 = vadd.f32 %v3127_v37, %v2882_v30  ;;  %4277 = vmatmul.msk.f32.gmra.mxu1 %vm638_vm1, %v5295_v10  ;;  %v3450_v0 = vmax.f32 %v3418_v35, 0.0  ;;  %v2777_v6 = vpop.f32.mrf.mxu0  ;;  %v853_v35 = vand.u32 15, %v703_v47 }
 0x3a9   : > { %v3321_v61 = vsel %vm3225_vm12, %v3193_v39, 0.0  ;;  %vm3229_vm14 = vcmp.lt.s32.totalorder %v853_v35, 15 }
 0x3aa   : > { %v3353_v53 = vadd.f32 %v3321_v61, %v5900_v15  ;;  %v3133_v26 = vpop.f32.mrf.mxu2  ;;  %4327 = vmatmul.msk.f32.gmra.mxu3 %vm638_vm1, %v3450_v0 }
 0x3ac   : > { %v3386_v57 = vmul.f32 %v5417_v24, %v3353_v53  ;;  %v2884_v44 = vpop.f32.mrf.mxu1 }
 0x3ad   : > { %v2885_v5 = vadd.f32 %v2884_v44, %v2762_v19  ;;  %v4346_v44 = vld [vmem:[%s4500_s29 + $0x18] sm:$0xff] }
 0x3ae   : > { %v3419_v41 = vadd.f32 %v5427_v48, %v3386_v57 }
 0x3af   : > { %v3194_v43 = vadd.f32 %v3130_v45, %v2885_v5  ;;  %v2780_v20 = vpop.f32.mrf.mxu0 }
 0x3b0   : > { %v3451_v62 = vmax.f32 %v3419_v41, 0.0 }
 0x3b1   : > { %v3354_v10 = vadd.f32 %v3194_v43, %v5901_v17 }
 0x3b2   : > { %v3136_v23 = vpop.f32.mrf.mxu2  ;;  %4328 = vmatmul.msk.f32.gmra.mxu3 %vm638_vm1, %v3451_v62 }
 0x3b3   : > { %v3387_v34 = vmul.f32 %v5417_v24, %v3354_v10 }
 0x3b4   : > { %v2887_v14 = vpop.f32.mrf.mxu1 }
 0x3b5   : > { %v2888_v42 = vadd.f32 %v2887_v14, %v2765_v2  ;;  %v3420_v19 = vadd.f32 %v5427_v48, %v3387_v34  ;;  %v5601_v2 = vld [vmem:[%s5848_s4 + $0x5] ss:$0 sm:$0xff] }
 0x3b7   : > { %v3195_v32 = vadd.f32 %v3133_v26, %v2888_v42  ;;  %v3452_v56 = vmax.f32 %v3420_v19, 0.0 }
 0x3b9   : > { %v3323_v40 = vsel %vm3227_vm13, %v3195_v32, 0.0  ;;  %v705_v32 = vadd.s32 168, %v5082_v13 }
 0x3ba   : > { %v3355_v49 = vadd.f32 %v3323_v40, %v5902_v27  ;;  %v3139_v37 = vpop.f32.mrf.mxu2  ;;  %4329 = vmatmul.msk.f32.gmra.mxu3 %vm638_vm1, %v3452_v56 }
 0x3bc   : > { %v3388_v29 = vmul.f32 %v5417_v24, %v3355_v49  ;;  %v2890_v51 = vpop.f32.mrf.mxu1  ;;  %v3585_v21 = vpop.f32.mrf.mxu3 }
 0x3bd   : > { %v2891_v16 = vadd.f32 %v2890_v51, %v2768_v22  ;;  %v3682_v38 = vmul.f32 %v5594_v3, %v3585_v21  ;;  %v2783_v51 = vpop.f32.mrf.mxu0 }
 0x3be   : > { %v3421_v52 = vadd.f32 %v5427_v48, %v3388_v29  ;;  %v867_v29 = vand.u32 15, %v705_v32 }
 0x3bf   : > { %v3196_v45 = vadd.f32 %v3136_v23, %v2891_v16  ;;  %v3715_v31 = vadd.f32 %v5601_v2, %v3682_v38 }
 0x3c0   : > { %v3453_v11 = vmax.f32 %v3421_v52, 0.0  ;;  %vm3231_vm15 = vcmp.lt.s32.totalorder %v867_v29, 15 }
 0x3c1   : > { %v3356_v50 = vadd.f32 %v3196_v45, %v5327_v18  ;;  %v3781_v30 = vadd.f32 %v4345_v8, %v3715_v31  ;;  %v4348_v31 = vld [vmem:[%s4500_s29 + $0x28] sm:$0xff] }
 0x3c2   : > { %v3142_v22 = vpop.f32.mrf.mxu2  ;;  %4330 = vmatmul.msk.f32.gmra.mxu3 %vm638_vm1, %v3453_v11 }
 0x3c3   : > { %v3389_v39 = vmul.f32 %v5417_v24, %v3356_v50  ;;  %v3813_v0 = vmax.f32 %v3781_v30, 0.0 }
 0x3c4   : > { %v2893_v61 = vpop.f32.mrf.mxu1 }
 0x3c5   : > { %3845 = vst.msk [vmem:[%s5614_s24] sm:$0xff] %vm294_vm0, %v3813_v0  ;;  %v2894_v15 = vadd.f32 %v2893_v61, %v2771_v46  ;;  %v3588_v18 = vpop.f32.mrf.mxu3  ;;  %v3422_v53 = vadd.f32 %v5427_v48, %v3389_v39 }
 0x3c6   : > { %v3683_v26 = vmul.f32 %v5594_v3, %v3588_v18 }
 0x3c7   : > { %v3197_v57 = vadd.f32 %v3139_v37, %v2894_v15  ;;  %v3454_v5 = vmax.f32 %v3422_v53, 0.0  ;;  %v2786_v15 = vpop.f32.mrf.mxu0 }
 0x3c8   : > { %v3716_v41 = vadd.f32 %v5601_v2, %v3683_v26 }
 0x3c9   : > { %v3325_v43 = vsel %vm3229_vm14, %v3197_v57, 0.0 }
 0x3ca   : > { %v3357_v62 = vadd.f32 %v3325_v43, %v5335_v58  ;;  %v3782_v17 = vadd.f32 %v4346_v44, %v3716_v41  ;;  %v3145_v10 = vpop.f32.mrf.mxu2  ;;  %4331 = vmatmul.msk.f32.gmra.mxu3 %vm638_vm1, %v3454_v5  ;;  %v4347_v58 = vld [vmem:[%s4500_s29 + $0x20] sm:$0xff]  ;;  %v707_v44 = vadd.s32 184, %v5082_v13  ;;  %v4349_v5 = vld [vmem:[%s4500_s29 + $0x30] sm:$0xff] }
 0x3cc   : > { %v3390_v46 = vmul.f32 %v5417_v24, %v3357_v62  ;;  %v3814_v23 = vmax.f32 %v3782_v17, 0.0  ;;  %v2896_v33 = vpop.f32.mrf.mxu1 }
 0x3cd   : > { %v2897_v34 = vadd.f32 %v2896_v33, %v2774_v55  ;;  %v3591_v14 = vpop.f32.mrf.mxu3 }
 0x3ce   : > { %3846 = vst.msk [vmem:[%s5614_s24 + $0x8] sm:$0xff] %vm294_vm0, %v3814_v23  ;;  %v3684_v42 = vmul.f32 %v5594_v3, %v3591_v14  ;;  %v3423_v19 = vadd.f32 %v5427_v48, %v3390_v46 }
 0x3cf   : > { %v3198_v56 = vadd.f32 %v3142_v22, %v2897_v34 }
 0x3d0   : > { %v3717_v40 = vadd.f32 %v5601_v2, %v3684_v42  ;;  %v3455_v27 = vmax.f32 %v3423_v19, 0.0 }
 0x3d1   : > { %v3358_v49 = vadd.f32 %v3198_v56, %v5342_v12  ;;  %v4350_v56 = vld [vmem:[%s4500_s29 + $0x38] sm:$0xff] }
 0x3d2   : > { %v3783_v37 = vadd.f32 %v4347_v58, %v3717_v40  ;;  %v3148_v55 = vpop.f32.mrf.mxu2  ;;  %4332 = vmatmul.msk.f32.gmra.mxu3 %vm638_vm1, %v3455_v27 }
 0x3d3   : > { %v3391_v21 = vmul.f32 %v5417_v24, %v3358_v49 }
 0x3d4   : > { %v3815_v16 = vmax.f32 %v3783_v37, 0.0  ;;  %v2899_v38 = vpop.f32.mrf.mxu1 }
 0x3d5   : > { %v2900_v8 = vadd.f32 %v2899_v38, %v2777_v6  ;;  %v3594_v52 = vpop.f32.mrf.mxu3  ;;  %v3424_v47 = vadd.f32 %v5427_v48, %v3391_v21 }
 0x3d6   : > { %3847 = vst.msk [vmem:[%s5614_s24 + $0x10] sm:$0xff] %vm294_vm0, %v3815_v16  ;;  %v3685_v12 = vmul.f32 %v5594_v3, %v3594_v52 }
 0x3d7   : > { %v3199_v45 = vadd.f32 %v3145_v10, %v2900_v8  ;;  %v3456_v11 = vmax.f32 %v3424_v47, 0.0  ;;  %v881_v10 = vand.u32 15, %v707_v44  ;;  %v709_v47 = vadd.s32 200, %v5082_v13 }
 0x3d8   : > { %v3718_v50 = vadd.f32 %v5601_v2, %v3685_v12 }
 0x3d9   : > { %v3327_v30 = vsel %vm3231_vm15, %v3199_v45, 0.0  ;;  %vm3233_vm2 = vcmp.lt.s32.totalorder %v881_v10, 15 }
 0x3da   : > { %v3359_v22 = vadd.f32 %v3327_v30, %v5350_v7  ;;  %v3784_v35 = vadd.f32 %v4348_v31, %v3718_v50  ;;  %v3151_v6 = vpop.f32.mrf.mxu2  ;;  %4333 = vmatmul.msk.f32.gmra.mxu3 %vm638_vm1, %v3456_v11 }
 0x3dc   : > { %v3392_v39 = vmul.f32 %v5417_v24, %v3359_v22  ;;  %v3816_v0 = vmax.f32 %v3784_v35, 0.0  ;;  %v2902_v61 = vpop.f32.mrf.mxu1  ;;  %v895_v22 = vand.u32 15, %v709_v47 }
 0x3dd   : > { %v2903_v18 = vadd.f32 %v2902_v61, %v2780_v20  ;;  %v3597_v53 = vpop.f32.mrf.mxu3 }
 0x3de   : > { %3848 = vst.msk [vmem:[%s5614_s24 + $0x18] sm:$0xff] %vm294_vm0, %v3816_v0  ;;  %v3686_v26 = vmul.f32 %v5594_v3, %v3597_v53  ;;  %v3425_v57 = vadd.f32 %v5427_v48, %v3392_v39  ;;  %vm3235_vm3 = vcmp.lt.s32.totalorder %v895_v22, 15 }
 0x3df   : > { %v3200_v7 = vadd.f32 %v3148_v55, %v2903_v18 }
 0x3e0   : > { %v3719_v41 = vadd.f32 %v5601_v2, %v3686_v26  ;;  %v3457_v43 = vmax.f32 %v3425_v57, 0.0  ;;  %v4352_v26 = vld [vmem:[%s4500_s29 + $0x48] sm:$0xff] }
 0x3e1   : > { %v3360_v62 = vadd.f32 %v3200_v7, %v5357_v36  ;;  %v2789_v36 = vpop.f32.mrf.mxu0 }
 0x3e2   : > { %v3785_v17 = vadd.f32 %v4349_v5, %v3719_v41  ;;  %v3154_v20 = vpop.f32.mrf.mxu2  ;;  %4334 = vmatmul.msk.f32.gmra.mxu3 %vm638_vm1, %v3457_v43 }
 0x3e3   : > { %v3393_v46 = vmul.f32 %v5417_v24, %v3360_v62 }
 0x3e4   : > { %v3817_v23 = vmax.f32 %v3785_v17, 0.0  ;;  %v2905_v33 = vpop.f32.mrf.mxu1 }
 0x3e5   : > { %v2906_v34 = vadd.f32 %v2905_v33, %v2783_v51  ;;  %v3600_v14 = vpop.f32.mrf.mxu3  ;;  %v3426_v42 = vadd.f32 %v5427_v48, %v3393_v46 }
 0x3e6   : > { %3849 = vst.msk [vmem:[%s5614_s24 + $0x20] sm:$0xff] %vm294_vm0, %v3817_v23  ;;  %v3687_v19 = vmul.f32 %v5594_v3, %v3600_v14  ;;  %v711_v14 = vadd.s32 216, %v5082_v13 }
 0x3e7   : > { %v3201_v32 = vadd.f32 %v3151_v6, %v2906_v34  ;;  %v3458_v58 = vmax.f32 %v3426_v42, 0.0  ;;  %v4353_v42 = vld [vmem:[%s4500_s29 + $0x50] sm:$0xff] }
 0x3e8   : > { %v3720_v40 = vadd.f32 %v5601_v2, %v3687_v19 }
 0x3e9   : > { %v3329_v27 = vsel %vm3233_vm2, %v3201_v32, 0.0  ;;  %v2792_v11 = vpop.f32.mrf.mxu0 }
 0x3ea   : > { %v3361_v49 = vadd.f32 %v3329_v27, %v5365_v60  ;;  %v3786_v37 = vadd.f32 %v4350_v56, %v3720_v40  ;;  %v3157_v55 = vpop.f32.mrf.mxu2  ;;  %4335 = vmatmul.msk.f32.gmra.mxu3 %vm638_vm1, %v3458_v58  ;;  %v4351_v60 = vld [vmem:[%s4500_s29 + $0x40] sm:$0xff]  ;;  %v909_v58 = vand.u32 15, %v711_v14 }
 0x3ec   : > { %v3394_v29 = vmul.f32 %v5417_v24, %v3361_v49  ;;  %v3818_v51 = vmax.f32 %v3786_v37, 0.0  ;;  %v2908_v21 = vpop.f32.mrf.mxu1  ;;  %vm3237_vm4 = vcmp.lt.s32.totalorder %v909_v58, 15 }
 0x3ed   : > { %v2909_v16 = vadd.f32 %v2908_v21, %v2786_v15  ;;  %v3603_v38 = vpop.f32.mrf.mxu3 }
 0x3ee   : > { %3850 = vst.msk [vmem:[%s5614_s24 + $0x28] sm:$0xff] %vm294_vm0, %v3818_v51  ;;  %v3688_v8 = vmul.f32 %v5594_v3, %v3603_v38  ;;  %v3427_v52 = vadd.f32 %v5427_v48, %v3394_v29 }
 0x3ef   : > { %v3202_v12 = vadd.f32 %v3154_v20, %v2909_v16  ;;  %v4354_v16 = vld [vmem:[%s4500_s29 + $0x58] sm:$0xff] }
 0x3f0   : > { %v3721_v45 = vadd.f32 %v5601_v2, %v3688_v8  ;;  %v3459_v31 = vmax.f32 %v3427_v52, 0.0 }
 0x3f1   : > { %v3362_v50 = vadd.f32 %v3202_v12, %v5372_v9  ;;  %v2795_v43 = vpop.f32.mrf.mxu0 }
 0x3f2   : > { %v3787_v30 = vadd.f32 %v4351_v60, %v3721_v45  ;;  %4336 = vmatmul.msk.f32.gmra.mxu3 %vm638_vm1, %v3459_v31  ;;  %v3160_v39 = vpop.f32.mrf.mxu2 }
 0x3f3   : > { %v3395_v35 = vmul.f32 %v5417_v24, %v3362_v50 }
 0x3f4   : > { %v3819_v6 = vmax.f32 %v3787_v30, 0.0  ;;  %v2911_v0 = vpop.f32.mrf.mxu1 }
 0x3f5   : > { %v2912_v61 = vadd.f32 %v2911_v0, %v2789_v36  ;;  %v3606_v15 = vpop.f32.mrf.mxu3  ;;  %v3428_v18 = vadd.f32 %v5427_v48, %v3395_v35  ;;  %v4355_v0 = vld [vmem:[%s4500_s29 + $0x60] sm:$0xff] }
 0x3f6   : > { %3851 = vst.msk [vmem:[%s5614_s24 + $0x30] sm:$0xff] %vm294_vm0, %v3819_v6  ;;  %v3689_v53 = vmul.f32 %v5594_v3, %v3606_v15  ;;  %v713_v6 = vadd.s32 232, %v5082_v13 }
 0x3f7   : > { %v3203_v9 = vadd.f32 %v3157_v55, %v2912_v61  ;;  %v3460_v57 = vmax.f32 %v3428_v18, 0.0 }
 0x3f8   : > { %v3722_v44 = vadd.f32 %v5601_v2, %v3689_v53 }
 0x3f9   : > { %v3331_v7 = vsel %vm3235_vm3, %v3203_v9, 0.0  ;;  %v2798_v37 = vpop.f32.mrf.mxu0 }
 0x3fa   : > { %v3363_v5 = vadd.f32 %v3331_v7, %v5380_v63  ;;  %v3788_v41 = vadd.f32 %v4352_v26, %v3722_v44  ;;  %4337 = vmatmul.msk.f32.gmra.mxu3 %vm638_vm1, %v3460_v57  ;;  %v3163_v23 = vpop.f32.mrf.mxu2  ;;  %v923_v26 = vand.u32 15, %v713_v6 }
 0x3fc   : > { %v3396_v62 = vmul.f32 %v5417_v24, %v3363_v5  ;;  %v3820_v17 = vmax.f32 %v3788_v41, 0.0  ;;  %v2914_v20 = vpop.f32.mrf.mxu1  ;;  %vm3239_vm5 = vcmp.lt.s32.totalorder %v923_v26, 15 }
 0x3fd   : > { %v2915_v10 = vadd.f32 %v2914_v20, %v2792_v11  ;;  %v3609_v46 = vpop.f32.mrf.mxu3 }
 0x3fe   : > { %3852 = vst.msk [vmem:[%s5614_s24 + $0x38] sm:$0xff] %vm294_vm0, %v3820_v17  ;;  %v3690_v33 = vmul.f32 %v5594_v3, %v3609_v46  ;;  %v3429_v34 = vadd.f32 %v5427_v48, %v3396_v62  ;;  %v4356_v17 = vld [vmem:[%s4500_s29 + $0x68] sm:$0xff] }
 0x3ff   : > { %v3204_v63 = vadd.f32 %v3160_v39, %v2915_v10 }
 0x400   : > { %v3723_v19 = vadd.f32 %v5601_v2, %v3690_v33  ;;  %v3461_v36 = vmax.f32 %v3429_v34, 0.0 }
 0x401   : > { %v3364_v32 = vadd.f32 %v3204_v63, %v5387_v4  ;;  %v2801_v39 = vpop.f32.mrf.mxu0 }
 0x402   : > { %v3789_v56 = vadd.f32 %v4353_v42, %v3723_v19  ;;  %4338 = vmatmul.msk.f32.gmra.mxu3 %vm638_vm1, %v3461_v36  ;;  %v3166_v8 = vpop.f32.mrf.mxu2 }
 0x403   : > { %v3397_v40 = vmul.f32 %v5417_v24, %v3364_v32 }
 0x404   : > { %v3821_v27 = vmax.f32 %v3789_v56, 0.0  ;;  %v2917_v49 = vpop.f32.mrf.mxu1 }
 0x405   : > { %v2918_v55 = vadd.f32 %v2917_v49, %v2795_v43  ;;  %v3612_v29 = vpop.f32.mrf.mxu3  ;;  %v3430_v51 = vadd.f32 %v5427_v48, %v3397_v40  ;;  %v715_v40 = vadd.s32 248, %v5082_v13 }
 0x406   : > { %3853 = vst.msk [vmem:[%s5614_s24 + $0x40] sm:$0xff] %vm294_vm0, %v3821_v27  ;;  %v3691_v21 = vmul.f32 %v5594_v3, %v3612_v29  ;;  %v4357_v27 = vld [vmem:[%s4500_s29 + $0x70] sm:$0xff] }
 0x407   : > { %v3205_v4 = vadd.f32 %v3163_v23, %v2918_v55  ;;  %v3462_v38 = vmax.f32 %v3430_v51, 0.0  ;;  %v937_v51 = vand.u32 15, %v715_v40 }
 0x408   : > { %v3724_v52 = vadd.f32 %v5601_v2, %v3691_v21 }
 0x409   : > { %v3333_v47 = vsel %vm3237_vm4, %v3205_v4, 0.0  ;;  %v2804_v46 = vpop.f32.mrf.mxu0  ;;  %vm3241_vm6 = vcmp.lt.s32.totalorder %v937_v51, 15 }
 0x40a   : > { %v3365_v12 = vadd.f32 %v3333_v47, %v5395_v28  ;;  %v3790_v60 = vadd.f32 %v4354_v16, %v3724_v52  ;;  %4339 = vmatmul.msk.f32.gmra.mxu3 %vm638_vm1, %v3462_v38  ;;  %v3169_v53 = vpop.f32.mrf.mxu2 }
 0x40c   : > { %v3398_v45 = vmul.f32 %v5417_v24, %v3365_v12  ;;  %v3822_v31 = vmax.f32 %v3790_v60, 0.0  ;;  %v2920_v11 = vpop.f32.mrf.mxu1  ;;  %v4358_v60 = vld [vmem:[%s4500_s29 + $0x78] sm:$0xff] }
 0x40d   : > { %v2921_v50 = vadd.f32 %v2920_v11, %v2798_v37  ;;  %v3615_v30 = vpop.f32.mrf.mxu3 }
 0x40e   : > { %3854 = vst.msk [vmem:[%s5614_s24 + $0x48] sm:$0xff] %vm294_vm0, %v3822_v31  ;;  %v3692_v22 = vmul.f32 %v5594_v3, %v3615_v30  ;;  %v3431_v35 = vadd.f32 %v5427_v48, %v3398_v45 }
 0x40f   : > { %v3206_v28 = vadd.f32 %v3166_v8, %v2921_v50 }
 0x410   : > { %v3725_v61 = vadd.f32 %v5601_v2, %v3692_v22  ;;  %v3463_v15 = vmax.f32 %v3431_v35, 0.0 }
 0x411   : > { %v3366_v18 = vadd.f32 %v3206_v28, %v5402_v1  ;;  %v2807_v21 = vpop.f32.mrf.mxu0 }
 0x412   : > { %v3791_v9 = vadd.f32 %v4355_v0, %v3725_v61  ;;  %4340 = vmatmul.msk.f32.gmra.mxu3 %vm638_vm1, %v3463_v15  ;;  %v3172_v14 = vpop.f32.mrf.mxu2  ;;  %v4359_v0 = vld [vmem:[%s4500_s29 + $0x80] sm:$0xff] }
 0x413   : > { %v3399_v57 = vmul.f32 %v5417_v24, %v3366_v18 }
 0x414   : > { %v3823_v44 = vmax.f32 %v3791_v9, 0.0  ;;  %v2923_v7 = vpop.f32.mrf.mxu1 }
 0x415   : > { %v2924_v5 = vadd.f32 %v2923_v7, %v2801_v39  ;;  %v3618_v41 = vpop.f32.mrf.mxu3  ;;  %v3432_v43 = vadd.f32 %v5427_v48, %v3399_v57 }
 0x416   : > { %3855 = vst.msk [vmem:[%s5614_s24 + $0x50] sm:$0xff] %vm294_vm0, %v3823_v44  ;;  %v3693_v62 = vmul.f32 %v5594_v3, %v3618_v41 }
 0x417   : > { %v3207_v1 = vadd.f32 %v3169_v53, %v2924_v5  ;;  %v3464_v20 = vmax.f32 %v3432_v43, 0.0  ;;  %v4361_v5 = vld [vmem:[%s4500_s29 + $0x90] sm:$0xff] }
 0x418   : > { %v3726_v10 = vadd.f32 %v5601_v2, %v3693_v62 }
 0x419   : > { %v3335_v23 = vsel %vm3239_vm5, %v3207_v1, 0.0 }
 0x41a   : > { %v3367_v33 = vadd.f32 %v3335_v23, %v5411_v54  ;;  %v3792_v34 = vadd.f32 %v4356_v17, %v3726_v10  ;;  %4341 = vmatmul.msk.f32.gmra.mxu3 %vm638_vm1, %v3464_v20  ;;  %v3175_v8 = vpop.f32.mrf.mxu2  ;;  %v4362_v20 = vld [vmem:[%s4500_s29 + $0x98] sm:$0xff] }
 0x41c   : > { %v3400_v63 = vmul.f32 %v5417_v24, %v3367_v33  ;;  %v3824_v42 = vmax.f32 %v3792_v34, 0.0  ;;  %v2926_v19 = vpop.f32.mrf.mxu1 }
 0x41d   : > { %v2927_v36 = vadd.f32 %v2926_v19, %v2804_v46  ;;  %v3621_v32 = vpop.f32.mrf.mxu3 }
 0x41e   : > { %3856 = vst.msk [vmem:[%s5614_s24 + $0x58] sm:$0xff] %vm294_vm0, %v3824_v42  ;;  %v3694_v56 = vmul.f32 %v5594_v3, %v3621_v32  ;;  %v3433_v58 = vadd.f32 %v5427_v48, %v3400_v63 }
 0x41f   : > { %v3208_v54 = vadd.f32 %v3172_v14, %v2927_v36  ;;  %v4363_v14 = vld [vmem:[%s4500_s29 + $0xa0] sm:$0xff] }
 0x420   : > { %v3727_v49 = vadd.f32 %v5601_v2, %v3694_v56  ;;  %v3465_v37 = vmax.f32 %v3433_v58, 0.0  ;;  %v4364_v56 = vld [vmem:[%s4500_s29 + $0xa8] sm:$0xff] }
 0x421   : > { %v3368_v55 = vadd.f32 %v3208_v54, %v5433_v25 }
 0x422   : > { %v3793_v29 = vadd.f32 %v4357_v27, %v3727_v49  ;;  %4342 = vmatmul.msk.f32.gmra.mxu3 %vm638_vm1, %v3465_v37  ;;  %v4365_v37 = vld [vmem:[%s4500_s29 + $0xb0] sm:$0xff] }
 0x423   : > { %v3401_v4 = vmul.f32 %v5417_v24, %v3368_v55 }
 0x424   : > { %v3825_v16 = vmax.f32 %v3793_v29, 0.0  ;;  %v2929_v38 = vpop.f32.mrf.mxu1 }
 0x425   : > { %v3434_v13 = vadd.f32 %v5427_v48, %v3401_v4  ;;  %v2930_v52 = vadd.f32 %v2929_v38, %v2807_v21  ;;  %v3624_v47 = vpop.f32.mrf.mxu3 }
 0x426   : > { %3857 = vst.msk [vmem:[%s5614_s24 + $0x60] sm:$0xff] %vm294_vm0, %v3825_v16  ;;  %v3695_v25 = vmul.f32 %v5594_v3, %v3624_v47  ;;  %v4366_v16 = vld [vmem:[%s4500_s29 + $0xb8] sm:$0xff] }
 0x427   : > { %v3466_v12 = vmax.f32 %v3434_v13, 0.0  ;;  %v3209_v45 = vadd.f32 %v3175_v8, %v2930_v52 }
 0x428   : > { %v3728_v31 = vadd.f32 %v5601_v2, %v3695_v25  ;;  %v4367_v25 = vld [vmem:[%s4500_s29 + $0xc0] sm:$0xff] }
 0x429   : > { %v3337_v11 = vsel %vm3241_vm6, %v3209_v45, 0.0 }
 0x42a   : > { %v3794_v50 = vadd.f32 %v4358_v60, %v3728_v31  ;;  %v3369_v30 = vadd.f32 %v3337_v11, %v5446_v59  ;;  %4343 = vmatmul.msk.f32.gmra.mxu3 %vm638_vm1, %v3466_v12 }
 0x42c   : > { %v3826_v22 = vmax.f32 %v3794_v50, 0.0  ;;  %v3402_v35 = vmul.f32 %v5417_v24, %v3369_v30  ;;  %v4368_v50 = vld [vmem:[%s4500_s29 + $0xc8] sm:$0xff] }
 0x42d   : > { %v3627_v6 = vpop.f32.mrf.mxu3 }
 0x42e   : > { %3858 = vst.msk [vmem:[%s5614_s24 + $0x68] sm:$0xff] %vm294_vm0, %v3826_v22  ;;  %v3435_v39 = vadd.f32 %v5427_v48, %v3402_v35  ;;  %v3696_v28 = vmul.f32 %v5594_v3, %v3627_v6  ;;  %v4360_v48 = vld [vmem:[%s4500_s29 + $0x88] sm:$0xff] }
 0x430   : > { %v3729_v61 = vadd.f32 %v5601_v2, %v3696_v28  ;;  %v3467_v15 = vmax.f32 %v3435_v39, 0.0  ;;  %v4369_v28 = vld [vmem:[%s4500_s29 + $0xd0] sm:$0xff] }
 0x432   : > { %v3795_v59 = vadd.f32 %v4359_v0, %v3729_v61  ;;  %4344 = vmatmul.msk.f32.gmra.mxu3 %vm638_vm1, %v3467_v15 }
 0x434   : > { %v3827_v18 = vmax.f32 %v3795_v59, 0.0 }
 0x435   : > { %v3630_v53 = vpop.f32.mrf.mxu3 }
 0x436   : > { %3859 = vst.msk [vmem:[%s5614_s24 + $0x70] sm:$0xff] %vm294_vm0, %v3827_v18  ;;  %v3697_v24 = vmul.f32 %v5594_v3, %v3630_v53  ;;  %v4370_v53 = vld [vmem:[%s4500_s29 + $0xd8] sm:$0xff] }
 0x438   : > { %v3730_v9 = vadd.f32 %v5601_v2, %v3697_v24 }
 0x43a   : > { %v3796_v26 = vadd.f32 %v4360_v48, %v3730_v9 }
 0x43c   : > { %v3828_v57 = vmax.f32 %v3796_v26, 0.0 }
 0x43d   : > { %v3633_v44 = vpop.f32.mrf.mxu3 }
 0x43e   : > { %3860 = vst.msk [vmem:[%s5614_s24 + $0x78] sm:$0xff] %vm294_vm0, %v3828_v57  ;;  %v3698_v7 = vmul.f32 %v5594_v3, %v3633_v44  ;;  %v4371_v44 = vld [vmem:[%s4500_s29 + $0xe0] sm:$0xff] }
 0x440   : > { %v3731_v41 = vadd.f32 %v5601_v2, %v3698_v7 }
 0x442   : > { %v3797_v43 = vadd.f32 %v4361_v5, %v3731_v41 }
 0x444   : > { %v3829_v62 = vmax.f32 %v3797_v43, 0.0 }
 0x445   : > { %v3636_v1 = vpop.f32.mrf.mxu3 }
 0x446   : > { %3861 = vst.msk [vmem:[%s5614_s24 + $0x80] sm:$0xff] %vm294_vm0, %v3829_v62  ;;  %v3699_v17 = vmul.f32 %v5594_v3, %v3636_v1  ;;  %v4372_v1 = vld [vmem:[%s4500_s29 + $0xe8] sm:$0xff] }
 0x448   : > { %v3732_v10 = vadd.f32 %v5601_v2, %v3699_v17 }
 0x44a   : > { %v3798_v46 = vadd.f32 %v4362_v20, %v3732_v10 }
 0x44c   : > { %v3830_v23 = vmax.f32 %v3798_v46, 0.0 }
 0x44d   : > { %v3639_v33 = vpop.f32.mrf.mxu3 }
 0x44e   : > { %3862 = vst.msk [vmem:[%s5614_s24 + $0x88] sm:$0xff] %vm294_vm0, %v3830_v23  ;;  %v3700_v34 = vmul.f32 %v5594_v3, %v3639_v33  ;;  %v4373_v33 = vld [vmem:[%s4500_s29 + $0xf0] sm:$0xff] }
 0x450   : > { %v3733_v63 = vadd.f32 %v5601_v2, %v3700_v34 }
 0x452   : > { %v3799_v42 = vadd.f32 %v4363_v14, %v3733_v63 }
 0x454   : > { %v3831_v19 = vmax.f32 %v3799_v42, 0.0 }
 0x455   : > { %v3642_v36 = vpop.f32.mrf.mxu3 }
 0x456   : > { %3863 = vst.msk [vmem:[%s5614_s24 + $0x90] sm:$0xff] %vm294_vm0, %v3831_v19  ;;  %v3701_v32 = vmul.f32 %v5594_v3, %v3642_v36  ;;  %v4374_v36 = vld [vmem:[%s4500_s29 + $0xf8] sm:$0xff] }
 0x458   : > { %v3734_v58 = vadd.f32 %v5601_v2, %v3701_v32 }
 0x45a   : > { %v3800_v40 = vadd.f32 %v4364_v56, %v3734_v58 }
 0x45c   : > { %v3832_v27 = vmax.f32 %v3800_v40, 0.0 }
 0x45d   : > { %v3645_v54 = vpop.f32.mrf.mxu3 }
 0x45e   : > { %3864 = vst.msk [vmem:[%s5614_s24 + $0x98] sm:$0xff] %vm294_vm0, %v3832_v27  ;;  %v3702_v49 = vmul.f32 %v5594_v3, %v3645_v54  ;;  %v4375_v54 = vld [vmem:[%s4500_s29 + $0x100] sm:$0xff] }
 0x460   : > { %v3735_v55 = vadd.f32 %v5601_v2, %v3702_v49 }
 0x462   : > { %v3801_v29 = vadd.f32 %v4365_v37, %v3735_v55 }
 0x464   : > { %v3833_v51 = vmax.f32 %v3801_v29, 0.0 }
 0x465   : > { %v3648_v21 = vpop.f32.mrf.mxu3 }
 0x466   : > { %3865 = vst.msk [vmem:[%s5614_s24 + $0xa0] sm:$0xff] %vm294_vm0, %v3833_v51  ;;  %v3703_v4 = vmul.f32 %v5594_v3, %v3648_v21  ;;  %v4376_v21 = vld [vmem:[%s4500_s29 + $0x108] sm:$0xff] }
 0x468   : > { %v3736_v38 = vadd.f32 %v5601_v2, %v3703_v4 }
 0x46a   : > { %v3802_v8 = vadd.f32 %v4366_v16, %v3736_v38 }
 0x46c   : > { %v3834_v13 = vmax.f32 %v3802_v8, 0.0 }
 0x46d   : > { %v3651_v52 = vpop.f32.mrf.mxu3 }
 0x46e   : > { %3866 = vst.msk [vmem:[%s5614_s24 + $0xa8] sm:$0xff] %vm294_vm0, %v3834_v13  ;;  %v3704_v47 = vmul.f32 %v5594_v3, %v3651_v52 }
 0x470   : > { %v3737_v12 = vadd.f32 %v5601_v2, %v3704_v47 }
 0x472   : > { %v3803_v60 = vadd.f32 %v4367_v25, %v3737_v12 }
 0x474   : > { %v3835_v45 = vmax.f32 %v3803_v60, 0.0 }
 0x475   : > { %v3654_v31 = vpop.f32.mrf.mxu3 }
 0x476   : > { %3867 = vst.msk [vmem:[%s5614_s24 + $0xb0] sm:$0xff] %vm294_vm0, %v3835_v45  ;;  %v3705_v11 = vmul.f32 %v5594_v3, %v3654_v31 }
 0x478   : > { %v3738_v30 = vadd.f32 %v5601_v2, %v3705_v11 }
 0x47a   : > { %v3804_v22 = vadd.f32 %v4368_v50, %v3738_v30 }
 0x47c   : > { %v3836_v35 = vmax.f32 %v3804_v22, 0.0 }
 0x47d   : > { %v3657_v6 = vpop.f32.mrf.mxu3 }
 0x47e   : > { %3868 = vst.msk [vmem:[%s5614_s24 + $0xb8] sm:$0xff] %vm294_vm0, %v3836_v35  ;;  %v3706_v39 = vmul.f32 %v5594_v3, %v3657_v6 }
 0x480   : > { %v3739_v0 = vadd.f32 %v5601_v2, %v3706_v39 }
 0x482   : > { %v3805_v61 = vadd.f32 %v4369_v28, %v3739_v0 }
 0x484   : > { %v3837_v15 = vmax.f32 %v3805_v61, 0.0 }
 0x485   : > { %v3660_v59 = vpop.f32.mrf.mxu3 }
 0x486   : > { %3869 = vst.msk [vmem:[%s5614_s24 + $0xc0] sm:$0xff] %vm294_vm0, %v3837_v15  ;;  %v3707_v18 = vmul.f32 %v5594_v3, %v3660_v59 }
 0x488   : > { %v3740_v24 = vadd.f32 %v5601_v2, %v3707_v18 }
 0x48a   : > { %v3806_v48 = vadd.f32 %v4370_v53, %v3740_v24 }
 0x48c   : > { %v3838_v9 = vmax.f32 %v3806_v48, 0.0 }
 0x48d   : > { %v3663_v26 = vpop.f32.mrf.mxu3 }
 0x48e   : > { %3870 = vst.msk [vmem:[%s5614_s24 + $0xc8] sm:$0xff] %vm294_vm0, %v3838_v9  ;;  %v3708_v57 = vmul.f32 %v5594_v3, %v3663_v26 }
 0x490   : > { %v3741_v7 = vadd.f32 %v5601_v2, %v3708_v57 }
 0x492   : > { %v3807_v5 = vadd.f32 %v4371_v44, %v3741_v7 }
 0x494   : > { %v3839_v41 = vmax.f32 %v3807_v5, 0.0 }
 0x495   : > { %v3666_v43 = vpop.f32.mrf.mxu3 }
 0x496   : > { %3871 = vst.msk [vmem:[%s5614_s24 + $0xd0] sm:$0xff] %vm294_vm0, %v3839_v41  ;;  %v3709_v62 = vmul.f32 %v5594_v3, %v3666_v43 }
 0x498   : > { %v3742_v17 = vadd.f32 %v5601_v2, %v3709_v62 }
 0x49a   : > { %v3808_v20 = vadd.f32 %v4372_v1, %v3742_v17 }
 0x49c   : > { %v3840_v10 = vmax.f32 %v3808_v20, 0.0 }
 0x49d   : > { %v3669_v46 = vpop.f32.mrf.mxu3 }
 0x49e   : > { %3872 = vst.msk [vmem:[%s5614_s24 + $0xd8] sm:$0xff] %vm294_vm0, %v3840_v10  ;;  %v3710_v23 = vmul.f32 %v5594_v3, %v3669_v46 }
 0x4a0   : > { %v3743_v34 = vadd.f32 %v5601_v2, %v3710_v23 }
 0x4a2   : > { %v3809_v14 = vadd.f32 %v4373_v33, %v3743_v34 }
 0x4a4   : > { %v3841_v63 = vmax.f32 %v3809_v14, 0.0 }
 0x4a5   : > { %v3672_v42 = vpop.f32.mrf.mxu3 }
 0x4a6   : > { %3873 = vst.msk [vmem:[%s5614_s24 + $0xe0] sm:$0xff] %vm294_vm0, %v3841_v63  ;;  %v3711_v19 = vmul.f32 %v5594_v3, %v3672_v42 }
 0x4a8   : > { %v3744_v32 = vadd.f32 %v5601_v2, %v3711_v19 }
 0x4aa   : > { %v3810_v56 = vadd.f32 %v4374_v36, %v3744_v32 }
 0x4ac   : > { %v3842_v58 = vmax.f32 %v3810_v56, 0.0 }
 0x4ad   : > { %v3675_v40 = vpop.f32.mrf.mxu3 }
 0x4ae   : > { %3874 = vst.msk [vmem:[%s5614_s24 + $0xe8] sm:$0xff] %vm294_vm0, %v3842_v58  ;;  %v3712_v27 = vmul.f32 %v5594_v3, %v3675_v40 }
 0x4b0   : > { %v3745_v49 = vadd.f32 %v5601_v2, %v3712_v27 }
 0x4b2   : > { %v3811_v37 = vadd.f32 %v4375_v54, %v3745_v49 }
 0x4b4   : > { %v3843_v55 = vmax.f32 %v3811_v37, 0.0 }
 0x4b5   : > { %v3678_v29 = vpop.f32.mrf.mxu3 }
 0x4b6   : > { %3875 = vst.msk [vmem:[%s5614_s24 + $0xf0] sm:$0xff] %vm294_vm0, %v3843_v55  ;;  %v3713_v51 = vmul.f32 %v5594_v3, %v3678_v29 }
 0x4b8   : > { %v3746_v4 = vadd.f32 %v5601_v2, %v3713_v51 }
 0x4ba   : > { %v3812_v16 = vadd.f32 %v4376_v21, %v3746_v4 }
 0x4bc   : > { %v3844_v38 = vmax.f32 %v3812_v16, 0.0 }
 0x4be   : > { %3876 = vst.msk [vmem:[%s5614_s24 + $0xf8] sm:$0xff] %vm294_vm0, %v3844_v38 }
 0x4bf PF: > { %s15_s20 = sadd.s32 1, %s4437_s20   ;;  %s5903_s18 = smov %s4433_s19 }
 0x4c0   : > { %p12_p5 = scmp.ge.s32.totalorder %s15_s20, 4   ;;  %s5904_s19 = smov %s5906_s21 }
 0x4c2   :  { %14 = sbr.rel (!%p12_p5) target bundleno = 2 (0x2), region = 84 }

</bundles_post_ra>
